<compile_context>
chip_gen: v6e
topology: v6e:2x2x1
jax: 0.10.0
libtpu: 0.0.40
codegen_flags: <defaults>
</compile_context>

<pallas_src>
import functools

import jax
import jax.numpy as jnp
from jax.experimental import pallas as pl
from jax.experimental.pallas import tpu as pltpu  # noqa: F401  (TPU backend)

_BN_EPS = 1e-5


# ----------------------------------------------------------------------------
# Pallas kernels
# ----------------------------------------------------------------------------
def _conv_gemm_kernel(w_ref, x_ref, b_ref, g_ref, be_ref, o_ref, *,
                      bn, activation, eps):
    """o (C_out, M) = epilogue( W (C_out,K) @ X (K,M) + b ).

    Epilogue = optional training-mode BatchNorm (stats over M) + activation.
    W, X are bf16; accumulation and epilogue are f32.
    """
    y = jnp.dot(w_ref[...], x_ref[...], preferred_element_type=jnp.float32)
    y = y + b_ref[...]                                   # (C_out, M)
    if bn:
        mean = jnp.mean(y, axis=1, keepdims=True)        # lane (XLU) reduce
        var = jnp.mean(jnp.square(y - mean), axis=1, keepdims=True)
        scale = g_ref[...] * jax.lax.rsqrt(var + eps)    # EUP rsqrt
        y = (y - mean) * scale + be_ref[...]
    if activation == "relu":
        y = jnp.maximum(y, 0.0)
    elif activation == "sigmoid":
        y = jax.nn.sigmoid(y)
    o_ref[...] = y.astype(o_ref.dtype)


def _convt_bn_relu_kernel(w_ref, x_ref, b_ref, g_ref, be_ref, o_ref, *,
                          bn, eps):
    """Phase-decomposed ConvTranspose2d(k=4, s=2, p=1) + fused BN + ReLU.

    w_ref: (4, C_out, K4) bf16   per-phase 2x2 weight matrices
    x_ref: (4, K4, M)     bf16   per-phase patches (M = N*H*W input pixels)
    o_ref: (4, C_out, M)  f32    per-phase outputs (interleaved in XLA glue)
    BN statistics are computed jointly over all 4 phases (= all output pixels).
    """
    ys = [jnp.dot(w_ref[p], x_ref[p], preferred_element_type=jnp.float32)
          + b_ref[...] for p in range(4)]
    if bn:
        m = ys[0].shape[1]
        cnt = 4.0 * m
        s1 = ys[0].sum(axis=1, keepdims=True)
        for p in range(1, 4):
            s1 = s1 + ys[p].sum(axis=1, keepdims=True)
        mean = s1 / cnt
        s2 = jnp.square(ys[0] - mean).sum(axis=1, keepdims=True)
        for p in range(1, 4):
            s2 = s2 + jnp.square(ys[p] - mean).sum(axis=1, keepdims=True)
        var = s2 / cnt
        scale = g_ref[...] * jax.lax.rsqrt(var + eps)
        shift = be_ref[...] - mean * scale
        ys = [y * scale + shift for y in ys]
    for p in range(4):
        o_ref[p] = jnp.maximum(ys[p], 0.0).astype(o_ref.dtype)


def _convt_relu_final_kernel(w_ref, x_ref, b_ref, wf_ref, bf_ref, o_ref):
    """Last decoder stage, fully fused:
    phase-decomposed ConvTranspose2d(nc->nc) + ReLU, then 1x1 Conv(nc->1)
    (per-pixel channel reduction) + bias + Sigmoid.  Output (4, 1, M).
    """
    for p in range(4):
        y = jnp.dot(w_ref[p], x_ref[p], preferred_element_type=jnp.float32)
        y = jnp.maximum(y + b_ref[...], 0.0)             # (C_out, M)
        z = jnp.sum(y * wf_ref[...], axis=0, keepdims=True) + bf_ref[...]
        o_ref[p] = jax.nn.sigmoid(z).astype(o_ref.dtype)  # EUP sigmoid


# ----------------------------------------------------------------------------
# pallas_call wrappers (grid=(1,), whole-array VMEM blocks — tiny problem)
# ----------------------------------------------------------------------------
def pallas_conv_gemm(wmat, patches, bias, gamma=None, beta=None,
                     activation="relu", eps=_BN_EPS):
    C_out, K = wmat.shape
    _, M = patches.shape
    bn = gamma is not None
    if not bn:
        gamma = jnp.ones((C_out,), jnp.float32)
        beta = jnp.zeros((C_out,), jnp.float32)
    kernel = functools.partial(_conv_gemm_kernel, bn=bn,
                               activation=activation, eps=eps)
    return pl.pallas_call(
        kernel,
        out_shape=jax.ShapeDtypeStruct((C_out, M), jnp.float32),
        grid=(1,),
        in_specs=[
            pl.BlockSpec((C_out, K), lambda i: (0, 0)),
            pl.BlockSpec((K, M), lambda i: (0, 0)),
            pl.BlockSpec((C_out, 1), lambda i: (0, 0)),
            pl.BlockSpec((C_out, 1), lambda i: (0, 0)),
            pl.BlockSpec((C_out, 1), lambda i: (0, 0)),
        ],
        out_specs=pl.BlockSpec((C_out, M), lambda i: (0, 0)),
    )(wmat.astype(jnp.bfloat16), patches.astype(jnp.bfloat16),
      bias.reshape(C_out, 1), gamma.reshape(C_out, 1), beta.reshape(C_out, 1))


def pallas_convt_gemm(wp, xp, bias, gamma=None, beta=None, eps=_BN_EPS):
    _, C_out, K4 = wp.shape
    _, _, M = xp.shape
    bn = gamma is not None
    if not bn:
        gamma = jnp.ones((C_out,), jnp.float32)
        beta = jnp.zeros((C_out,), jnp.float32)
    kernel = functools.partial(_convt_bn_relu_kernel, bn=bn, eps=eps)
    return pl.pallas_call(
        kernel,
        out_shape=jax.ShapeDtypeStruct((4, C_out, M), jnp.float32),
        grid=(1,),
        in_specs=[
            pl.BlockSpec((4, C_out, K4), lambda i: (0, 0, 0)),
            pl.BlockSpec((4, K4, M), lambda i: (0, 0, 0)),
            pl.BlockSpec((C_out, 1), lambda i: (0, 0)),
            pl.BlockSpec((C_out, 1), lambda i: (0, 0)),
            pl.BlockSpec((C_out, 1), lambda i: (0, 0)),
        ],
        out_specs=pl.BlockSpec((4, C_out, M), lambda i: (0, 0, 0)),
    )(wp.astype(jnp.bfloat16), xp.astype(jnp.bfloat16),
      bias.reshape(C_out, 1), gamma.reshape(C_out, 1), beta.reshape(C_out, 1))


def pallas_convt_relu_final(wp, xp, bias, wf, bf):
    _, C_out, K4 = wp.shape
    _, _, M = xp.shape
    return pl.pallas_call(
        _convt_relu_final_kernel,
        out_shape=jax.ShapeDtypeStruct((4, 1, M), jnp.float32),
        grid=(1,),
        in_specs=[
            pl.BlockSpec((4, C_out, K4), lambda i: (0, 0, 0)),
            pl.BlockSpec((4, K4, M), lambda i: (0, 0, 0)),
            pl.BlockSpec((C_out, 1), lambda i: (0, 0)),
            pl.BlockSpec((C_out, 1), lambda i: (0, 0)),
            pl.BlockSpec((1, 1), lambda i: (0, 0)),
        ],
        out_specs=pl.BlockSpec((4, 1, M), lambda i: (0, 0, 0)),
    )(wp.astype(jnp.bfloat16), xp.astype(jnp.bfloat16),
      bias.reshape(C_out, 1), wf.reshape(C_out, 1), bf.reshape(1, 1))


# ----------------------------------------------------------------------------
# XLA glue: channel-major im2col / ConvTranspose phase decomposition
# ----------------------------------------------------------------------------
def _im2col_nchw(x, kh, kw, stride, pad):
    """x (N,C,H,W) -> patches (C*kh*kw, N*Ho*Wo); K order: c major, (i,j) minor."""
    N, C, H, W = x.shape
    xp = jnp.pad(x, ((0, 0), (0, 0), (pad, pad), (pad, pad)))
    Hp, Wp = H + 2 * pad, W + 2 * pad
    Ho = (Hp - kh) // stride + 1
    Wo = (Wp - kw) // stride + 1
    cols = []
    for i in range(kh):
        for j in range(kw):
            cols.append(xp[:, :, i:i + (Ho - 1) * stride + 1:stride,
                              j:j + (Wo - 1) * stride + 1:stride])
    p = jnp.stack(cols, axis=2)                      # (N, C, kh*kw, Ho, Wo)
    p = jnp.transpose(p, (1, 2, 0, 3, 4))            # (C, kh*kw, N, Ho, Wo)
    return p.reshape(C * kh * kw, N * Ho * Wo), (N, Ho, Wo)


def conv2d_nchw(x, w, b, stride, pad, gamma=None, beta=None, activation="relu"):
    """PyTorch Conv2d: w (C_out, C_in, kh, kw). Returns NCHW."""
    C_out, C_in, kh, kw = w.shape
    patches, (N, Ho, Wo) = _im2col_nchw(x, kh, kw, stride, pad)
    wmat = w.reshape(C_out, C_in * kh * kw)
    y = pallas_conv_gemm(wmat, patches, b, gamma, beta, activation=activation)
    return jnp.transpose(y.reshape(C_out, N, Ho, Wo), (1, 0, 2, 3))


# ConvTranspose2d(k=4, s=2, p=1): output (2qy+ry, 2qx+rx) only touches kernel
# taps with fixed parity.  Per output phase (ry, rx) the layer is a stride-1
# 2x2 conv on the (pad=1) input with the tap subset below.
_KID = ((1, 3), (2, 0))   # kernel index  per (phase r, tap t)
_OFF = ((1, 0), (1, 2))   # padded-input offset per (phase r, tap t)


def _convt_phase_parts(x, w):
    """x (N,C_in,H,W), w (C_in,C_out,4,4) -> (wp (4,C_out,4C_in), xp (4,4C_in,M))."""
    N, C_in, H, W = x.shape
    _, C_out, _, _ = w.shape
    xpad = jnp.pad(x, ((0, 0), (0, 0), (1, 1), (1, 1)))
    patches, wmats = [], []
    for ry in range(2):
        for rx in range(2):
            cols, taps = [], []
            for ty in range(2):
                for tx in range(2):
                    oy, ox = _OFF[ry][ty], _OFF[rx][tx]
                    cols.append(xpad[:, :, oy:oy + H, ox:ox + W])     # (N,C,H,W)
                    taps.append(w[:, :, _KID[ry][ty], _KID[rx][tx]])  # (C_in,C_out)
            p = jnp.stack(cols, axis=2)                        # (N, C_in, 4, H, W)
            p = jnp.transpose(p, (1, 2, 0, 3, 4)).reshape(C_in * 4, N * H * W)
            patches.append(p)
            wm = jnp.transpose(jnp.stack(taps, axis=1), (2, 0, 1))
            wmats.append(wm.reshape(C_out, C_in * 4))
    return jnp.stack(wmats, axis=0), jnp.stack(patches, axis=0), (N, H, W)


def _interleave_phases(y, N, H, W):
    """y (4, C, N*H*W) phase-major -> (N, C, 2H, 2W)."""
    C = y.shape[1]
    y = y.reshape(2, 2, C, N, H, W)
    y = jnp.transpose(y, (3, 2, 4, 0, 5, 1))          # (N, C, H, ry, W, rx)
    return y.reshape(N, C, 2 * H, 2 * W)


def conv_transpose2d_nchw(x, w, b, gamma=None, beta=None):
    """PyTorch ConvTranspose2d(k=4,s=2,p=1): w (C_in, C_out, 4, 4) + BN + ReLU."""
    wp, xp, (N, H, W) = _convt_phase_parts(x, w)
    y = pallas_convt_gemm(wp, xp, b, gamma, beta)      # (4, C_out, N*H*W)
    return _interleave_phases(y, N, H, W)


def conv_transpose2d_final(x, w, b, wf, bf):
    """Fused: ConvTranspose2d(nc->nc)+ReLU, then 1x1 Conv(nc->1)+Sigmoid."""
    wp, xp, (N, H, W) = _convt_phase_parts(x, w)
    z = pallas_convt_relu_final(wp, xp, b, wf, bf)     # (4, 1, N*H*W)
    return _interleave_phases(z, N, H, W)


# ----------------------------------------------------------------------------
# Deterministic parameter init (PyTorch-style uniform fan-in bounds)
# ----------------------------------------------------------------------------
def init_params(key, nc=8):
    keys = iter(jax.random.split(key, 40))

    def conv_p(co, ci, kh=4, kw=4):
        bound = 1.0 / (ci * kh * kw) ** 0.5
        w = jax.random.uniform(next(keys), (co, ci, kh, kw), jnp.float32,
                               -bound, bound)
        b = jax.random.uniform(next(keys), (co,), jnp.float32, -bound, bound)
        return w, b

    def convt_p(ci, co, kh=4, kw=4):
        bound = 1.0 / (co * kh * kw) ** 0.5
        w = jax.random.uniform(next(keys), (ci, co, kh, kw), jnp.float32,
                               -bound, bound)
        b = jax.random.uniform(next(keys), (co,), jnp.float32, -bound, bound)
        return w, b

    def bn_p(c):
        return jnp.ones((c,), jnp.float32), jnp.zeros((c,), jnp.float32)

    enc = []
    for ci, co in [(3, nc), (nc, 2 * nc), (2 * nc, 4 * nc), (4 * nc, 8 * nc)]:
        w, b = conv_p(co, ci)
        g, be = bn_p(co)
        enc.append((w, b, g, be))

    dec = []
    for ci, co in [(8 * nc, 4 * nc), (4 * nc, 2 * nc), (2 * nc, nc)]:
        w, b = convt_p(ci, co)
        g, be = bn_p(co)
        dec.append((w, b, g, be))

    dec4 = convt_p(nc, nc)                 # ConvTranspose, ReLU only (no BN)
    final = conv_p(1, nc, 1, 1)            # 1x1 conv -> sigmoid

    return {"enc": enc, "dec": dec, "dec4": dec4, "final": final}


# ----------------------------------------------------------------------------
# Full forward pass (matches AutoEncoder.forward, training-mode BatchNorm)
# ----------------------------------------------------------------------------
def autoencoder_forward(params, x_nchw):
    x = x_nchw
    # encoder: 4x [conv k4 s2 p1 -> BN -> ReLU]   (BN/ReLU fused in kernel)
    for (w, b, g, be) in params["enc"]:
        x = conv2d_nchw(x, w, b, stride=2, pad=1, gamma=g, beta=be)
    # decoder: 3x [convT k4 s2 p1 -> BN -> ReLU]  (phase-decomposed, fused)
    for (w, b, g, be) in params["dec"]:
        x = conv_transpose2d_nchw(x, w, b, gamma=g, beta=be)
    # convT k4 s2 p1 -> ReLU -> 1x1 conv -> Sigmoid, all in one kernel
    w4, b4 = params["dec4"]
    wf, bf = params["final"]
    x = conv_transpose2d_final(x, w4, b4, wf, bf)
    return x                               # (N, 1, H, W)


if __name__ == "__main__":
    key = jax.random.PRNGKey(0)
    pkey, xkey = jax.random.split(key)
    nc = 8
    params = init_params(pkey, nc=nc)
    x = jax.random.normal(xkey, (2, 3, 16, 16), dtype=jnp.float32)  # NCHW

    fwd = jax.jit(autoencoder_forward)
    out = jax.block_until_ready(fwd(params, x))

    assert out.shape == (2, 1, 16, 16), out.shape
    assert bool(jnp.all(jnp.isfinite(out)))
    assert bool(jnp.all((out >= 0.0) & (out <= 1.0)))   # sigmoid range
    print("KERNEL_OK")
</pallas_src>

<mosaic_0001>
module attributes {stable_mosaic.version = 11 : i64} {
  func.func @_conv_gemm_kernel(%arg0: i32, %arg1: memref<8x48xbf16, #tpu.memory_space<vmem>>, %arg2: memref<48x128xbf16, #tpu.memory_space<vmem>>, %arg3: memref<8x1xf32, #tpu.memory_space<vmem>>, %arg4: memref<8x1xf32, #tpu.memory_space<vmem>>, %arg5: memref<8x1xf32, #tpu.memory_space<vmem>>, %arg6: memref<8x128xf32, #tpu.memory_space<vmem>>) attributes {dimension_semantics = [#tpu.dimension_semantics<arbitrary>], iteration_bounds = array<i64: 1>, scalar_prefetch = 0 : i64, scratch_operands = 0 : i64, tpu.core_type = #tpu.core_type<tc>, window_params = [{pipeline_mode = #tpu.pipeline_mode<synchronous>, transform_indices = @transform_0, window_bounds = array<i64: 8, 48>}, {pipeline_mode = #tpu.pipeline_mode<synchronous>, transform_indices = @transform_1, window_bounds = array<i64: 48, 128>}, {pipeline_mode = #tpu.pipeline_mode<synchronous>, transform_indices = @transform_2, window_bounds = array<i64: 8, 1>}, {pipeline_mode = #tpu.pipeline_mode<synchronous>, transform_indices = @transform_3, window_bounds = array<i64: 8, 1>}, {pipeline_mode = #tpu.pipeline_mode<synchronous>, transform_indices = @transform_4, window_bounds = array<i64: 8, 1>}, {pipeline_mode = #tpu.pipeline_mode<synchronous>, transform_indices = @transform_5, window_bounds = array<i64: 8, 128>}]} {
    %c0 = arith.constant 0 : index
    %c0_0 = arith.constant 0 : index
    %0 = vector.load %arg1[%c0, %c0_0] : memref<8x48xbf16, #tpu.memory_space<vmem>>, vector<8x48xbf16>
    %c0_1 = arith.constant 0 : index
    %c0_2 = arith.constant 0 : index
    %1 = vector.load %arg2[%c0_1, %c0_2] : memref<48x128xbf16, #tpu.memory_space<vmem>>, vector<48x128xbf16>
    %cst = arith.constant dense<0.000000e+00> : vector<8x128xf32>
    %2 = tpu.matmul %0, %1, %cst {dimension_numbers = #tpu.dot_dimension_numbers<[1], [0], [0], [1], [0, 0, 1, 1], [], []>} : vector<8x48xbf16>, vector<48x128xbf16>, vector<8x128xf32> -> vector<8x128xf32>
    %c0_3 = arith.constant 0 : index
    %c0_4 = arith.constant 0 : index
    %3 = vector.load %arg3[%c0_3, %c0_4] : memref<8x1xf32, #tpu.memory_space<vmem>>, vector<8x1xf32>
    %4 = vector.broadcast %3 : vector<8x1xf32> to vector<8x128xf32>
    %5 = arith.addf %2, %4 : vector<8x128xf32>
    %cst_5 = arith.constant dense<0.000000e+00> : vector<8xf32>
    %6 = vector.multi_reduction <add>, %5, %cst_5 [1] : vector<8x128xf32> to vector<8xf32>
    %7 = vector.shape_cast %6 : vector<8xf32> to vector<8x1xf32>
    %cst_6 = arith.constant 1.280000e+02 : f32
    %8 = vector.broadcast %cst_6 : f32 to vector<8x1xf32>
    %9 = arith.divf %7, %8 : vector<8x1xf32>
    %10 = vector.broadcast %9 : vector<8x1xf32> to vector<8x128xf32>
    %11 = arith.subf %5, %10 : vector<8x128xf32>
    %12 = arith.mulf %11, %11 : vector<8x128xf32>
    %cst_7 = arith.constant dense<0.000000e+00> : vector<8xf32>
    %13 = vector.multi_reduction <add>, %12, %cst_7 [1] : vector<8x128xf32> to vector<8xf32>
    %14 = vector.shape_cast %13 : vector<8xf32> to vector<8x1xf32>
    %cst_8 = arith.constant 1.280000e+02 : f32
    %15 = vector.broadcast %cst_8 : f32 to vector<8x1xf32>
    %16 = arith.divf %14, %15 : vector<8x1xf32>
    %c0_9 = arith.constant 0 : index
    %c0_10 = arith.constant 0 : index
    %17 = vector.load %arg4[%c0_9, %c0_10] : memref<8x1xf32, #tpu.memory_space<vmem>>, vector<8x1xf32>
    %cst_11 = arith.constant 9.99999974E-6 : f32
    %18 = vector.broadcast %cst_11 : f32 to vector<8x1xf32>
    %19 = arith.addf %16, %18 : vector<8x1xf32>
    %20 = math.rsqrt %19 : vector<8x1xf32>
    %21 = arith.mulf %17, %20 : vector<8x1xf32>
    %22 = vector.broadcast %9 : vector<8x1xf32> to vector<8x128xf32>
    %23 = arith.subf %5, %22 : vector<8x128xf32>
    %24 = vector.broadcast %21 : vector<8x1xf32> to vector<8x128xf32>
    %25 = arith.mulf %23, %24 : vector<8x128xf32>
    %c0_12 = arith.constant 0 : index
    %c0_13 = arith.constant 0 : index
    %26 = vector.load %arg5[%c0_12, %c0_13] : memref<8x1xf32, #tpu.memory_space<vmem>>, vector<8x1xf32>
    %27 = vector.broadcast %26 : vector<8x1xf32> to vector<8x128xf32>
    %28 = arith.addf %25, %27 : vector<8x128xf32>
    %cst_14 = arith.constant 0.000000e+00 : f32
    %29 = vector.broadcast %cst_14 : f32 to vector<8x128xf32>
    %30 = arith.maximumf %28, %29 : vector<8x128xf32>
    %c0_15 = arith.constant 0 : index
    %c0_16 = arith.constant 0 : index
    %31 = vector.load %arg6[%c0_15, %c0_16] : memref<8x128xf32, #tpu.memory_space<vmem>>, vector<8x128xf32>
    tpu.vector_store %arg6[%c0_15, %c0_16], %30 {strides = array<i32>} : memref<8x128xf32, #tpu.memory_space<vmem>>, vector<8x128xf32>,
    return
  }
  func.func @transform_0(%arg0: i32) -> (i32, i32) {
    %c0_i32 = arith.constant 0 : i32
    %c0_i32_0 = arith.constant 0 : i32
    %c0_i32_1 = arith.constant 0 : i32
    return %c0_i32, %c0_i32_0 : i32, i32
  }
  func.func @transform_1(%arg0: i32) -> (i32, i32) {
    %c0_i32 = arith.constant 0 : i32
    %c0_i32_0 = arith.constant 0 : i32
    %c0_i32_1 = arith.constant 0 : i32
    return %c0_i32, %c0_i32_0 : i32, i32
  }
  func.func @transform_2(%arg0: i32) -> (i32, i32) {
    %c0_i32 = arith.constant 0 : i32
    %c0_i32_0 = arith.constant 0 : i32
    %c0_i32_1 = arith.constant 0 : i32
    return %c0_i32, %c0_i32_0 : i32, i32
  }
  func.func @transform_3(%arg0: i32) -> (i32, i32) {
    %c0_i32 = arith.constant 0 : i32
    %c0_i32_0 = arith.constant 0 : i32
    %c0_i32_1 = arith.constant 0 : i32
    return %c0_i32, %c0_i32_0 : i32, i32
  }
  func.func @transform_4(%arg0: i32) -> (i32, i32) {
    %c0_i32 = arith.constant 0 : i32
    %c0_i32_0 = arith.constant 0 : i32
    %c0_i32_1 = arith.constant 0 : i32
    return %c0_i32, %c0_i32_0 : i32, i32
  }
  func.func @transform_5(%arg0: i32) -> (i32, i32) {
    %c0_i32 = arith.constant 0 : i32
    %c0_i32_0 = arith.constant 0 : i32
    %c0_i32_1 = arith.constant 0 : i32
    return %c0_i32, %c0_i32_0 : i32, i32
  }
}

module attributes {stable_mosaic.version = 11 : i64} {
  func.func @_conv_gemm_kernel(%arg0: i32, %arg1: memref<16x128xbf16, #tpu.memory_space<vmem>>, %arg2: memref<128x32xbf16, #tpu.memory_space<vmem>>, %arg3: memref<16x1xf32, #tpu.memory_space<vmem>>, %arg4: memref<16x1xf32, #tpu.memory_space<vmem>>, %arg5: memref<16x1xf32, #tpu.memory_space<vmem>>, %arg6: memref<16x32xf32, #tpu.memory_space<vmem>>) attributes {dimension_semantics = [#tpu.dimension_semantics<arbitrary>], iteration_bounds = array<i64: 1>, scalar_prefetch = 0 : i64, scratch_operands = 0 : i64, tpu.core_type = #tpu.core_type<tc>, window_params = [{pipeline_mode = #tpu.pipeline_mode<synchronous>, transform_indices = @transform_0, window_bounds = array<i64: 16, 128>}, {pipeline_mode = #tpu.pipeline_mode<synchronous>, transform_indices = @transform_1, window_bounds = array<i64: 128, 32>}, {pipeline_mode = #tpu.pipeline_mode<synchronous>, transform_indices = @transform_2, window_bounds = array<i64: 16, 1>}, {pipeline_mode = #tpu.pipeline_mode<synchronous>, transform_indices = @transform_3, window_bounds = array<i64: 16, 1>}, {pipeline_mode = #tpu.pipeline_mode<synchronous>, transform_indices = @transform_4, window_bounds = array<i64: 16, 1>}, {pipeline_mode = #tpu.pipeline_mode<synchronous>, transform_indices = @transform_5, window_bounds = array<i64: 16, 32>}]} {
    %c0 = arith.constant 0 : index
    %c0_0 = arith.constant 0 : index
    %0 = vector.load %arg1[%c0, %c0_0] : memref<16x128xbf16, #tpu.memory_space<vmem>>, vector<16x128xbf16>
    %c0_1 = arith.constant 0 : index
    %c0_2 = arith.constant 0 : index
    %1 = vector.load %arg2[%c0_1, %c0_2] : memref<128x32xbf16, #tpu.memory_space<vmem>>, vector<128x32xbf16>
    %cst = arith.constant dense<0.000000e+00> : vector<16x32xf32>
    %2 = tpu.matmul %0, %1, %cst {dimension_numbers = #tpu.dot_dimension_numbers<[1], [0], [0], [1], [0, 0, 1, 1], [], []>} : vector<16x128xbf16>, vector<128x32xbf16>, vector<16x32xf32> -> vector<16x32xf32>
    %c0_3 = arith.constant 0 : index
    %c0_4 = arith.constant 0 : index
    %3 = vector.load %arg3[%c0_3, %c0_4] : memref<16x1xf32, #tpu.memory_space<vmem>>, vector<16x1xf32>
    %4 = vector.broadcast %3 : vector<16x1xf32> to vector<16x32xf32>
    %5 = arith.addf %2, %4 : vector<16x32xf32>
    %cst_5 = arith.constant dense<0.000000e+00> : vector<16xf32>
    %6 = vector.multi_reduction <add>, %5, %cst_5 [1] : vector<16x32xf32> to vector<16xf32>
    %7 = vector.shape_cast %6 : vector<16xf32> to vector<16x1xf32>
    %cst_6 = arith.constant 3.200000e+01 : f32
    %8 = vector.broadcast %cst_6 : f32 to vector<16x1xf32>
    %9 = arith.divf %7, %8 : vector<16x1xf32>
    %10 = vector.broadcast %9 : vector<16x1xf32> to vector<16x32xf32>
    %11 = arith.subf %5, %10 : vector<16x32xf32>
    %12 = arith.mulf %11, %11 : vector<16x32xf32>
    %cst_7 = arith.constant dense<0.000000e+00> : vector<16xf32>
    %13 = vector.multi_reduction <add>, %12, %cst_7 [1] : vector<16x32xf32> to vector<16xf32>
    %14 = vector.shape_cast %13 : vector<16xf32> to vector<16x1xf32>
    %cst_8 = arith.constant 3.200000e+01 : f32
    %15 = vector.broadcast %cst_8 : f32 to vector<16x1xf32>
    %16 = arith.divf %14, %15 : vector<16x1xf32>
    %c0_9 = arith.constant 0 : index
    %c0_10 = arith.constant 0 : index
    %17 = vector.load %arg4[%c0_9, %c0_10] : memref<16x1xf32, #tpu.memory_space<vmem>>, vector<16x1xf32>
    %cst_11 = arith.constant 9.99999974E-6 : f32
    %18 = vector.broadcast %cst_11 : f32 to vector<16x1xf32>
    %19 = arith.addf %16, %18 : vector<16x1xf32>
    %20 = math.rsqrt %19 : vector<16x1xf32>
    %21 = arith.mulf %17, %20 : vector<16x1xf32>
    %22 = vector.broadcast %9 : vector<16x1xf32> to vector<16x32xf32>
    %23 = arith.subf %5, %22 : vector<16x32xf32>
    %24 = vector.broadcast %21 : vector<16x1xf32> to vector<16x32xf32>
    %25 = arith.mulf %23, %24 : vector<16x32xf32>
    %c0_12 = arith.constant 0 : index
    %c0_13 = arith.constant 0 : index
    %26 = vector.load %arg5[%c0_12, %c0_13] : memref<16x1xf32, #tpu.memory_space<vmem>>, vector<16x1xf32>
    %27 = vector.broadcast %26 : vector<16x1xf32> to vector<16x32xf32>
    %28 = arith.addf %25, %27 : vector<16x32xf32>
    %cst_14 = arith.constant 0.000000e+00 : f32
    %29 = vector.broadcast %cst_14 : f32 to vector<16x32xf32>
    %30 = arith.maximumf %28, %29 : vector<16x32xf32>
    %c0_15 = arith.constant 0 : index
    %c0_16 = arith.constant 0 : index
    %31 = vector.load %arg6[%c0_15, %c0_16] : memref<16x32xf32, #tpu.memory_space<vmem>>, vector<16x32xf32>
    tpu.vector_store %arg6[%c0_15, %c0_16], %30 {strides = array<i32>} : memref<16x32xf32, #tpu.memory_space<vmem>>, vector<16x32xf32>,
    return
  }
  func.func @transform_0(%arg0: i32) -> (i32, i32) {
    %c0_i32 = arith.constant 0 : i32
    %c0_i32_0 = arith.constant 0 : i32
    %c0_i32_1 = arith.constant 0 : i32
    return %c0_i32, %c0_i32_0 : i32, i32
  }
  func.func @transform_1(%arg0: i32) -> (i32, i32) {
    %c0_i32 = arith.constant 0 : i32
    %c0_i32_0 = arith.constant 0 : i32
    %c0_i32_1 = arith.constant 0 : i32
    return %c0_i32, %c0_i32_0 : i32, i32
  }
  func.func @transform_2(%arg0: i32) -> (i32, i32) {
    %c0_i32 = arith.constant 0 : i32
    %c0_i32_0 = arith.constant 0 : i32
    %c0_i32_1 = arith.constant 0 : i32
    return %c0_i32, %c0_i32_0 : i32, i32
  }
  func.func @transform_3(%arg0: i32) -> (i32, i32) {
    %c0_i32 = arith.constant 0 : i32
    %c0_i32_0 = arith.constant 0 : i32
    %c0_i32_1 = arith.constant 0 : i32
    return %c0_i32, %c0_i32_0 : i32, i32
  }
  func.func @transform_4(%arg0: i32) -> (i32, i32) {
    %c0_i32 = arith.constant 0 : i32
    %c0_i32_0 = arith.constant 0 : i32
    %c0_i32_1 = arith.constant 0 : i32
    return %c0_i32, %c0_i32_0 : i32, i32
  }
  func.func @transform_5(%arg0: i32) -> (i32, i32) {
    %c0_i32 = arith.constant 0 : i32
    %c0_i32_0 = arith.constant 0 : i32
    %c0_i32_1 = arith.constant 0 : i32
    return %c0_i32, %c0_i32_0 : i32, i32
  }
}

module attributes {stable_mosaic.version = 11 : i64} {
  func.func @_conv_gemm_kernel(%arg0: i32, %arg1: memref<32x256xbf16, #tpu.memory_space<vmem>>, %arg2: memref<256x8xbf16, #tpu.memory_space<vmem>>, %arg3: memref<32x1xf32, #tpu.memory_space<vmem>>, %arg4: memref<32x1xf32, #tpu.memory_space<vmem>>, %arg5: memref<32x1xf32, #tpu.memory_space<vmem>>, %arg6: memref<32x8xf32, #tpu.memory_space<vmem>>) attributes {dimension_semantics = [#tpu.dimension_semantics<arbitrary>], iteration_bounds = array<i64: 1>, scalar_prefetch = 0 : i64, scratch_operands = 0 : i64, tpu.core_type = #tpu.core_type<tc>, window_params = [{pipeline_mode = #tpu.pipeline_mode<synchronous>, transform_indices = @transform_0, window_bounds = array<i64: 32, 256>}, {pipeline_mode = #tpu.pipeline_mode<synchronous>, transform_indices = @transform_1, window_bounds = array<i64: 256, 8>}, {pipeline_mode = #tpu.pipeline_mode<synchronous>, transform_indices = @transform_2, window_bounds = array<i64: 32, 1>}, {pipeline_mode = #tpu.pipeline_mode<synchronous>, transform_indices = @transform_3, window_bounds = array<i64: 32, 1>}, {pipeline_mode = #tpu.pipeline_mode<synchronous>, transform_indices = @transform_4, window_bounds = array<i64: 32, 1>}, {pipeline_mode = #tpu.pipeline_mode<synchronous>, transform_indices = @transform_5, window_bounds = array<i64: 32, 8>}]} {
    %c0 = arith.constant 0 : index
    %c0_0 = arith.constant 0 : index
    %0 = vector.load %arg1[%c0, %c0_0] : memref<32x256xbf16, #tpu.memory_space<vmem>>, vector<32x256xbf16>
    %c0_1 = arith.constant 0 : index
    %c0_2 = arith.constant 0 : index
    %1 = vector.load %arg2[%c0_1, %c0_2] : memref<256x8xbf16, #tpu.memory_space<vmem>>, vector<256x8xbf16>
    %cst = arith.constant dense<0.000000e+00> : vector<32x8xf32>
    %2 = tpu.matmul %0, %1, %cst {dimension_numbers = #tpu.dot_dimension_numbers<[1], [0], [0], [1], [0, 0, 1, 1], [], []>} : vector<32x256xbf16>, vector<256x8xbf16>, vector<32x8xf32> -> vector<32x8xf32>
    %c0_3 = arith.constant 0 : index
    %c0_4 = arith.constant 0 : index
    %3 = vector.load %arg3[%c0_3, %c0_4] : memref<32x1xf32, #tpu.memory_space<vmem>>, vector<32x1xf32>
    %4 = vector.broadcast %3 : vector<32x1xf32> to vector<32x8xf32>
    %5 = arith.addf %2, %4 : vector<32x8xf32>
    %cst_5 = arith.constant dense<0.000000e+00> : vector<32xf32>
    %6 = vector.multi_reduction <add>, %5, %cst_5 [1] : vector<32x8xf32> to vector<32xf32>
    %7 = vector.shape_cast %6 : vector<32xf32> to vector<32x1xf32>
    %cst_6 = arith.constant 8.000000e+00 : f32
    %8 = vector.broadcast %cst_6 : f32 to vector<32x1xf32>
    %9 = arith.divf %7, %8 : vector<32x1xf32>
    %10 = vector.broadcast %9 : vector<32x1xf32> to vector<32x8xf32>
    %11 = arith.subf %5, %10 : vector<32x8xf32>
    %12 = arith.mulf %11, %11 : vector<32x8xf32>
    %cst_7 = arith.constant dense<0.000000e+00> : vector<32xf32>
    %13 = vector.multi_reduction <add>, %12, %cst_7 [1] : vector<32x8xf32> to vector<32xf32>
    %14 = vector.shape_cast %13 : vector<32xf32> to vector<32x1xf32>
    %cst_8 = arith.constant 8.000000e+00 : f32
    %15 = vector.broadcast %cst_8 : f32 to vector<32x1xf32>
    %16 = arith.divf %14, %15 : vector<32x1xf32>
    %c0_9 = arith.constant 0 : index
    %c0_10 = arith.constant 0 : index
    %17 = vector.load %arg4[%c0_9, %c0_10] : memref<32x1xf32, #tpu.memory_space<vmem>>, vector<32x1xf32>
    %cst_11 = arith.constant 9.99999974E-6 : f32
    %18 = vector.broadcast %cst_11 : f32 to vector<32x1xf32>
    %19 = arith.addf %16, %18 : vector<32x1xf32>
    %20 = math.rsqrt %19 : vector<32x1xf32>
    %21 = arith.mulf %17, %20 : vector<32x1xf32>
    %22 = vector.broadcast %9 : vector<32x1xf32> to vector<32x8xf32>
    %23 = arith.subf %5, %22 : vector<32x8xf32>
    %24 = vector.broadcast %21 : vector<32x1xf32> to vector<32x8xf32>
    %25 = arith.mulf %23, %24 : vector<32x8xf32>
    %c0_12 = arith.constant 0 : index
    %c0_13 = arith.constant 0 : index
    %26 = vector.load %arg5[%c0_12, %c0_13] : memref<32x1xf32, #tpu.memory_space<vmem>>, vector<32x1xf32>
    %27 = vector.broadcast %26 : vector<32x1xf32> to vector<32x8xf32>
    %28 = arith.addf %25, %27 : vector<32x8xf32>
    %cst_14 = arith.constant 0.000000e+00 : f32
    %29 = vector.broadcast %cst_14 : f32 to vector<32x8xf32>
    %30 = arith.maximumf %28, %29 : vector<32x8xf32>
    %c0_15 = arith.constant 0 : index
    %c0_16 = arith.constant 0 : index
    %31 = vector.load %arg6[%c0_15, %c0_16] : memref<32x8xf32, #tpu.memory_space<vmem>>, vector<32x8xf32>
    tpu.vector_store %arg6[%c0_15, %c0_16], %30 {strides = array<i32>} : memref<32x8xf32, #tpu.memory_space<vmem>>, vector<32x8xf32>,
    return
  }
  func.func @transform_0(%arg0: i32) -> (i32, i32) {
    %c0_i32 = arith.constant 0 : i32
    %c0_i32_0 = arith.constant 0 : i32
    %c0_i32_1 = arith.constant 0 : i32
    return %c0_i32, %c0_i32_0 : i32, i32
  }
  func.func @transform_1(%arg0: i32) -> (i32, i32) {
    %c0_i32 = arith.constant 0 : i32
    %c0_i32_0 = arith.constant 0 : i32
    %c0_i32_1 = arith.constant 0 : i32
    return %c0_i32, %c0_i32_0 : i32, i32
  }
  func.func @transform_2(%arg0: i32) -> (i32, i32) {
    %c0_i32 = arith.constant 0 : i32
    %c0_i32_0 = arith.constant 0 : i32
    %c0_i32_1 = arith.constant 0 : i32
    return %c0_i32, %c0_i32_0 : i32, i32
  }
  func.func @transform_3(%arg0: i32) -> (i32, i32) {
    %c0_i32 = arith.constant 0 : i32
    %c0_i32_0 = arith.constant 0 : i32
    %c0_i32_1 = arith.constant 0 : i32
    return %c0_i32, %c0_i32_0 : i32, i32
  }
  func.func @transform_4(%arg0: i32) -> (i32, i32) {
    %c0_i32 = arith.constant 0 : i32
    %c0_i32_0 = arith.constant 0 : i32
    %c0_i32_1 = arith.constant 0 : i32
    return %c0_i32, %c0_i32_0 : i32, i32
  }
  func.func @transform_5(%arg0: i32) -> (i32, i32) {
    %c0_i32 = arith.constant 0 : i32
    %c0_i32_0 = arith.constant 0 : i32
    %c0_i32_1 = arith.constant 0 : i32
    return %c0_i32, %c0_i32_0 : i32, i32
  }
}

module attributes {stable_mosaic.version = 11 : i64} {
  func.func @_conv_gemm_kernel(%arg0: i32, %arg1: memref<64x512xbf16, #tpu.memory_space<vmem>>, %arg2: memref<512x2xbf16, #tpu.memory_space<vmem>>, %arg3: memref<64x1xf32, #tpu.memory_space<vmem>>, %arg4: memref<64x1xf32, #tpu.memory_space<vmem>>, %arg5: memref<64x1xf32, #tpu.memory_space<vmem>>, %arg6: memref<64x2xf32, #tpu.memory_space<vmem>>) attributes {dimension_semantics = [#tpu.dimension_semantics<arbitrary>], iteration_bounds = array<i64: 1>, scalar_prefetch = 0 : i64, scratch_operands = 0 : i64, tpu.core_type = #tpu.core_type<tc>, window_params = [{pipeline_mode = #tpu.pipeline_mode<synchronous>, transform_indices = @transform_0, window_bounds = array<i64: 64, 512>}, {pipeline_mode = #tpu.pipeline_mode<synchronous>, transform_indices = @transform_1, window_bounds = array<i64: 512, 2>}, {pipeline_mode = #tpu.pipeline_mode<synchronous>, transform_indices = @transform_2, window_bounds = array<i64: 64, 1>}, {pipeline_mode = #tpu.pipeline_mode<synchronous>, transform_indices = @transform_3, window_bounds = array<i64: 64, 1>}, {pipeline_mode = #tpu.pipeline_mode<synchronous>, transform_indices = @transform_4, window_bounds = array<i64: 64, 1>}, {pipeline_mode = #tpu.pipeline_mode<synchronous>, transform_indices = @transform_5, window_bounds = array<i64: 64, 2>}]} {
    %c0 = arith.constant 0 : index
    %c0_0 = arith.constant 0 : index
    %0 = vector.load %arg1[%c0, %c0_0] : memref<64x512xbf16, #tpu.memory_space<vmem>>, vector<64x512xbf16>
    %c0_1 = arith.constant 0 : index
    %c0_2 = arith.constant 0 : index
    %1 = vector.load %arg2[%c0_1, %c0_2] : memref<512x2xbf16, #tpu.memory_space<vmem>>, vector<512x2xbf16>
    %cst = arith.constant dense<0.000000e+00> : vector<64x2xf32>
    %2 = tpu.matmul %0, %1, %cst {dimension_numbers = #tpu.dot_dimension_numbers<[1], [0], [0], [1], [0, 0, 1, 1], [], []>} : vector<64x512xbf16>, vector<512x2xbf16>, vector<64x2xf32> -> vector<64x2xf32>
    %c0_3 = arith.constant 0 : index
    %c0_4 = arith.constant 0 : index
    %3 = vector.load %arg3[%c0_3, %c0_4] : memref<64x1xf32, #tpu.memory_space<vmem>>, vector<64x1xf32>
    %4 = vector.broadcast %3 : vector<64x1xf32> to vector<64x2xf32>
    %5 = arith.addf %2, %4 : vector<64x2xf32>
    %cst_5 = arith.constant dense<0.000000e+00> : vector<64xf32>
    %6 = vector.multi_reduction <add>, %5, %cst_5 [1] : vector<64x2xf32> to vector<64xf32>
    %7 = vector.shape_cast %6 : vector<64xf32> to vector<64x1xf32>
    %cst_6 = arith.constant 2.000000e+00 : f32
    %8 = vector.broadcast %cst_6 : f32 to vector<64x1xf32>
    %9 = arith.divf %7, %8 : vector<64x1xf32>
    %10 = vector.broadcast %9 : vector<64x1xf32> to vector<64x2xf32>
    %11 = arith.subf %5, %10 : vector<64x2xf32>
    %12 = arith.mulf %11, %11 : vector<64x2xf32>
    %cst_7 = arith.constant dense<0.000000e+00> : vector<64xf32>
    %13 = vector.multi_reduction <add>, %12, %cst_7 [1] : vector<64x2xf32> to vector<64xf32>
    %14 = vector.shape_cast %13 : vector<64xf32> to vector<64x1xf32>
    %cst_8 = arith.constant 2.000000e+00 : f32
    %15 = vector.broadcast %cst_8 : f32 to vector<64x1xf32>
    %16 = arith.divf %14, %15 : vector<64x1xf32>
    %c0_9 = arith.constant 0 : index
    %c0_10 = arith.constant 0 : index
    %17 = vector.load %arg4[%c0_9, %c0_10] : memref<64x1xf32, #tpu.memory_space<vmem>>, vector<64x1xf32>
    %cst_11 = arith.constant 9.99999974E-6 : f32
    %18 = vector.broadcast %cst_11 : f32 to vector<64x1xf32>
    %19 = arith.addf %16, %18 : vector<64x1xf32>
    %20 = math.rsqrt %19 : vector<64x1xf32>
    %21 = arith.mulf %17, %20 : vector<64x1xf32>
    %22 = vector.broadcast %9 : vector<64x1xf32> to vector<64x2xf32>
    %23 = arith.subf %5, %22 : vector<64x2xf32>
    %24 = vector.broadcast %21 : vector<64x1xf32> to vector<64x2xf32>
    %25 = arith.mulf %23, %24 : vector<64x2xf32>
    %c0_12 = arith.constant 0 : index
    %c0_13 = arith.constant 0 : index
    %26 = vector.load %arg5[%c0_12, %c0_13] : memref<64x1xf32, #tpu.memory_space<vmem>>, vector<64x1xf32>
    %27 = vector.broadcast %26 : vector<64x1xf32> to vector<64x2xf32>
    %28 = arith.addf %25, %27 : vector<64x2xf32>
    %cst_14 = arith.constant 0.000000e+00 : f32
    %29 = vector.broadcast %cst_14 : f32 to vector<64x2xf32>
    %30 = arith.maximumf %28, %29 : vector<64x2xf32>
    %c0_15 = arith.constant 0 : index
    %c0_16 = arith.constant 0 : index
    %31 = vector.load %arg6[%c0_15, %c0_16] : memref<64x2xf32, #tpu.memory_space<vmem>>, vector<64x2xf32>
    tpu.vector_store %arg6[%c0_15, %c0_16], %30 {strides = array<i32>} : memref<64x2xf32, #tpu.memory_space<vmem>>, vector<64x2xf32>,
    return
  }
  func.func @transform_0(%arg0: i32) -> (i32, i32) {
    %c0_i32 = arith.constant 0 : i32
    %c0_i32_0 = arith.constant 0 : i32
    %c0_i32_1 = arith.constant 0 : i32
    return %c0_i32, %c0_i32_0 : i32, i32
  }
  func.func @transform_1(%arg0: i32) -> (i32, i32) {
    %c0_i32 = arith.constant 0 : i32
    %c0_i32_0 = arith.constant 0 : i32
    %c0_i32_1 = arith.constant 0 : i32
    return %c0_i32, %c0_i32_0 : i32, i32
  }
  func.func @transform_2(%arg0: i32) -> (i32, i32) {
    %c0_i32 = arith.constant 0 : i32
    %c0_i32_0 = arith.constant 0 : i32
    %c0_i32_1 = arith.constant 0 : i32
    return %c0_i32, %c0_i32_0 : i32, i32
  }
  func.func @transform_3(%arg0: i32) -> (i32, i32) {
    %c0_i32 = arith.constant 0 : i32
    %c0_i32_0 = arith.constant 0 : i32
    %c0_i32_1 = arith.constant 0 : i32
    return %c0_i32, %c0_i32_0 : i32, i32
  }
  func.func @transform_4(%arg0: i32) -> (i32, i32) {
    %c0_i32 = arith.constant 0 : i32
    %c0_i32_0 = arith.constant 0 : i32
    %c0_i32_1 = arith.constant 0 : i32
    return %c0_i32, %c0_i32_0 : i32, i32
  }
  func.func @transform_5(%arg0: i32) -> (i32, i32) {
    %c0_i32 = arith.constant 0 : i32
    %c0_i32_0 = arith.constant 0 : i32
    %c0_i32_1 = arith.constant 0 : i32
    return %c0_i32, %c0_i32_0 : i32, i32
  }
}

module attributes {stable_mosaic.version = 11 : i64} {
  func.func @_convt_bn_relu_kernel(%arg0: i32, %arg1: memref<4x32x256xbf16, #tpu.memory_space<vmem>>, %arg2: memref<4x256x2xbf16, #tpu.memory_space<vmem>>, %arg3: memref<32x1xf32, #tpu.memory_space<vmem>>, %arg4: memref<32x1xf32, #tpu.memory_space<vmem>>, %arg5: memref<32x1xf32, #tpu.memory_space<vmem>>, %arg6: memref<4x32x2xf32, #tpu.memory_space<vmem>>) attributes {dimension_semantics = [#tpu.dimension_semantics<arbitrary>], iteration_bounds = array<i64: 1>, scalar_prefetch = 0 : i64, scratch_operands = 0 : i64, tpu.core_type = #tpu.core_type<tc>, window_params = [{pipeline_mode = #tpu.pipeline_mode<synchronous>, transform_indices = @transform_0, window_bounds = array<i64: 4, 32, 256>}, {pipeline_mode = #tpu.pipeline_mode<synchronous>, transform_indices = @transform_1, window_bounds = array<i64: 4, 256, 2>}, {pipeline_mode = #tpu.pipeline_mode<synchronous>, transform_indices = @transform_2, window_bounds = array<i64: 32, 1>}, {pipeline_mode = #tpu.pipeline_mode<synchronous>, transform_indices = @transform_3, window_bounds = array<i64: 32, 1>}, {pipeline_mode = #tpu.pipeline_mode<synchronous>, transform_indices = @transform_4, window_bounds = array<i64: 32, 1>}, {pipeline_mode = #tpu.pipeline_mode<synchronous>, transform_indices = @transform_5, window_bounds = array<i64: 4, 32, 2>}]} {
    %c0 = arith.constant 0 : index
    %c0_0 = arith.constant 0 : index
    %c0_1 = arith.constant 0 : index
    %0 = vector.load %arg1[%c0, %c0_0, %c0_1] : memref<4x32x256xbf16, #tpu.memory_space<vmem>>, vector<1x32x256xbf16>
    %1 = vector.shape_cast %0 : vector<1x32x256xbf16> to vector<32x256xbf16>
    %c0_2 = arith.constant 0 : index
    %c0_3 = arith.constant 0 : index
    %c0_4 = arith.constant 0 : index
    %2 = vector.load %arg2[%c0_2, %c0_3, %c0_4] : memref<4x256x2xbf16, #tpu.memory_space<vmem>>, vector<1x256x2xbf16>
    %3 = vector.shape_cast %2 : vector<1x256x2xbf16> to vector<256x2xbf16>
    %cst = arith.constant dense<0.000000e+00> : vector<32x2xf32>
    %4 = tpu.matmul %1, %3, %cst {dimension_numbers = #tpu.dot_dimension_numbers<[1], [0], [0], [1], [0, 0, 1, 1], [], []>} : vector<32x256xbf16>, vector<256x2xbf16>, vector<32x2xf32> -> vector<32x2xf32>
    %c0_5 = arith.constant 0 : index
    %c0_6 = arith.constant 0 : index
    %5 = vector.load %arg3[%c0_5, %c0_6] : memref<32x1xf32, #tpu.memory_space<vmem>>, vector<32x1xf32>
    %6 = vector.broadcast %5 : vector<32x1xf32> to vector<32x2xf32>
    %7 = arith.addf %4, %6 : vector<32x2xf32>
    %c1 = arith.constant 1 : index
    %c0_7 = arith.constant 0 : index
    %c0_8 = arith.constant 0 : index
    %8 = vector.load %arg1[%c1, %c0_7, %c0_8] : memref<4x32x256xbf16, #tpu.memory_space<vmem>>, vector<1x32x256xbf16>
    %9 = vector.shape_cast %8 : vector<1x32x256xbf16> to vector<32x256xbf16>
    %c1_9 = arith.constant 1 : index
    %c0_10 = arith.constant 0 : index
    %c0_11 = arith.constant 0 : index
    %10 = vector.load %arg2[%c1_9, %c0_10, %c0_11] : memref<4x256x2xbf16, #tpu.memory_space<vmem>>, vector<1x256x2xbf16>
    %11 = vector.shape_cast %10 : vector<1x256x2xbf16> to vector<256x2xbf16>
    %cst_12 = arith.constant dense<0.000000e+00> : vector<32x2xf32>
    %12 = tpu.matmul %9, %11, %cst_12 {dimension_numbers = #tpu.dot_dimension_numbers<[1], [0], [0], [1], [0, 0, 1, 1], [], []>} : vector<32x256xbf16>, vector<256x2xbf16>, vector<32x2xf32> -> vector<32x2xf32>
    %c0_13 = arith.constant 0 : index
    %c0_14 = arith.constant 0 : index
    %13 = vector.load %arg3[%c0_13, %c0_14] : memref<32x1xf32, #tpu.memory_space<vmem>>, vector<32x1xf32>
    %14 = vector.broadcast %13 : vector<32x1xf32> to vector<32x2xf32>
    %15 = arith.addf %12, %14 : vector<32x2xf32>
    %c2 = arith.constant 2 : index
    %c0_15 = arith.constant 0 : index
    %c0_16 = arith.constant 0 : index
    %16 = vector.load %arg1[%c2, %c0_15, %c0_16] : memref<4x32x256xbf16, #tpu.memory_space<vmem>>, vector<1x32x256xbf16>
    %17 = vector.shape_cast %16 : vector<1x32x256xbf16> to vector<32x256xbf16>
    %c2_17 = arith.constant 2 : index
    %c0_18 = arith.constant 0 : index
    %c0_19 = arith.constant 0 : index
    %18 = vector.load %arg2[%c2_17, %c0_18, %c0_19] : memref<4x256x2xbf16, #tpu.memory_space<vmem>>, vector<1x256x2xbf16>
    %19 = vector.shape_cast %18 : vector<1x256x2xbf16> to vector<256x2xbf16>
    %cst_20 = arith.constant dense<0.000000e+00> : vector<32x2xf32>
    %20 = tpu.matmul %17, %19, %cst_20 {dimension_numbers = #tpu.dot_dimension_numbers<[1], [0], [0], [1], [0, 0, 1, 1], [], []>} : vector<32x256xbf16>, vector<256x2xbf16>, vector<32x2xf32> -> vector<32x2xf32>
    %c0_21 = arith.constant 0 : index
    %c0_22 = arith.constant 0 : index
    %21 = vector.load %arg3[%c0_21, %c0_22] : memref<32x1xf32, #tpu.memory_space<vmem>>, vector<32x1xf32>
    %22 = vector.broadcast %21 : vector<32x1xf32> to vector<32x2xf32>
    %23 = arith.addf %20, %22 : vector<32x2xf32>
    %c3 = arith.constant 3 : index
    %c0_23 = arith.constant 0 : index
    %c0_24 = arith.constant 0 : index
    %24 = vector.load %arg1[%c3, %c0_23, %c0_24] : memref<4x32x256xbf16, #tpu.memory_space<vmem>>, vector<1x32x256xbf16>
    %25 = vector.shape_cast %24 : vector<1x32x256xbf16> to vector<32x256xbf16>
    %c3_25 = arith.constant 3 : index
    %c0_26 = arith.constant 0 : index
    %c0_27 = arith.constant 0 : index
    %26 = vector.load %arg2[%c3_25, %c0_26, %c0_27] : memref<4x256x2xbf16, #tpu.memory_space<vmem>>, vector<1x256x2xbf16>
    %27 = vector.shape_cast %26 : vector<1x256x2xbf16> to vector<256x2xbf16>
    %cst_28 = arith.constant dense<0.000000e+00> : vector<32x2xf32>
    %28 = tpu.matmul %25, %27, %cst_28 {dimension_numbers = #tpu.dot_dimension_numbers<[1], [0], [0], [1], [0, 0, 1, 1], [], []>} : vector<32x256xbf16>, vector<256x2xbf16>, vector<32x2xf32> -> vector<32x2xf32>
    %c0_29 = arith.constant 0 : index
    %c0_30 = arith.constant 0 : index
    %29 = vector.load %arg3[%c0_29, %c0_30] : memref<32x1xf32, #tpu.memory_space<vmem>>, vector<32x1xf32>
    %30 = vector.broadcast %29 : vector<32x1xf32> to vector<32x2xf32>
    %31 = arith.addf %28, %30 : vector<32x2xf32>
    %cst_31 = arith.constant dense<0.000000e+00> : vector<32xf32>
    %32 = vector.multi_reduction <add>, %7, %cst_31 [1] : vector<32x2xf32> to vector<32xf32>
    %33 = vector.shape_cast %32 : vector<32xf32> to vector<32x1xf32>
    %cst_32 = arith.constant dense<0.000000e+00> : vector<32xf32>
    %34 = vector.multi_reduction <add>, %15, %cst_32 [1] : vector<32x2xf32> to vector<32xf32>
    %35 = vector.shape_cast %34 : vector<32xf32> to vector<32x1xf32>
    %36 = arith.addf %33, %35 : vector<32x1xf32>
    %cst_33 = arith.constant dense<0.000000e+00> : vector<32xf32>
    %37 = vector.multi_reduction <add>, %23, %cst_33 [1] : vector<32x2xf32> to vector<32xf32>
    %38 = vector.shape_cast %37 : vector<32xf32> to vector<32x1xf32>
    %39 = arith.addf %36, %38 : vector<32x1xf32>
    %cst_34 = arith.constant dense<0.000000e+00> : vector<32xf32>
    %40 = vector.multi_reduction <add>, %31, %cst_34 [1] : vector<32x2xf32> to vector<32xf32>
    %41 = vector.shape_cast %40 : vector<32xf32> to vector<32x1xf32>
    %42 = arith.addf %39, %41 : vector<32x1xf32>
    %cst_35 = arith.constant 8.000000e+00 : f32
    %43 = vector.broadcast %cst_35 : f32 to vector<32x1xf32>
    %44 = arith.divf %42, %43 : vector<32x1xf32>
    %45 = vector.broadcast %44 : vector<32x1xf32> to vector<32x2xf32>
    %46 = arith.subf %7, %45 : vector<32x2xf32>
    %47 = arith.mulf %46, %46 : vector<32x2xf32>
    %cst_36 = arith.constant dense<0.000000e+00> : vector<32xf32>
    %48 = vector.multi_reduction <add>, %47, %cst_36 [1] : vector<32x2xf32> to vector<32xf32>
    %49 = vector.shape_cast %48 : vector<32xf32> to vector<32x1xf32>
    %50 = vector.broadcast %44 : vector<32x1xf32> to vector<32x2xf32>
    %51 = arith.subf %15, %50 : vector<32x2xf32>
    %52 = arith.mulf %51, %51 : vector<32x2xf32>
    %cst_37 = arith.constant dense<0.000000e+00> : vector<32xf32>
    %53 = vector.multi_reduction <add>, %52, %cst_37 [1] : vector<32x2xf32> to vector<32xf32>
    %54 = vector.shape_cast %53 : vector<32xf32> to vector<32x1xf32>
    %55 = arith.addf %49, %54 : vector<32x1xf32>
    %56 = vector.broadcast %44 : vector<32x1xf32> to vector<32x2xf32>
    %57 = arith.subf %23, %56 : vector<32x2xf32>
    %58 = arith.mulf %57, %57 : vector<32x2xf32>
    %cst_38 = arith.constant dense<0.000000e+00> : vector<32xf32>
    %59 = vector.multi_reduction <add>, %58, %cst_38 [1] : vector<32x2xf32> to vector<32xf32>
    %60 = vector.shape_cast %59 : vector<32xf32> to vector<32x1xf32>
    %61 = arith.addf %55, %60 : vector<32x1xf32>
    %62 = vector.broadcast %44 : vector<32x1xf32> to vector<32x2xf32>
    %63 = arith.subf %31, %62 : vector<32x2xf32>
    %64 = arith.mulf %63, %63 : vector<32x2xf32>
    %cst_39 = arith.constant dense<0.000000e+00> : vector<32xf32>
    %65 = vector.multi_reduction <add>, %64, %cst_39 [1] : vector<32x2xf32> to vector<32xf32>
    %66 = vector.shape_cast %65 : vector<32xf32> to vector<32x1xf32>
    %67 = arith.addf %61, %66 : vector<32x1xf32>
    %cst_40 = arith.constant 8.000000e+00 : f32
    %68 = vector.broadcast %cst_40 : f32 to vector<32x1xf32>
    %69 = arith.divf %67, %68 : vector<32x1xf32>
    %c0_41 = arith.constant 0 : index
    %c0_42 = arith.constant 0 : index
    %70 = vector.load %arg4[%c0_41, %c0_42] : memref<32x1xf32, #tpu.memory_space<vmem>>, vector<32x1xf32>
    %cst_43 = arith.constant 9.99999974E-6 : f32
    %71 = vector.broadcast %cst_43 : f32 to vector<32x1xf32>
    %72 = arith.addf %69, %71 : vector<32x1xf32>
    %73 = math.rsqrt %72 : vector<32x1xf32>
    %74 = arith.mulf %70, %73 : vector<32x1xf32>
    %c0_44 = arith.constant 0 : index
    %c0_45 = arith.constant 0 : index
    %75 = vector.load %arg5[%c0_44, %c0_45] : memref<32x1xf32, #tpu.memory_space<vmem>>, vector<32x1xf32>
    %76 = arith.mulf %44, %74 : vector<32x1xf32>
    %77 = arith.subf %75, %76 : vector<32x1xf32>
    %78 = vector.broadcast %74 : vector<32x1xf32> to vector<32x2xf32>
    %79 = arith.mulf %7, %78 : vector<32x2xf32>
    %80 = vector.broadcast %77 : vector<32x1xf32> to vector<32x2xf32>
    %81 = arith.addf %79, %80 : vector<32x2xf32>
    %82 = vector.broadcast %74 : vector<32x1xf32> to vector<32x2xf32>
    %83 = arith.mulf %15, %82 : vector<32x2xf32>
    %84 = vector.broadcast %77 : vector<32x1xf32> to vector<32x2xf32>
    %85 = arith.addf %83, %84 : vector<32x2xf32>
    %86 = vector.broadcast %74 : vector<32x1xf32> to vector<32x2xf32>
    %87 = arith.mulf %23, %86 : vector<32x2xf32>
    %88 = vector.broadcast %77 : vector<32x1xf32> to vector<32x2xf32>
    %89 = arith.addf %87, %88 : vector<32x2xf32>
    %90 = vector.broadcast %74 : vector<32x1xf32> to vector<32x2xf32>
    %91 = arith.mulf %31, %90 : vector<32x2xf32>
    %92 = vector.broadcast %77 : vector<32x1xf32> to vector<32x2xf32>
    %93 = arith.addf %91, %92 : vector<32x2xf32>
    %cst_46 = arith.constant 0.000000e+00 : f32
    %94 = vector.broadcast %cst_46 : f32 to vector<32x2xf32>
    %95 = arith.maximumf %81, %94 : vector<32x2xf32>
    %c0_47 = arith.constant 0 : index
    %c0_48 = arith.constant 0 : index
    %c0_49 = arith.constant 0 : index
    %96 = vector.load %arg6[%c0_47, %c0_48, %c0_49] : memref<4x32x2xf32, #tpu.memory_space<vmem>>, vector<1x32x2xf32>
    %97 = vector.shape_cast %96 : vector<1x32x2xf32> to vector<32x2xf32>
    %98 = vector.shape_cast %95 : vector<32x2xf32> to vector<1x32x2xf32>
    tpu.vector_store %arg6[%c0_47, %c0_48, %c0_49], %98 {strides = array<i32>} : memref<4x32x2xf32, #tpu.memory_space<vmem>>, vector<1x32x2xf32>,
    %cst_50 = arith.constant 0.000000e+00 : f32
    %99 = vector.broadcast %cst_50 : f32 to vector<32x2xf32>
    %100 = arith.maximumf %85, %99 : vector<32x2xf32>
    %c1_51 = arith.constant 1 : index
    %c0_52 = arith.constant 0 : index
    %c0_53 = arith.constant 0 : index
    %101 = vector.load %arg6[%c1_51, %c0_52, %c0_53] : memref<4x32x2xf32, #tpu.memory_space<vmem>>, vector<1x32x2xf32>
    %102 = vector.shape_cast %101 : vector<1x32x2xf32> to vector<32x2xf32>
    %103 = vector.shape_cast %100 : vector<32x2xf32> to vector<1x32x2xf32>
    tpu.vector_store %arg6[%c1_51, %c0_52, %c0_53], %103 {strides = array<i32>} : memref<4x32x2xf32, #tpu.memory_space<vmem>>, vector<1x32x2xf32>,
    %cst_54 = arith.constant 0.000000e+00 : f32
    %104 = vector.broadcast %cst_54 : f32 to vector<32x2xf32>
    %105 = arith.maximumf %89, %104 : vector<32x2xf32>
    %c2_55 = arith.constant 2 : index
    %c0_56 = arith.constant 0 : index
    %c0_57 = arith.constant 0 : index
    %106 = vector.load %arg6[%c2_55, %c0_56, %c0_57] : memref<4x32x2xf32, #tpu.memory_space<vmem>>, vector<1x32x2xf32>
    %107 = vector.shape_cast %106 : vector<1x32x2xf32> to vector<32x2xf32>
    %108 = vector.shape_cast %105 : vector<32x2xf32> to vector<1x32x2xf32>
    tpu.vector_store %arg6[%c2_55, %c0_56, %c0_57], %108 {strides = array<i32>} : memref<4x32x2xf32, #tpu.memory_space<vmem>>, vector<1x32x2xf32>,
    %cst_58 = arith.constant 0.000000e+00 : f32
    %109 = vector.broadcast %cst_58 : f32 to vector<32x2xf32>
    %110 = arith.maximumf %93, %109 : vector<32x2xf32>
    %c3_59 = arith.constant 3 : index
    %c0_60 = arith.constant 0 : index
    %c0_61 = arith.constant 0 : index
    %111 = vector.load %arg6[%c3_59, %c0_60, %c0_61] : memref<4x32x2xf32, #tpu.memory_space<vmem>>, vector<1x32x2xf32>
    %112 = vector.shape_cast %111 : vector<1x32x2xf32> to vector<32x2xf32>
    %113 = vector.shape_cast %110 : vector<32x2xf32> to vector<1x32x2xf32>
    tpu.vector_store %arg6[%c3_59, %c0_60, %c0_61], %113 {strides = array<i32>} : memref<4x32x2xf32, #tpu.memory_space<vmem>>, vector<1x32x2xf32>,
    return
  }
  func.func @transform_0(%arg0: i32) -> (i32, i32, i32) {
    %c0_i32 = arith.constant 0 : i32
    %c0_i32_0 = arith.constant 0 : i32
    %c0_i32_1 = arith.constant 0 : i32
    %c0_i32_2 = arith.constant 0 : i32
    return %c0_i32, %c0_i32_0, %c0_i32_1 : i32, i32, i32
  }
  func.func @transform_1(%arg0: i32) -> (i32, i32, i32) {
    %c0_i32 = arith.constant 0 : i32
    %c0_i32_0 = arith.constant 0 : i32
    %c0_i32_1 = arith.constant 0 : i32
    %c0_i32_2 = arith.constant 0 : i32
    return %c0_i32, %c0_i32_0, %c0_i32_1 : i32, i32, i32
  }
  func.func @transform_2(%arg0: i32) -> (i32, i32) {
    %c0_i32 = arith.constant 0 : i32
    %c0_i32_0 = arith.constant 0 : i32
    %c0_i32_1 = arith.constant 0 : i32
    return %c0_i32, %c0_i32_0 : i32, i32
  }
  func.func @transform_3(%arg0: i32) -> (i32, i32) {
    %c0_i32 = arith.constant 0 : i32
    %c0_i32_0 = arith.constant 0 : i32
    %c0_i32_1 = arith.constant 0 : i32
    return %c0_i32, %c0_i32_0 : i32, i32
  }
  func.func @transform_4(%arg0: i32) -> (i32, i32) {
    %c0_i32 = arith.constant 0 : i32
    %c0_i32_0 = arith.constant 0 : i32
    %c0_i32_1 = arith.constant 0 : i32
    return %c0_i32, %c0_i32_0 : i32, i32
  }
  func.func @transform_5(%arg0: i32) -> (i32, i32, i32) {
    %c0_i32 = arith.constant 0 : i32
    %c0_i32_0 = arith.constant 0 : i32
    %c0_i32_1 = arith.constant 0 : i32
    %c0_i32_2 = arith.constant 0 : i32
    return %c0_i32, %c0_i32_0, %c0_i32_1 : i32, i32, i32
  }
}

module attributes {stable_mosaic.version = 11 : i64} {
  func.func @_convt_bn_relu_kernel(%arg0: i32, %arg1: memref<4x16x128xbf16, #tpu.memory_space<vmem>>, %arg2: memref<4x128x8xbf16, #tpu.memory_space<vmem>>, %arg3: memref<16x1xf32, #tpu.memory_space<vmem>>, %arg4: memref<16x1xf32, #tpu.memory_space<vmem>>, %arg5: memref<16x1xf32, #tpu.memory_space<vmem>>, %arg6: memref<4x16x8xf32, #tpu.memory_space<vmem>>) attributes {dimension_semantics = [#tpu.dimension_semantics<arbitrary>], iteration_bounds = array<i64: 1>, scalar_prefetch = 0 : i64, scratch_operands = 0 : i64, tpu.core_type = #tpu.core_type<tc>, window_params = [{pipeline_mode = #tpu.pipeline_mode<synchronous>, transform_indices = @transform_0, window_bounds = array<i64: 4, 16, 128>}, {pipeline_mode = #tpu.pipeline_mode<synchronous>, transform_indices = @transform_1, window_bounds = array<i64: 4, 128, 8>}, {pipeline_mode = #tpu.pipeline_mode<synchronous>, transform_indices = @transform_2, window_bounds = array<i64: 16, 1>}, {pipeline_mode = #tpu.pipeline_mode<synchronous>, transform_indices = @transform_3, window_bounds = array<i64: 16, 1>}, {pipeline_mode = #tpu.pipeline_mode<synchronous>, transform_indices = @transform_4, window_bounds = array<i64: 16, 1>}, {pipeline_mode = #tpu.pipeline_mode<synchronous>, transform_indices = @transform_5, window_bounds = array<i64: 4, 16, 8>}]} {
    %c0 = arith.constant 0 : index
    %c0_0 = arith.constant 0 : index
    %c0_1 = arith.constant 0 : index
    %0 = vector.load %arg1[%c0, %c0_0, %c0_1] : memref<4x16x128xbf16, #tpu.memory_space<vmem>>, vector<1x16x128xbf16>
    %1 = vector.shape_cast %0 : vector<1x16x128xbf16> to vector<16x128xbf16>
    %c0_2 = arith.constant 0 : index
    %c0_3 = arith.constant 0 : index
    %c0_4 = arith.constant 0 : index
    %2 = vector.load %arg2[%c0_2, %c0_3, %c0_4] : memref<4x128x8xbf16, #tpu.memory_space<vmem>>, vector<1x128x8xbf16>
    %3 = vector.shape_cast %2 : vector<1x128x8xbf16> to vector<128x8xbf16>
    %cst = arith.constant dense<0.000000e+00> : vector<16x8xf32>
    %4 = tpu.matmul %1, %3, %cst {dimension_numbers = #tpu.dot_dimension_numbers<[1], [0], [0], [1], [0, 0, 1, 1], [], []>} : vector<16x128xbf16>, vector<128x8xbf16>, vector<16x8xf32> -> vector<16x8xf32>
    %c0_5 = arith.constant 0 : index
    %c0_6 = arith.constant 0 : index
    %5 = vector.load %arg3[%c0_5, %c0_6] : memref<16x1xf32, #tpu.memory_space<vmem>>, vector<16x1xf32>
    %6 = vector.broadcast %5 : vector<16x1xf32> to vector<16x8xf32>
    %7 = arith.addf %4, %6 : vector<16x8xf32>
    %c1 = arith.constant 1 : index
    %c0_7 = arith.constant 0 : index
    %c0_8 = arith.constant 0 : index
    %8 = vector.load %arg1[%c1, %c0_7, %c0_8] : memref<4x16x128xbf16, #tpu.memory_space<vmem>>, vector<1x16x128xbf16>
    %9 = vector.shape_cast %8 : vector<1x16x128xbf16> to vector<16x128xbf16>
    %c1_9 = arith.constant 1 : index
    %c0_10 = arith.constant 0 : index
    %c0_11 = arith.constant 0 : index
    %10 = vector.load %arg2[%c1_9, %c0_10, %c0_11] : memref<4x128x8xbf16, #tpu.memory_space<vmem>>, vector<1x128x8xbf16>
    %11 = vector.shape_cast %10 : vector<1x128x8xbf16> to vector<128x8xbf16>
    %cst_12 = arith.constant dense<0.000000e+00> : vector<16x8xf32>
    %12 = tpu.matmul %9, %11, %cst_12 {dimension_numbers = #tpu.dot_dimension_numbers<[1], [0], [0], [1], [0, 0, 1, 1], [], []>} : vector<16x128xbf16>, vector<128x8xbf16>, vector<16x8xf32> -> vector<16x8xf32>
    %c0_13 = arith.constant 0 : index
    %c0_14 = arith.constant 0 : index
    %13 = vector.load %arg3[%c0_13, %c0_14] : memref<16x1xf32, #tpu.memory_space<vmem>>, vector<16x1xf32>
    %14 = vector.broadcast %13 : vector<16x1xf32> to vector<16x8xf32>
    %15 = arith.addf %12, %14 : vector<16x8xf32>
    %c2 = arith.constant 2 : index
    %c0_15 = arith.constant 0 : index
    %c0_16 = arith.constant 0 : index
    %16 = vector.load %arg1[%c2, %c0_15, %c0_16] : memref<4x16x128xbf16, #tpu.memory_space<vmem>>, vector<1x16x128xbf16>
    %17 = vector.shape_cast %16 : vector<1x16x128xbf16> to vector<16x128xbf16>
    %c2_17 = arith.constant 2 : index
    %c0_18 = arith.constant 0 : index
    %c0_19 = arith.constant 0 : index
    %18 = vector.load %arg2[%c2_17, %c0_18, %c0_19] : memref<4x128x8xbf16, #tpu.memory_space<vmem>>, vector<1x128x8xbf16>
    %19 = vector.shape_cast %18 : vector<1x128x8xbf16> to vector<128x8xbf16>
    %cst_20 = arith.constant dense<0.000000e+00> : vector<16x8xf32>
    %20 = tpu.matmul %17, %19, %cst_20 {dimension_numbers = #tpu.dot_dimension_numbers<[1], [0], [0], [1], [0, 0, 1, 1], [], []>} : vector<16x128xbf16>, vector<128x8xbf16>, vector<16x8xf32> -> vector<16x8xf32>
    %c0_21 = arith.constant 0 : index
    %c0_22 = arith.constant 0 : index
    %21 = vector.load %arg3[%c0_21, %c0_22] : memref<16x1xf32, #tpu.memory_space<vmem>>, vector<16x1xf32>
    %22 = vector.broadcast %21 : vector<16x1xf32> to vector<16x8xf32>
    %23 = arith.addf %20, %22 : vector<16x8xf32>
    %c3 = arith.constant 3 : index
    %c0_23 = arith.constant 0 : index
    %c0_24 = arith.constant 0 : index
    %24 = vector.load %arg1[%c3, %c0_23, %c0_24] : memref<4x16x128xbf16, #tpu.memory_space<vmem>>, vector<1x16x128xbf16>
    %25 = vector.shape_cast %24 : vector<1x16x128xbf16> to vector<16x128xbf16>
    %c3_25 = arith.constant 3 : index
    %c0_26 = arith.constant 0 : index
    %c0_27 = arith.constant 0 : index
    %26 = vector.load %arg2[%c3_25, %c0_26, %c0_27] : memref<4x128x8xbf16, #tpu.memory_space<vmem>>, vector<1x128x8xbf16>
    %27 = vector.shape_cast %26 : vector<1x128x8xbf16> to vector<128x8xbf16>
    %cst_28 = arith.constant dense<0.000000e+00> : vector<16x8xf32>
    %28 = tpu.matmul %25, %27, %cst_28 {dimension_numbers = #tpu.dot_dimension_numbers<[1], [0], [0], [1], [0, 0, 1, 1], [], []>} : vector<16x128xbf16>, vector<128x8xbf16>, vector<16x8xf32> -> vector<16x8xf32>
    %c0_29 = arith.constant 0 : index
    %c0_30 = arith.constant 0 : index
    %29 = vector.load %arg3[%c0_29, %c0_30] : memref<16x1xf32, #tpu.memory_space<vmem>>, vector<16x1xf32>
    %30 = vector.broadcast %29 : vector<16x1xf32> to vector<16x8xf32>
    %31 = arith.addf %28, %30 : vector<16x8xf32>
    %cst_31 = arith.constant dense<0.000000e+00> : vector<16xf32>
    %32 = vector.multi_reduction <add>, %7, %cst_31 [1] : vector<16x8xf32> to vector<16xf32>
    %33 = vector.shape_cast %32 : vector<16xf32> to vector<16x1xf32>
    %cst_32 = arith.constant dense<0.000000e+00> : vector<16xf32>
    %34 = vector.multi_reduction <add>, %15, %cst_32 [1] : vector<16x8xf32> to vector<16xf32>
    %35 = vector.shape_cast %34 : vector<16xf32> to vector<16x1xf32>
    %36 = arith.addf %33, %35 : vector<16x1xf32>
    %cst_33 = arith.constant dense<0.000000e+00> : vector<16xf32>
    %37 = vector.multi_reduction <add>, %23, %cst_33 [1] : vector<16x8xf32> to vector<16xf32>
    %38 = vector.shape_cast %37 : vector<16xf32> to vector<16x1xf32>
    %39 = arith.addf %36, %38 : vector<16x1xf32>
    %cst_34 = arith.constant dense<0.000000e+00> : vector<16xf32>
    %40 = vector.multi_reduction <add>, %31, %cst_34 [1] : vector<16x8xf32> to vector<16xf32>
    %41 = vector.shape_cast %40 : vector<16xf32> to vector<16x1xf32>
    %42 = arith.addf %39, %41 : vector<16x1xf32>
    %cst_35 = arith.constant 3.200000e+01 : f32
    %43 = vector.broadcast %cst_35 : f32 to vector<16x1xf32>
    %44 = arith.divf %42, %43 : vector<16x1xf32>
    %45 = vector.broadcast %44 : vector<16x1xf32> to vector<16x8xf32>
    %46 = arith.subf %7, %45 : vector<16x8xf32>
    %47 = arith.mulf %46, %46 : vector<16x8xf32>
    %cst_36 = arith.constant dense<0.000000e+00> : vector<16xf32>
    %48 = vector.multi_reduction <add>, %47, %cst_36 [1] : vector<16x8xf32> to vector<16xf32>
    %49 = vector.shape_cast %48 : vector<16xf32> to vector<16x1xf32>
    %50 = vector.broadcast %44 : vector<16x1xf32> to vector<16x8xf32>
    %51 = arith.subf %15, %50 : vector<16x8xf32>
    %52 = arith.mulf %51, %51 : vector<16x8xf32>
    %cst_37 = arith.constant dense<0.000000e+00> : vector<16xf32>
    %53 = vector.multi_reduction <add>, %52, %cst_37 [1] : vector<16x8xf32> to vector<16xf32>
    %54 = vector.shape_cast %53 : vector<16xf32> to vector<16x1xf32>
    %55 = arith.addf %49, %54 : vector<16x1xf32>
    %56 = vector.broadcast %44 : vector<16x1xf32> to vector<16x8xf32>
    %57 = arith.subf %23, %56 : vector<16x8xf32>
    %58 = arith.mulf %57, %57 : vector<16x8xf32>
    %cst_38 = arith.constant dense<0.000000e+00> : vector<16xf32>
    %59 = vector.multi_reduction <add>, %58, %cst_38 [1] : vector<16x8xf32> to vector<16xf32>
    %60 = vector.shape_cast %59 : vector<16xf32> to vector<16x1xf32>
    %61 = arith.addf %55, %60 : vector<16x1xf32>
    %62 = vector.broadcast %44 : vector<16x1xf32> to vector<16x8xf32>
    %63 = arith.subf %31, %62 : vector<16x8xf32>
    %64 = arith.mulf %63, %63 : vector<16x8xf32>
    %cst_39 = arith.constant dense<0.000000e+00> : vector<16xf32>
    %65 = vector.multi_reduction <add>, %64, %cst_39 [1] : vector<16x8xf32> to vector<16xf32>
    %66 = vector.shape_cast %65 : vector<16xf32> to vector<16x1xf32>
    %67 = arith.addf %61, %66 : vector<16x1xf32>
    %cst_40 = arith.constant 3.200000e+01 : f32
    %68 = vector.broadcast %cst_40 : f32 to vector<16x1xf32>
    %69 = arith.divf %67, %68 : vector<16x1xf32>
    %c0_41 = arith.constant 0 : index
    %c0_42 = arith.constant 0 : index
    %70 = vector.load %arg4[%c0_41, %c0_42] : memref<16x1xf32, #tpu.memory_space<vmem>>, vector<16x1xf32>
    %cst_43 = arith.constant 9.99999974E-6 : f32
    %71 = vector.broadcast %cst_43 : f32 to vector<16x1xf32>
    %72 = arith.addf %69, %71 : vector<16x1xf32>
    %73 = math.rsqrt %72 : vector<16x1xf32>
    %74 = arith.mulf %70, %73 : vector<16x1xf32>
    %c0_44 = arith.constant 0 : index
    %c0_45 = arith.constant 0 : index
    %75 = vector.load %arg5[%c0_44, %c0_45] : memref<16x1xf32, #tpu.memory_space<vmem>>, vector<16x1xf32>
    %76 = arith.mulf %44, %74 : vector<16x1xf32>
    %77 = arith.subf %75, %76 : vector<16x1xf32>
    %78 = vector.broadcast %74 : vector<16x1xf32> to vector<16x8xf32>
    %79 = arith.mulf %7, %78 : vector<16x8xf32>
    %80 = vector.broadcast %77 : vector<16x1xf32> to vector<16x8xf32>
    %81 = arith.addf %79, %80 : vector<16x8xf32>
    %82 = vector.broadcast %74 : vector<16x1xf32> to vector<16x8xf32>
    %83 = arith.mulf %15, %82 : vector<16x8xf32>
    %84 = vector.broadcast %77 : vector<16x1xf32> to vector<16x8xf32>
    %85 = arith.addf %83, %84 : vector<16x8xf32>
    %86 = vector.broadcast %74 : vector<16x1xf32> to vector<16x8xf32>
    %87 = arith.mulf %23, %86 : vector<16x8xf32>
    %88 = vector.broadcast %77 : vector<16x1xf32> to vector<16x8xf32>
    %89 = arith.addf %87, %88 : vector<16x8xf32>
    %90 = vector.broadcast %74 : vector<16x1xf32> to vector<16x8xf32>
    %91 = arith.mulf %31, %90 : vector<16x8xf32>
    %92 = vector.broadcast %77 : vector<16x1xf32> to vector<16x8xf32>
    %93 = arith.addf %91, %92 : vector<16x8xf32>
    %cst_46 = arith.constant 0.000000e+00 : f32
    %94 = vector.broadcast %cst_46 : f32 to vector<16x8xf32>
    %95 = arith.maximumf %81, %94 : vector<16x8xf32>
    %c0_47 = arith.constant 0 : index
    %c0_48 = arith.constant 0 : index
    %c0_49 = arith.constant 0 : index
    %96 = vector.load %arg6[%c0_47, %c0_48, %c0_49] : memref<4x16x8xf32, #tpu.memory_space<vmem>>, vector<1x16x8xf32>
    %97 = vector.shape_cast %96 : vector<1x16x8xf32> to vector<16x8xf32>
    %98 = vector.shape_cast %95 : vector<16x8xf32> to vector<1x16x8xf32>
    tpu.vector_store %arg6[%c0_47, %c0_48, %c0_49], %98 {strides = array<i32>} : memref<4x16x8xf32, #tpu.memory_space<vmem>>, vector<1x16x8xf32>,
    %cst_50 = arith.constant 0.000000e+00 : f32
    %99 = vector.broadcast %cst_50 : f32 to vector<16x8xf32>
    %100 = arith.maximumf %85, %99 : vector<16x8xf32>
    %c1_51 = arith.constant 1 : index
    %c0_52 = arith.constant 0 : index
    %c0_53 = arith.constant 0 : index
    %101 = vector.load %arg6[%c1_51, %c0_52, %c0_53] : memref<4x16x8xf32, #tpu.memory_space<vmem>>, vector<1x16x8xf32>
    %102 = vector.shape_cast %101 : vector<1x16x8xf32> to vector<16x8xf32>
    %103 = vector.shape_cast %100 : vector<16x8xf32> to vector<1x16x8xf32>
    tpu.vector_store %arg6[%c1_51, %c0_52, %c0_53], %103 {strides = array<i32>} : memref<4x16x8xf32, #tpu.memory_space<vmem>>, vector<1x16x8xf32>,
    %cst_54 = arith.constant 0.000000e+00 : f32
    %104 = vector.broadcast %cst_54 : f32 to vector<16x8xf32>
    %105 = arith.maximumf %89, %104 : vector<16x8xf32>
    %c2_55 = arith.constant 2 : index
    %c0_56 = arith.constant 0 : index
    %c0_57 = arith.constant 0 : index
    %106 = vector.load %arg6[%c2_55, %c0_56, %c0_57] : memref<4x16x8xf32, #tpu.memory_space<vmem>>, vector<1x16x8xf32>
    %107 = vector.shape_cast %106 : vector<1x16x8xf32> to vector<16x8xf32>
    %108 = vector.shape_cast %105 : vector<16x8xf32> to vector<1x16x8xf32>
    tpu.vector_store %arg6[%c2_55, %c0_56, %c0_57], %108 {strides = array<i32>} : memref<4x16x8xf32, #tpu.memory_space<vmem>>, vector<1x16x8xf32>,
    %cst_58 = arith.constant 0.000000e+00 : f32
    %109 = vector.broadcast %cst_58 : f32 to vector<16x8xf32>
    %110 = arith.maximumf %93, %109 : vector<16x8xf32>
    %c3_59 = arith.constant 3 : index
    %c0_60 = arith.constant 0 : index
    %c0_61 = arith.constant 0 : index
    %111 = vector.load %arg6[%c3_59, %c0_60, %c0_61] : memref<4x16x8xf32, #tpu.memory_space<vmem>>, vector<1x16x8xf32>
    %112 = vector.shape_cast %111 : vector<1x16x8xf32> to vector<16x8xf32>
    %113 = vector.shape_cast %110 : vector<16x8xf32> to vector<1x16x8xf32>
    tpu.vector_store %arg6[%c3_59, %c0_60, %c0_61], %113 {strides = array<i32>} : memref<4x16x8xf32, #tpu.memory_space<vmem>>, vector<1x16x8xf32>,
    return
  }
  func.func @transform_0(%arg0: i32) -> (i32, i32, i32) {
    %c0_i32 = arith.constant 0 : i32
    %c0_i32_0 = arith.constant 0 : i32
    %c0_i32_1 = arith.constant 0 : i32
    %c0_i32_2 = arith.constant 0 : i32
    return %c0_i32, %c0_i32_0, %c0_i32_1 : i32, i32, i32
  }
  func.func @transform_1(%arg0: i32) -> (i32, i32, i32) {
    %c0_i32 = arith.constant 0 : i32
    %c0_i32_0 = arith.constant 0 : i32
    %c0_i32_1 = arith.constant 0 : i32
    %c0_i32_2 = arith.constant 0 : i32
    return %c0_i32, %c0_i32_0, %c0_i32_1 : i32, i32, i32
  }
  func.func @transform_2(%arg0: i32) -> (i32, i32) {
    %c0_i32 = arith.constant 0 : i32
    %c0_i32_0 = arith.constant 0 : i32
    %c0_i32_1 = arith.constant 0 : i32
    return %c0_i32, %c0_i32_0 : i32, i32
  }
  func.func @transform_3(%arg0: i32) -> (i32, i32) {
    %c0_i32 = arith.constant 0 : i32
    %c0_i32_0 = arith.constant 0 : i32
    %c0_i32_1 = arith.constant 0 : i32
    return %c0_i32, %c0_i32_0 : i32, i32
  }
  func.func @transform_4(%arg0: i32) -> (i32, i32) {
    %c0_i32 = arith.constant 0 : i32
    %c0_i32_0 = arith.constant 0 : i32
    %c0_i32_1 = arith.constant 0 : i32
    return %c0_i32, %c0_i32_0 : i32, i32
  }
  func.func @transform_5(%arg0: i32) -> (i32, i32, i32) {
    %c0_i32 = arith.constant 0 : i32
    %c0_i32_0 = arith.constant 0 : i32
    %c0_i32_1 = arith.constant 0 : i32
    %c0_i32_2 = arith.constant 0 : i32
    return %c0_i32, %c0_i32_0, %c0_i32_1 : i32, i32, i32
  }
}

module attributes {stable_mosaic.version = 11 : i64} {
  func.func @_convt_bn_relu_kernel(%arg0: i32, %arg1: memref<4x8x64xbf16, #tpu.memory_space<vmem>>, %arg2: memref<4x64x32xbf16, #tpu.memory_space<vmem>>, %arg3: memref<8x1xf32, #tpu.memory_space<vmem>>, %arg4: memref<8x1xf32, #tpu.memory_space<vmem>>, %arg5: memref<8x1xf32, #tpu.memory_space<vmem>>, %arg6: memref<4x8x32xf32, #tpu.memory_space<vmem>>) attributes {dimension_semantics = [#tpu.dimension_semantics<arbitrary>], iteration_bounds = array<i64: 1>, scalar_prefetch = 0 : i64, scratch_operands = 0 : i64, tpu.core_type = #tpu.core_type<tc>, window_params = [{pipeline_mode = #tpu.pipeline_mode<synchronous>, transform_indices = @transform_0, window_bounds = array<i64: 4, 8, 64>}, {pipeline_mode = #tpu.pipeline_mode<synchronous>, transform_indices = @transform_1, window_bounds = array<i64: 4, 64, 32>}, {pipeline_mode = #tpu.pipeline_mode<synchronous>, transform_indices = @transform_2, window_bounds = array<i64: 8, 1>}, {pipeline_mode = #tpu.pipeline_mode<synchronous>, transform_indices = @transform_3, window_bounds = array<i64: 8, 1>}, {pipeline_mode = #tpu.pipeline_mode<synchronous>, transform_indices = @transform_4, window_bounds = array<i64: 8, 1>}, {pipeline_mode = #tpu.pipeline_mode<synchronous>, transform_indices = @transform_5, window_bounds = array<i64: 4, 8, 32>}]} {
    %c0 = arith.constant 0 : index
    %c0_0 = arith.constant 0 : index
    %c0_1 = arith.constant 0 : index
    %0 = vector.load %arg1[%c0, %c0_0, %c0_1] : memref<4x8x64xbf16, #tpu.memory_space<vmem>>, vector<1x8x64xbf16>
    %1 = vector.shape_cast %0 : vector<1x8x64xbf16> to vector<8x64xbf16>
    %c0_2 = arith.constant 0 : index
    %c0_3 = arith.constant 0 : index
    %c0_4 = arith.constant 0 : index
    %2 = vector.load %arg2[%c0_2, %c0_3, %c0_4] : memref<4x64x32xbf16, #tpu.memory_space<vmem>>, vector<1x64x32xbf16>
    %3 = vector.shape_cast %2 : vector<1x64x32xbf16> to vector<64x32xbf16>
    %cst = arith.constant dense<0.000000e+00> : vector<8x32xf32>
    %4 = tpu.matmul %1, %3, %cst {dimension_numbers = #tpu.dot_dimension_numbers<[1], [0], [0], [1], [0, 0, 1, 1], [], []>} : vector<8x64xbf16>, vector<64x32xbf16>, vector<8x32xf32> -> vector<8x32xf32>
    %c0_5 = arith.constant 0 : index
    %c0_6 = arith.constant 0 : index
    %5 = vector.load %arg3[%c0_5, %c0_6] : memref<8x1xf32, #tpu.memory_space<vmem>>, vector<8x1xf32>
    %6 = vector.broadcast %5 : vector<8x1xf32> to vector<8x32xf32>
    %7 = arith.addf %4, %6 : vector<8x32xf32>
    %c1 = arith.constant 1 : index
    %c0_7 = arith.constant 0 : index
    %c0_8 = arith.constant 0 : index
    %8 = vector.load %arg1[%c1, %c0_7, %c0_8] : memref<4x8x64xbf16, #tpu.memory_space<vmem>>, vector<1x8x64xbf16>
    %9 = vector.shape_cast %8 : vector<1x8x64xbf16> to vector<8x64xbf16>
    %c1_9 = arith.constant 1 : index
    %c0_10 = arith.constant 0 : index
    %c0_11 = arith.constant 0 : index
    %10 = vector.load %arg2[%c1_9, %c0_10, %c0_11] : memref<4x64x32xbf16, #tpu.memory_space<vmem>>, vector<1x64x32xbf16>
    %11 = vector.shape_cast %10 : vector<1x64x32xbf16> to vector<64x32xbf16>
    %cst_12 = arith.constant dense<0.000000e+00> : vector<8x32xf32>
    %12 = tpu.matmul %9, %11, %cst_12 {dimension_numbers = #tpu.dot_dimension_numbers<[1], [0], [0], [1], [0, 0, 1, 1], [], []>} : vector<8x64xbf16>, vector<64x32xbf16>, vector<8x32xf32> -> vector<8x32xf32>
    %c0_13 = arith.constant 0 : index
    %c0_14 = arith.constant 0 : index
    %13 = vector.load %arg3[%c0_13, %c0_14] : memref<8x1xf32, #tpu.memory_space<vmem>>, vector<8x1xf32>
    %14 = vector.broadcast %13 : vector<8x1xf32> to vector<8x32xf32>
    %15 = arith.addf %12, %14 : vector<8x32xf32>
    %c2 = arith.constant 2 : index
    %c0_15 = arith.constant 0 : index
    %c0_16 = arith.constant 0 : index
    %16 = vector.load %arg1[%c2, %c0_15, %c0_16] : memref<4x8x64xbf16, #tpu.memory_space<vmem>>, vector<1x8x64xbf16>
    %17 = vector.shape_cast %16 : vector<1x8x64xbf16> to vector<8x64xbf16>
    %c2_17 = arith.constant 2 : index
    %c0_18 = arith.constant 0 : index
    %c0_19 = arith.constant 0 : index
    %18 = vector.load %arg2[%c2_17, %c0_18, %c0_19] : memref<4x64x32xbf16, #tpu.memory_space<vmem>>, vector<1x64x32xbf16>
    %19 = vector.shape_cast %18 : vector<1x64x32xbf16> to vector<64x32xbf16>
    %cst_20 = arith.constant dense<0.000000e+00> : vector<8x32xf32>
    %20 = tpu.matmul %17, %19, %cst_20 {dimension_numbers = #tpu.dot_dimension_numbers<[1], [0], [0], [1], [0, 0, 1, 1], [], []>} : vector<8x64xbf16>, vector<64x32xbf16>, vector<8x32xf32> -> vector<8x32xf32>
    %c0_21 = arith.constant 0 : index
    %c0_22 = arith.constant 0 : index
    %21 = vector.load %arg3[%c0_21, %c0_22] : memref<8x1xf32, #tpu.memory_space<vmem>>, vector<8x1xf32>
    %22 = vector.broadcast %21 : vector<8x1xf32> to vector<8x32xf32>
    %23 = arith.addf %20, %22 : vector<8x32xf32>
    %c3 = arith.constant 3 : index
    %c0_23 = arith.constant 0 : index
    %c0_24 = arith.constant 0 : index
    %24 = vector.load %arg1[%c3, %c0_23, %c0_24] : memref<4x8x64xbf16, #tpu.memory_space<vmem>>, vector<1x8x64xbf16>
    %25 = vector.shape_cast %24 : vector<1x8x64xbf16> to vector<8x64xbf16>
    %c3_25 = arith.constant 3 : index
    %c0_26 = arith.constant 0 : index
    %c0_27 = arith.constant 0 : index
    %26 = vector.load %arg2[%c3_25, %c0_26, %c0_27] : memref<4x64x32xbf16, #tpu.memory_space<vmem>>, vector<1x64x32xbf16>
    %27 = vector.shape_cast %26 : vector<1x64x32xbf16> to vector<64x32xbf16>
    %cst_28 = arith.constant dense<0.000000e+00> : vector<8x32xf32>
    %28 = tpu.matmul %25, %27, %cst_28 {dimension_numbers = #tpu.dot_dimension_numbers<[1], [0], [0], [1], [0, 0, 1, 1], [], []>} : vector<8x64xbf16>, vector<64x32xbf16>, vector<8x32xf32> -> vector<8x32xf32>
    %c0_29 = arith.constant 0 : index
    %c0_30 = arith.constant 0 : index
    %29 = vector.load %arg3[%c0_29, %c0_30] : memref<8x1xf32, #tpu.memory_space<vmem>>, vector<8x1xf32>
    %30 = vector.broadcast %29 : vector<8x1xf32> to vector<8x32xf32>
    %31 = arith.addf %28, %30 : vector<8x32xf32>
    %cst_31 = arith.constant dense<0.000000e+00> : vector<8xf32>
    %32 = vector.multi_reduction <add>, %7, %cst_31 [1] : vector<8x32xf32> to vector<8xf32>
    %33 = vector.shape_cast %32 : vector<8xf32> to vector<8x1xf32>
    %cst_32 = arith.constant dense<0.000000e+00> : vector<8xf32>
    %34 = vector.multi_reduction <add>, %15, %cst_32 [1] : vector<8x32xf32> to vector<8xf32>
    %35 = vector.shape_cast %34 : vector<8xf32> to vector<8x1xf32>
    %36 = arith.addf %33, %35 : vector<8x1xf32>
    %cst_33 = arith.constant dense<0.000000e+00> : vector<8xf32>
    %37 = vector.multi_reduction <add>, %23, %cst_33 [1] : vector<8x32xf32> to vector<8xf32>
    %38 = vector.shape_cast %37 : vector<8xf32> to vector<8x1xf32>
    %39 = arith.addf %36, %38 : vector<8x1xf32>
    %cst_34 = arith.constant dense<0.000000e+00> : vector<8xf32>
    %40 = vector.multi_reduction <add>, %31, %cst_34 [1] : vector<8x32xf32> to vector<8xf32>
    %41 = vector.shape_cast %40 : vector<8xf32> to vector<8x1xf32>
    %42 = arith.addf %39, %41 : vector<8x1xf32>
    %cst_35 = arith.constant 1.280000e+02 : f32
    %43 = vector.broadcast %cst_35 : f32 to vector<8x1xf32>
    %44 = arith.divf %42, %43 : vector<8x1xf32>
    %45 = vector.broadcast %44 : vector<8x1xf32> to vector<8x32xf32>
    %46 = arith.subf %7, %45 : vector<8x32xf32>
    %47 = arith.mulf %46, %46 : vector<8x32xf32>
    %cst_36 = arith.constant dense<0.000000e+00> : vector<8xf32>
    %48 = vector.multi_reduction <add>, %47, %cst_36 [1] : vector<8x32xf32> to vector<8xf32>
    %49 = vector.shape_cast %48 : vector<8xf32> to vector<8x1xf32>
    %50 = vector.broadcast %44 : vector<8x1xf32> to vector<8x32xf32>
    %51 = arith.subf %15, %50 : vector<8x32xf32>
    %52 = arith.mulf %51, %51 : vector<8x32xf32>
    %cst_37 = arith.constant dense<0.000000e+00> : vector<8xf32>
    %53 = vector.multi_reduction <add>, %52, %cst_37 [1] : vector<8x32xf32> to vector<8xf32>
    %54 = vector.shape_cast %53 : vector<8xf32> to vector<8x1xf32>
    %55 = arith.addf %49, %54 : vector<8x1xf32>
    %56 = vector.broadcast %44 : vector<8x1xf32> to vector<8x32xf32>
    %57 = arith.subf %23, %56 : vector<8x32xf32>
    %58 = arith.mulf %57, %57 : vector<8x32xf32>
    %cst_38 = arith.constant dense<0.000000e+00> : vector<8xf32>
    %59 = vector.multi_reduction <add>, %58, %cst_38 [1] : vector<8x32xf32> to vector<8xf32>
    %60 = vector.shape_cast %59 : vector<8xf32> to vector<8x1xf32>
    %61 = arith.addf %55, %60 : vector<8x1xf32>
    %62 = vector.broadcast %44 : vector<8x1xf32> to vector<8x32xf32>
    %63 = arith.subf %31, %62 : vector<8x32xf32>
    %64 = arith.mulf %63, %63 : vector<8x32xf32>
    %cst_39 = arith.constant dense<0.000000e+00> : vector<8xf32>
    %65 = vector.multi_reduction <add>, %64, %cst_39 [1] : vector<8x32xf32> to vector<8xf32>
    %66 = vector.shape_cast %65 : vector<8xf32> to vector<8x1xf32>
    %67 = arith.addf %61, %66 : vector<8x1xf32>
    %cst_40 = arith.constant 1.280000e+02 : f32
    %68 = vector.broadcast %cst_40 : f32 to vector<8x1xf32>
    %69 = arith.divf %67, %68 : vector<8x1xf32>
    %c0_41 = arith.constant 0 : index
    %c0_42 = arith.constant 0 : index
    %70 = vector.load %arg4[%c0_41, %c0_42] : memref<8x1xf32, #tpu.memory_space<vmem>>, vector<8x1xf32>
    %cst_43 = arith.constant 9.99999974E-6 : f32
    %71 = vector.broadcast %cst_43 : f32 to vector<8x1xf32>
    %72 = arith.addf %69, %71 : vector<8x1xf32>
    %73 = math.rsqrt %72 : vector<8x1xf32>
    %74 = arith.mulf %70, %73 : vector<8x1xf32>
    %c0_44 = arith.constant 0 : index
    %c0_45 = arith.constant 0 : index
    %75 = vector.load %arg5[%c0_44, %c0_45] : memref<8x1xf32, #tpu.memory_space<vmem>>, vector<8x1xf32>
    %76 = arith.mulf %44, %74 : vector<8x1xf32>
    %77 = arith.subf %75, %76 : vector<8x1xf32>
    %78 = vector.broadcast %74 : vector<8x1xf32> to vector<8x32xf32>
    %79 = arith.mulf %7, %78 : vector<8x32xf32>
    %80 = vector.broadcast %77 : vector<8x1xf32> to vector<8x32xf32>
    %81 = arith.addf %79, %80 : vector<8x32xf32>
    %82 = vector.broadcast %74 : vector<8x1xf32> to vector<8x32xf32>
    %83 = arith.mulf %15, %82 : vector<8x32xf32>
    %84 = vector.broadcast %77 : vector<8x1xf32> to vector<8x32xf32>
    %85 = arith.addf %83, %84 : vector<8x32xf32>
    %86 = vector.broadcast %74 : vector<8x1xf32> to vector<8x32xf32>
    %87 = arith.mulf %23, %86 : vector<8x32xf32>
    %88 = vector.broadcast %77 : vector<8x1xf32> to vector<8x32xf32>
    %89 = arith.addf %87, %88 : vector<8x32xf32>
    %90 = vector.broadcast %74 : vector<8x1xf32> to vector<8x32xf32>
    %91 = arith.mulf %31, %90 : vector<8x32xf32>
    %92 = vector.broadcast %77 : vector<8x1xf32> to vector<8x32xf32>
    %93 = arith.addf %91, %92 : vector<8x32xf32>
    %cst_46 = arith.constant 0.000000e+00 : f32
    %94 = vector.broadcast %cst_46 : f32 to vector<8x32xf32>
    %95 = arith.maximumf %81, %94 : vector<8x32xf32>
    %c0_47 = arith.constant 0 : index
    %c0_48 = arith.constant 0 : index
    %c0_49 = arith.constant 0 : index
    %96 = vector.load %arg6[%c0_47, %c0_48, %c0_49] : memref<4x8x32xf32, #tpu.memory_space<vmem>>, vector<1x8x32xf32>
    %97 = vector.shape_cast %96 : vector<1x8x32xf32> to vector<8x32xf32>
    %98 = vector.shape_cast %95 : vector<8x32xf32> to vector<1x8x32xf32>
    tpu.vector_store %arg6[%c0_47, %c0_48, %c0_49], %98 {strides = array<i32>} : memref<4x8x32xf32, #tpu.memory_space<vmem>>, vector<1x8x32xf32>,
    %cst_50 = arith.constant 0.000000e+00 : f32
    %99 = vector.broadcast %cst_50 : f32 to vector<8x32xf32>
    %100 = arith.maximumf %85, %99 : vector<8x32xf32>
    %c1_51 = arith.constant 1 : index
    %c0_52 = arith.constant 0 : index
    %c0_53 = arith.constant 0 : index
    %101 = vector.load %arg6[%c1_51, %c0_52, %c0_53] : memref<4x8x32xf32, #tpu.memory_space<vmem>>, vector<1x8x32xf32>
    %102 = vector.shape_cast %101 : vector<1x8x32xf32> to vector<8x32xf32>
    %103 = vector.shape_cast %100 : vector<8x32xf32> to vector<1x8x32xf32>
    tpu.vector_store %arg6[%c1_51, %c0_52, %c0_53], %103 {strides = array<i32>} : memref<4x8x32xf32, #tpu.memory_space<vmem>>, vector<1x8x32xf32>,
    %cst_54 = arith.constant 0.000000e+00 : f32
    %104 = vector.broadcast %cst_54 : f32 to vector<8x32xf32>
    %105 = arith.maximumf %89, %104 : vector<8x32xf32>
    %c2_55 = arith.constant 2 : index
    %c0_56 = arith.constant 0 : index
    %c0_57 = arith.constant 0 : index
    %106 = vector.load %arg6[%c2_55, %c0_56, %c0_57] : memref<4x8x32xf32, #tpu.memory_space<vmem>>, vector<1x8x32xf32>
    %107 = vector.shape_cast %106 : vector<1x8x32xf32> to vector<8x32xf32>
    %108 = vector.shape_cast %105 : vector<8x32xf32> to vector<1x8x32xf32>
    tpu.vector_store %arg6[%c2_55, %c0_56, %c0_57], %108 {strides = array<i32>} : memref<4x8x32xf32, #tpu.memory_space<vmem>>, vector<1x8x32xf32>,
    %cst_58 = arith.constant 0.000000e+00 : f32
    %109 = vector.broadcast %cst_58 : f32 to vector<8x32xf32>
    %110 = arith.maximumf %93, %109 : vector<8x32xf32>
    %c3_59 = arith.constant 3 : index
    %c0_60 = arith.constant 0 : index
    %c0_61 = arith.constant 0 : index
    %111 = vector.load %arg6[%c3_59, %c0_60, %c0_61] : memref<4x8x32xf32, #tpu.memory_space<vmem>>, vector<1x8x32xf32>
    %112 = vector.shape_cast %111 : vector<1x8x32xf32> to vector<8x32xf32>
    %113 = vector.shape_cast %110 : vector<8x32xf32> to vector<1x8x32xf32>
    tpu.vector_store %arg6[%c3_59, %c0_60, %c0_61], %113 {strides = array<i32>} : memref<4x8x32xf32, #tpu.memory_space<vmem>>, vector<1x8x32xf32>,
    return
  }
  func.func @transform_0(%arg0: i32) -> (i32, i32, i32) {
    %c0_i32 = arith.constant 0 : i32
    %c0_i32_0 = arith.constant 0 : i32
    %c0_i32_1 = arith.constant 0 : i32
    %c0_i32_2 = arith.constant 0 : i32
    return %c0_i32, %c0_i32_0, %c0_i32_1 : i32, i32, i32
  }
  func.func @transform_1(%arg0: i32) -> (i32, i32, i32) {
    %c0_i32 = arith.constant 0 : i32
    %c0_i32_0 = arith.constant 0 : i32
    %c0_i32_1 = arith.constant 0 : i32
    %c0_i32_2 = arith.constant 0 : i32
    return %c0_i32, %c0_i32_0, %c0_i32_1 : i32, i32, i32
  }
  func.func @transform_2(%arg0: i32) -> (i32, i32) {
    %c0_i32 = arith.constant 0 : i32
    %c0_i32_0 = arith.constant 0 : i32
    %c0_i32_1 = arith.constant 0 : i32
    return %c0_i32, %c0_i32_0 : i32, i32
  }
  func.func @transform_3(%arg0: i32) -> (i32, i32) {
    %c0_i32 = arith.constant 0 : i32
    %c0_i32_0 = arith.constant 0 : i32
    %c0_i32_1 = arith.constant 0 : i32
    return %c0_i32, %c0_i32_0 : i32, i32
  }
  func.func @transform_4(%arg0: i32) -> (i32, i32) {
    %c0_i32 = arith.constant 0 : i32
    %c0_i32_0 = arith.constant 0 : i32
    %c0_i32_1 = arith.constant 0 : i32
    return %c0_i32, %c0_i32_0 : i32, i32
  }
  func.func @transform_5(%arg0: i32) -> (i32, i32, i32) {
    %c0_i32 = arith.constant 0 : i32
    %c0_i32_0 = arith.constant 0 : i32
    %c0_i32_1 = arith.constant 0 : i32
    %c0_i32_2 = arith.constant 0 : i32
    return %c0_i32, %c0_i32_0, %c0_i32_1 : i32, i32, i32
  }
}

module attributes {stable_mosaic.version = 11 : i64} {
  func.func @_convt_relu_final_kernel(%arg0: i32, %arg1: memref<4x8x32xbf16, #tpu.memory_space<vmem>>, %arg2: memref<4x32x128xbf16, #tpu.memory_space<vmem>>, %arg3: memref<8x1xf32, #tpu.memory_space<vmem>>, %arg4: memref<8x1xf32, #tpu.memory_space<vmem>>, %arg5: memref<1x1xf32, #tpu.memory_space<vmem>>, %arg6: memref<4x1x128xf32, #tpu.memory_space<vmem>>) attributes {dimension_semantics = [#tpu.dimension_semantics<arbitrary>], iteration_bounds = array<i64: 1>, scalar_prefetch = 0 : i64, scratch_operands = 0 : i64, tpu.core_type = #tpu.core_type<tc>, window_params = [{pipeline_mode = #tpu.pipeline_mode<synchronous>, transform_indices = @transform_0, window_bounds = array<i64: 4, 8, 32>}, {pipeline_mode = #tpu.pipeline_mode<synchronous>, transform_indices = @transform_1, window_bounds = array<i64: 4, 32, 128>}, {pipeline_mode = #tpu.pipeline_mode<synchronous>, transform_indices = @transform_2, window_bounds = array<i64: 8, 1>}, {pipeline_mode = #tpu.pipeline_mode<synchronous>, transform_indices = @transform_3, window_bounds = array<i64: 8, 1>}, {pipeline_mode = #tpu.pipeline_mode<synchronous>, transform_indices = @transform_4, window_bounds = array<i64: 1, 1>}, {pipeline_mode = #tpu.pipeline_mode<synchronous>, transform_indices = @transform_5, window_bounds = array<i64: 4, 1, 128>}]} {
    %c0 = arith.constant 0 : index
    %c0_0 = arith.constant 0 : index
    %c0_1 = arith.constant 0 : index
    %0 = vector.load %arg1[%c0, %c0_0, %c0_1] : memref<4x8x32xbf16, #tpu.memory_space<vmem>>, vector<1x8x32xbf16>
    %1 = vector.shape_cast %0 : vector<1x8x32xbf16> to vector<8x32xbf16>
    %c0_2 = arith.constant 0 : index
    %c0_3 = arith.constant 0 : index
    %c0_4 = arith.constant 0 : index
    %2 = vector.load %arg2[%c0_2, %c0_3, %c0_4] : memref<4x32x128xbf16, #tpu.memory_space<vmem>>, vector<1x32x128xbf16>
    %3 = vector.shape_cast %2 : vector<1x32x128xbf16> to vector<32x128xbf16>
    %cst = arith.constant dense<0.000000e+00> : vector<8x128xf32>
    %4 = tpu.matmul %1, %3, %cst {dimension_numbers = #tpu.dot_dimension_numbers<[1], [0], [0], [1], [0, 0, 1, 1], [], []>} : vector<8x32xbf16>, vector<32x128xbf16>, vector<8x128xf32> -> vector<8x128xf32>
    %c0_5 = arith.constant 0 : index
    %c0_6 = arith.constant 0 : index
    %5 = vector.load %arg3[%c0_5, %c0_6] : memref<8x1xf32, #tpu.memory_space<vmem>>, vector<8x1xf32>
    %6 = vector.broadcast %5 : vector<8x1xf32> to vector<8x128xf32>
    %7 = arith.addf %4, %6 : vector<8x128xf32>
    %cst_7 = arith.constant 0.000000e+00 : f32
    %8 = vector.broadcast %cst_7 : f32 to vector<8x128xf32>
    %9 = arith.maximumf %7, %8 : vector<8x128xf32>
    %c0_8 = arith.constant 0 : index
    %c0_9 = arith.constant 0 : index
    %10 = vector.load %arg4[%c0_8, %c0_9] : memref<8x1xf32, #tpu.memory_space<vmem>>, vector<8x1xf32>
    %11 = vector.broadcast %10 : vector<8x1xf32> to vector<8x128xf32>
    %12 = arith.mulf %9, %11 : vector<8x128xf32>
    %cst_10 = arith.constant dense<0.000000e+00> : vector<128xf32>
    %13 = vector.multi_reduction <add>, %12, %cst_10 [0] : vector<8x128xf32> to vector<128xf32>
    %14 = vector.shape_cast %13 : vector<128xf32> to vector<1x128xf32>
    %c0_11 = arith.constant 0 : index
    %c0_12 = arith.constant 0 : index
    %15 = vector.load %arg5[%c0_11, %c0_12] : memref<1x1xf32, #tpu.memory_space<vmem>>, vector<1x1xf32>
    %16 = vector.broadcast %15 : vector<1x1xf32> to vector<1x128xf32>
    %17 = arith.addf %14, %16 : vector<1x128xf32>
    %18 = arith.negf %17 : vector<1x128xf32>
    %19 = math.exp %18 : vector<1x128xf32>
    %cst_13 = arith.constant 1.000000e+00 : f32
    %20 = vector.broadcast %cst_13 : f32 to vector<1x128xf32>
    %21 = arith.addf %20, %19 : vector<1x128xf32>
    %22 = arith.divf %20, %21 : vector<1x128xf32>
    %c0_14 = arith.constant 0 : index
    %c0_15 = arith.constant 0 : index
    %c0_16 = arith.constant 0 : index
    %23 = vector.load %arg6[%c0_14, %c0_15, %c0_16] : memref<4x1x128xf32, #tpu.memory_space<vmem>>, vector<1x1x128xf32>
    %24 = vector.shape_cast %23 : vector<1x1x128xf32> to vector<1x128xf32>
    %25 = vector.shape_cast %22 : vector<1x128xf32> to vector<1x1x128xf32>
    tpu.vector_store %arg6[%c0_14, %c0_15, %c0_16], %25 {strides = array<i32>} : memref<4x1x128xf32, #tpu.memory_space<vmem>>, vector<1x1x128xf32>,
    %c1 = arith.constant 1 : index
    %c0_17 = arith.constant 0 : index
    %c0_18 = arith.constant 0 : index
    %26 = vector.load %arg1[%c1, %c0_17, %c0_18] : memref<4x8x32xbf16, #tpu.memory_space<vmem>>, vector<1x8x32xbf16>
    %27 = vector.shape_cast %26 : vector<1x8x32xbf16> to vector<8x32xbf16>
    %c1_19 = arith.constant 1 : index
    %c0_20 = arith.constant 0 : index
    %c0_21 = arith.constant 0 : index
    %28 = vector.load %arg2[%c1_19, %c0_20, %c0_21] : memref<4x32x128xbf16, #tpu.memory_space<vmem>>, vector<1x32x128xbf16>
    %29 = vector.shape_cast %28 : vector<1x32x128xbf16> to vector<32x128xbf16>
    %cst_22 = arith.constant dense<0.000000e+00> : vector<8x128xf32>
    %30 = tpu.matmul %27, %29, %cst_22 {dimension_numbers = #tpu.dot_dimension_numbers<[1], [0], [0], [1], [0, 0, 1, 1], [], []>} : vector<8x32xbf16>, vector<32x128xbf16>, vector<8x128xf32> -> vector<8x128xf32>
    %c0_23 = arith.constant 0 : index
    %c0_24 = arith.constant 0 : index
    %31 = vector.load %arg3[%c0_23, %c0_24] : memref<8x1xf32, #tpu.memory_space<vmem>>, vector<8x1xf32>
    %32 = vector.broadcast %31 : vector<8x1xf32> to vector<8x128xf32>
    %33 = arith.addf %30, %32 : vector<8x128xf32>
    %cst_25 = arith.constant 0.000000e+00 : f32
    %34 = vector.broadcast %cst_25 : f32 to vector<8x128xf32>
    %35 = arith.maximumf %33, %34 : vector<8x128xf32>
    %c0_26 = arith.constant 0 : index
    %c0_27 = arith.constant 0 : index
    %36 = vector.load %arg4[%c0_26, %c0_27] : memref<8x1xf32, #tpu.memory_space<vmem>>, vector<8x1xf32>
    %37 = vector.broadcast %36 : vector<8x1xf32> to vector<8x128xf32>
    %38 = arith.mulf %35, %37 : vector<8x128xf32>
    %cst_28 = arith.constant dense<0.000000e+00> : vector<128xf32>
    %39 = vector.multi_reduction <add>, %38, %cst_28 [0] : vector<8x128xf32> to vector<128xf32>
    %40 = vector.shape_cast %39 : vector<128xf32> to vector<1x128xf32>
    %c0_29 = arith.constant 0 : index
    %c0_30 = arith.constant 0 : index
    %41 = vector.load %arg5[%c0_29, %c0_30] : memref<1x1xf32, #tpu.memory_space<vmem>>, vector<1x1xf32>
    %42 = vector.broadcast %41 : vector<1x1xf32> to vector<1x128xf32>
    %43 = arith.addf %40, %42 : vector<1x128xf32>
    %44 = arith.negf %43 : vector<1x128xf32>
    %45 = math.exp %44 : vector<1x128xf32>
    %cst_31 = arith.constant 1.000000e+00 : f32
    %46 = vector.broadcast %cst_31 : f32 to vector<1x128xf32>
    %47 = arith.addf %46, %45 : vector<1x128xf32>
    %48 = arith.divf %46, %47 : vector<1x128xf32>
    %c1_32 = arith.constant 1 : index
    %c0_33 = arith.constant 0 : index
    %c0_34 = arith.constant 0 : index
    %49 = vector.load %arg6[%c1_32, %c0_33, %c0_34] : memref<4x1x128xf32, #tpu.memory_space<vmem>>, vector<1x1x128xf32>
    %50 = vector.shape_cast %49 : vector<1x1x128xf32> to vector<1x128xf32>
    %51 = vector.shape_cast %48 : vector<1x128xf32> to vector<1x1x128xf32>
    tpu.vector_store %arg6[%c1_32, %c0_33, %c0_34], %51 {strides = array<i32>} : memref<4x1x128xf32, #tpu.memory_space<vmem>>, vector<1x1x128xf32>,
    %c2 = arith.constant 2 : index
    %c0_35 = arith.constant 0 : index
    %c0_36 = arith.constant 0 : index
    %52 = vector.load %arg1[%c2, %c0_35, %c0_36] : memref<4x8x32xbf16, #tpu.memory_space<vmem>>, vector<1x8x32xbf16>
    %53 = vector.shape_cast %52 : vector<1x8x32xbf16> to vector<8x32xbf16>
    %c2_37 = arith.constant 2 : index
    %c0_38 = arith.constant 0 : index
    %c0_39 = arith.constant 0 : index
    %54 = vector.load %arg2[%c2_37, %c0_38, %c0_39] : memref<4x32x128xbf16, #tpu.memory_space<vmem>>, vector<1x32x128xbf16>
    %55 = vector.shape_cast %54 : vector<1x32x128xbf16> to vector<32x128xbf16>
    %cst_40 = arith.constant dense<0.000000e+00> : vector<8x128xf32>
    %56 = tpu.matmul %53, %55, %cst_40 {dimension_numbers = #tpu.dot_dimension_numbers<[1], [0], [0], [1], [0, 0, 1, 1], [], []>} : vector<8x32xbf16>, vector<32x128xbf16>, vector<8x128xf32> -> vector<8x128xf32>
    %c0_41 = arith.constant 0 : index
    %c0_42 = arith.constant 0 : index
    %57 = vector.load %arg3[%c0_41, %c0_42] : memref<8x1xf32, #tpu.memory_space<vmem>>, vector<8x1xf32>
    %58 = vector.broadcast %57 : vector<8x1xf32> to vector<8x128xf32>
    %59 = arith.addf %56, %58 : vector<8x128xf32>
    %cst_43 = arith.constant 0.000000e+00 : f32
    %60 = vector.broadcast %cst_43 : f32 to vector<8x128xf32>
    %61 = arith.maximumf %59, %60 : vector<8x128xf32>
    %c0_44 = arith.constant 0 : index
    %c0_45 = arith.constant 0 : index
    %62 = vector.load %arg4[%c0_44, %c0_45] : memref<8x1xf32, #tpu.memory_space<vmem>>, vector<8x1xf32>
    %63 = vector.broadcast %62 : vector<8x1xf32> to vector<8x128xf32>
    %64 = arith.mulf %61, %63 : vector<8x128xf32>
    %cst_46 = arith.constant dense<0.000000e+00> : vector<128xf32>
    %65 = vector.multi_reduction <add>, %64, %cst_46 [0] : vector<8x128xf32> to vector<128xf32>
    %66 = vector.shape_cast %65 : vector<128xf32> to vector<1x128xf32>
    %c0_47 = arith.constant 0 : index
    %c0_48 = arith.constant 0 : index
    %67 = vector.load %arg5[%c0_47, %c0_48] : memref<1x1xf32, #tpu.memory_space<vmem>>, vector<1x1xf32>
    %68 = vector.broadcast %67 : vector<1x1xf32> to vector<1x128xf32>
    %69 = arith.addf %66, %68 : vector<1x128xf32>
    %70 = arith.negf %69 : vector<1x128xf32>
    %71 = math.exp %70 : vector<1x128xf32>
    %cst_49 = arith.constant 1.000000e+00 : f32
    %72 = vector.broadcast %cst_49 : f32 to vector<1x128xf32>
    %73 = arith.addf %72, %71 : vector<1x128xf32>
    %74 = arith.divf %72, %73 : vector<1x128xf32>
    %c2_50 = arith.constant 2 : index
    %c0_51 = arith.constant 0 : index
    %c0_52 = arith.constant 0 : index
    %75 = vector.load %arg6[%c2_50, %c0_51, %c0_52] : memref<4x1x128xf32, #tpu.memory_space<vmem>>, vector<1x1x128xf32>
    %76 = vector.shape_cast %75 : vector<1x1x128xf32> to vector<1x128xf32>
    %77 = vector.shape_cast %74 : vector<1x128xf32> to vector<1x1x128xf32>
    tpu.vector_store %arg6[%c2_50, %c0_51, %c0_52], %77 {strides = array<i32>} : memref<4x1x128xf32, #tpu.memory_space<vmem>>, vector<1x1x128xf32>,
    %c3 = arith.constant 3 : index
    %c0_53 = arith.constant 0 : index
    %c0_54 = arith.constant 0 : index
    %78 = vector.load %arg1[%c3, %c0_53, %c0_54] : memref<4x8x32xbf16, #tpu.memory_space<vmem>>, vector<1x8x32xbf16>
    %79 = vector.shape_cast %78 : vector<1x8x32xbf16> to vector<8x32xbf16>
    %c3_55 = arith.constant 3 : index
    %c0_56 = arith.constant 0 : index
    %c0_57 = arith.constant 0 : index
    %80 = vector.load %arg2[%c3_55, %c0_56, %c0_57] : memref<4x32x128xbf16, #tpu.memory_space<vmem>>, vector<1x32x128xbf16>
    %81 = vector.shape_cast %80 : vector<1x32x128xbf16> to vector<32x128xbf16>
    %cst_58 = arith.constant dense<0.000000e+00> : vector<8x128xf32>
    %82 = tpu.matmul %79, %81, %cst_58 {dimension_numbers = #tpu.dot_dimension_numbers<[1], [0], [0], [1], [0, 0, 1, 1], [], []>} : vector<8x32xbf16>, vector<32x128xbf16>, vector<8x128xf32> -> vector<8x128xf32>
    %c0_59 = arith.constant 0 : index
    %c0_60 = arith.constant 0 : index
    %83 = vector.load %arg3[%c0_59, %c0_60] : memref<8x1xf32, #tpu.memory_space<vmem>>, vector<8x1xf32>
    %84 = vector.broadcast %83 : vector<8x1xf32> to vector<8x128xf32>
    %85 = arith.addf %82, %84 : vector<8x128xf32>
    %cst_61 = arith.constant 0.000000e+00 : f32
    %86 = vector.broadcast %cst_61 : f32 to vector<8x128xf32>
    %87 = arith.maximumf %85, %86 : vector<8x128xf32>
    %c0_62 = arith.constant 0 : index
    %c0_63 = arith.constant 0 : index
    %88 = vector.load %arg4[%c0_62, %c0_63] : memref<8x1xf32, #tpu.memory_space<vmem>>, vector<8x1xf32>
    %89 = vector.broadcast %88 : vector<8x1xf32> to vector<8x128xf32>
    %90 = arith.mulf %87, %89 : vector<8x128xf32>
    %cst_64 = arith.constant dense<0.000000e+00> : vector<128xf32>
    %91 = vector.multi_reduction <add>, %90, %cst_64 [0] : vector<8x128xf32> to vector<128xf32>
    %92 = vector.shape_cast %91 : vector<128xf32> to vector<1x128xf32>
    %c0_65 = arith.constant 0 : index
    %c0_66 = arith.constant 0 : index
    %93 = vector.load %arg5[%c0_65, %c0_66] : memref<1x1xf32, #tpu.memory_space<vmem>>, vector<1x1xf32>
    %94 = vector.broadcast %93 : vector<1x1xf32> to vector<1x128xf32>
    %95 = arith.addf %92, %94 : vector<1x128xf32>
    %96 = arith.negf %95 : vector<1x128xf32>
    %97 = math.exp %96 : vector<1x128xf32>
    %cst_67 = arith.constant 1.000000e+00 : f32
    %98 = vector.broadcast %cst_67 : f32 to vector<1x128xf32>
    %99 = arith.addf %98, %97 : vector<1x128xf32>
    %100 = arith.divf %98, %99 : vector<1x128xf32>
    %c3_68 = arith.constant 3 : index
    %c0_69 = arith.constant 0 : index
    %c0_70 = arith.constant 0 : index
    %101 = vector.load %arg6[%c3_68, %c0_69, %c0_70] : memref<4x1x128xf32, #tpu.memory_space<vmem>>, vector<1x1x128xf32>
    %102 = vector.shape_cast %101 : vector<1x1x128xf32> to vector<1x128xf32>
    %103 = vector.shape_cast %100 : vector<1x128xf32> to vector<1x1x128xf32>
    tpu.vector_store %arg6[%c3_68, %c0_69, %c0_70], %103 {strides = array<i32>} : memref<4x1x128xf32, #tpu.memory_space<vmem>>, vector<1x1x128xf32>,
    return
  }
  func.func @transform_0(%arg0: i32) -> (i32, i32, i32) {
    %c0_i32 = arith.constant 0 : i32
    %c0_i32_0 = arith.constant 0 : i32
    %c0_i32_1 = arith.constant 0 : i32
    %c0_i32_2 = arith.constant 0 : i32
    return %c0_i32, %c0_i32_0, %c0_i32_1 : i32, i32, i32
  }
  func.func @transform_1(%arg0: i32) -> (i32, i32, i32) {
    %c0_i32 = arith.constant 0 : i32
    %c0_i32_0 = arith.constant 0 : i32
    %c0_i32_1 = arith.constant 0 : i32
    %c0_i32_2 = arith.constant 0 : i32
    return %c0_i32, %c0_i32_0, %c0_i32_1 : i32, i32, i32
  }
  func.func @transform_2(%arg0: i32) -> (i32, i32) {
    %c0_i32 = arith.constant 0 : i32
    %c0_i32_0 = arith.constant 0 : i32
    %c0_i32_1 = arith.constant 0 : i32
    return %c0_i32, %c0_i32_0 : i32, i32
  }
  func.func @transform_3(%arg0: i32) -> (i32, i32) {
    %c0_i32 = arith.constant 0 : i32
    %c0_i32_0 = arith.constant 0 : i32
    %c0_i32_1 = arith.constant 0 : i32
    return %c0_i32, %c0_i32_0 : i32, i32
  }
  func.func @transform_4(%arg0: i32) -> (i32, i32) {
    %c0_i32 = arith.constant 0 : i32
    %c0_i32_0 = arith.constant 0 : i32
    %c0_i32_1 = arith.constant 0 : i32
    return %c0_i32, %c0_i32_0 : i32, i32
  }
  func.func @transform_5(%arg0: i32) -> (i32, i32, i32) {
    %c0_i32 = arith.constant 0 : i32
    %c0_i32_0 = arith.constant 0 : i32
    %c0_i32_1 = arith.constant 0 : i32
    %c0_i32_2 = arith.constant 0 : i32
    return %c0_i32, %c0_i32_0, %c0_i32_1 : i32, i32, i32
  }
}

</mosaic_0001>

<bundles_post_ra>
// kernel: autoencoder_forward.8
= control target key start
LH: loop header
LB: loop body
LE: loop exit
PB: predicated region body
PF: predicated region fallthrough
CT: control target
= control target key end

     0   :  { %v156_v0 = vmov 0.0   ;;  %vm157_vm0 = vmmov 0   ;;  %v158_v2 = vmov 0   ;;  %vm52_vm1 = vcmask 392192   ;;  %s213_s1 = inlined_call_operand.vmem [shape: bf16[48,128], index: 1, kind: input, shape index: {}]   ;;  %s214_s2 = inlined_call_operand.vmem [shape: f32[8,1], index: 2, kind: input, shape index: {}]   ;;  %s215_s0 = inlined_call_operand.vmem [shape: bf16[8,48], index: 0, kind: input, shape index: {}]   ;;  %s216_s3 = inlined_call_operand.vmem [shape: f32[8,1], index: 3, kind: input, shape index: {}]   ;;  %s217_s4 = inlined_call_operand.vmem [shape: f32[8,1], index: 4, kind: input, shape index: {}]   ;;  %s218_s5 = inlined_call_operand.vmem [shape: f32[8,128], index: 5, kind: output, shape index: {}]  }
   0x1   :  { %136 = vmatprep.subr.bf16.mxu0 %v156_v0  ;;  %v151_v1 = vld [vmem:[%s213_s1 + $0x10] sm:$0xff]   ;;  %142 = vmatprep.mubr.msk.bf16.mxu0 %vm157_vm0, %v156_v0  ;;  %v152_v3 = vld [vmem:[%s213_s1 + $0x8] sm:$0xff]   ;;  %v28_v4 = vld [vmem:[%s214_s2] sm:$0xff] }
   0x2   :  { %149 = vset.pattern.permute.xlu0 %v158_v2  ;;  %150 = vset.pattern.permute.xlu1 %v158_v2  ;;  %v153_v5 = vld [vmem:[%s213_s1] sm:$0xff]  }
   0x3   :  { %137 = vmatpush3.bf16.msra.mxu0 %v151_v1  ;;  %31 = vperm.xlu0 %149, %v28_v4   ;;  %v21_v6 = vld [vmem:[%s215_s0] sm:$0xf] }
   0x4   :  { %138 = vmatprep.subr.bf16.mxu0 %v156_v0  ;;  %v105_v20 = vld [vmem:[%s216_s3] sm:$0xff] }
   0x5   :  { %v115_v23 = vld [vmem:[%s217_s4] sm:$0xff] }
   0x7   :  { %139 = vmatpush3.bf16.msra.mxu0 %v152_v3 }
   0x8   :  { %140 = vmatprep.subr.bf16.mxu0 %v156_v0 }
   0xb   :  { %141 = vmatpush3.bf16.msra.mxu0 %v153_v5 }
   0xe   :  { %143 = vmatmul.mubr.msk.bf16.vlgmr.msra.gmra.mxu0 %vm52_vm1, %v21_v6 }
  0x7e   :  { %v32_v7 = vpop.permute.xlu0 %31 }
  0xce   :  { %v90_v8 = vpop.f32.mrf.mxu0 }
  0xcf   :  { %v91_v9 = vadd.f32 %v90_v8, %v32_v7 }
  0xd0   :  { %v144_v10 = vpop.f32.mrf.mxu0 }
  0xd1   :  { %96 = vadd.xlane.f32.xlu0 %v91_v9 }
  0xd2   :  { %v93_v11 = vpop.f32.mrf.mxu0 }
  0xd4   :  { %v145_v12 = vpop.f32.mrf.mxu0 }
 0x15a   :  { %v97_v13 = vpop.xlane.xlu0 %96 }
 0x15b   :  { %v99_v14 = vmul.f32 0.0078125, %v97_v13 }
 0x15d   :  { %v100_v15 = vsub.f32 %v91_v9, %v99_v14 }
 0x15f   :  { %v101_v16 = vmul.f32 %v100_v15, %v100_v15 }
 0x161   :  { %102 = vadd.xlane.f32.xlu1 %v101_v16 }
 0x1ea   :  { %v103_v17 = vpop.xlane.xlu1 %102 }
 0x1eb   :  { %v104_v18 = vmul.f32 0.0078125, %v103_v17 }
 0x1ed   :  { %v106_v19 = vadd.f32 1e-05, %v104_v18 }
 0x1ef   :  { %154 = vrsqrt.f32 %v106_v19 }
 0x1fc   :  { %v155_v21 = vpop.eup %154 }
 0x1fd   :  { %v108_v22 = vmul.f32 %v155_v21, %v105_v20 }
 0x1ff   :  { %111 = vperm.xlu1 %150, %v108_v22  }
 0x203   :  { %118 = vperm.xlu1 %150, %v115_v23  }
 0x27a   :  { %v112_v24 = vpop.permute.xlu1 %111 }
 0x27b   :  { %v114_v25 = vmul.f32 %v112_v24, %v100_v15 }
 0x27e   :  { %v119_v26 = vpop.permute.xlu1 %118 }
 0x27f   :  { %v121_v27 = vadd.f32 %v119_v26, %v114_v25 }
 0x281   :  { %v122_v28 = vmax.f32 %v121_v27, 0.0 }
 0x283   :  { %123 = vst [vmem:[%s218_s5] sm:$0xff] %v122_v28 }

// kernel: autoencoder_forward.9
= control target key start
LH: loop header
LB: loop body
LE: loop exit
PB: predicated region body
PF: predicated region fallthrough
CT: control target
= control target key end

     0   :  { %v266_v0 = vmov 0.0   ;;  %vm267_vm0 = vmmov 0   ;;  %v268_v2 = vmov 0   ;;  %vm146_vm1 = vcmask 261120   ;;  %s356_s1 = inlined_call_operand.vmem [shape: bf16[128,32], index: 1, kind: input, shape index: {}]   ;;  %s357_s2 = inlined_call_operand.vmem [shape: f32[16,1], index: 2, kind: input, shape index: {}]   ;;  %s358_s0 = inlined_call_operand.vmem [shape: bf16[16,128], index: 0, kind: input, shape index: {}]   ;;  %s359_s4 = inlined_call_operand.vmem [shape: f32[16,1], index: 4, kind: input, shape index: {}]   ;;  %s360_s3 = inlined_call_operand.vmem [shape: f32[16,1], index: 3, kind: input, shape index: {}]   ;;  %s361_s5 = inlined_call_operand.vmem [shape: f32[16,32], index: 5, kind: output, shape index: {}]  }
   0x1   :  { %228 = vmatprep.subr.bf16.mxu0 %v266_v0  ;;  %v253_v1 = vld [vmem:[%s356_s1 + $0x38] sm:$0xff]   ;;  %244 = vmatprep.mubr.msk.bf16.mxu0 %vm267_vm0, %v266_v0  ;;  %v254_v3 = vld [vmem:[%s356_s1 + $0x30] sm:$0xff]   ;;  %v255_v4 = vld [vmem:[%s356_s1 + $0x28] sm:$0xff]  }
   0x2   :  { %251 = vset.pattern.permute.xlu0 %v268_v2  ;;  %252 = vset.pattern.permute.xlu1 %v268_v2  ;;  %v39_v5 = vld [vmem:[%s357_s2] sm:$0xff]  ;;  %v40_v7 = vld [vmem:[%s357_s2 + $0x8] sm:$0xff]  ;;  %v257_v8 = vld [vmem:[%s356_s1 + $0x18] sm:$0xff]  }
   0x3   :  { %229 = vmatpush3.bf16.msra.mxu0 %v253_v1  ;;  %v256_v6 = vld [vmem:[%s356_s1 + $0x20] sm:$0xff]   ;;  %43 = vperm.xlu0 %251, %v39_v5   ;;  %v258_v9 = vld [vmem:[%s356_s1 + $0x10] sm:$0xff]   ;;  %v259_v10 = vld [vmem:[%s356_s1 + $0x8] sm:$0xff]  }
   0x4   :  { %230 = vmatprep.subr.bf16.mxu0 %v266_v0  ;;  %v260_v11 = vld [vmem:[%s356_s1] sm:$0xff]   ;;  %v169_v43 = vld [vmem:[%s360_s3 + $0x8] sm:$0xff] }
   0x5   :  { %v261_v12 = vld [vmem:[%s358_s0] sm:$0xff]   ;;  %v189_v46 = vld [vmem:[%s359_s4 + $0x8] sm:$0xff] }
   0x6   :  { %v188_v33 = vld [vmem:[%s359_s4] sm:$0xff] }
   0x7   :  { %231 = vmatpush3.bf16.msra.mxu0 %v254_v3  ;;  %48 = vperm.xlu0 %251, %v40_v7   ;;  %v168_v40 = vld [vmem:[%s360_s3] sm:$0xff] }
   0x8   :  { %232 = vmatprep.subr.bf16.mxu0 %v266_v0 }
   0xb   :  { %233 = vmatpush3.bf16.msra.mxu0 %v255_v4 }
   0xc   :  { %234 = vmatprep.subr.bf16.mxu0 %v266_v0 }
   0xf   :  { %235 = vmatpush3.bf16.msra.mxu0 %v256_v6 }
  0x10   :  { %236 = vmatprep.subr.bf16.mxu0 %v266_v0 }
  0x13   :  { %237 = vmatpush3.bf16.msra.mxu0 %v257_v8 }
  0x14   :  { %238 = vmatprep.subr.bf16.mxu0 %v266_v0 }
  0x17   :  { %239 = vmatpush3.bf16.msra.mxu0 %v258_v9 }
  0x18   :  { %240 = vmatprep.subr.bf16.mxu0 %v266_v0 }
  0x1b   :  { %241 = vmatpush3.bf16.msra.mxu0 %v259_v10 }
  0x1c   :  { %242 = vmatprep.subr.bf16.mxu0 %v266_v0 }
  0x1f   :  { %243 = vmatpush3.bf16.msra.mxu0 %v260_v11 }
  0x22   :  { %245 = vmatmul.mubr.bf16.vlgmr.msra.gmra.mxu0 %v261_v12 }
  0x7e   :  { %v44_v13 = vpop.permute.xlu0 %43 }
  0x82   :  { %v49_v18 = vpop.permute.xlu0 %48 }
  0xe2   :  { %v139_v14 = vpop.f32.mrf.mxu0 }
  0xe3   :  { %v140_v15 = vadd.f32 %v139_v14, %v44_v13 }
  0xe4   :  { %v246_v16 = vpop.f32.mrf.mxu0 }
  0xe5   :  { %v147_v17 = vsel %vm146_vm1, %v140_v15, 0.0 }
  0xe6   :  { %148 = vadd.xlane.f32.xlu1 %v147_v17  ;;  %v142_v19 = vpop.f32.mrf.mxu0 }
  0xe7   :  { %v143_v20 = vadd.f32 %v142_v19, %v49_v18 }
  0xe8   :  { %v247_v21 = vpop.f32.mrf.mxu0 }
  0xe9   :  { %v150_v22 = vsel %vm146_vm1, %v143_v20, 0.0 }
  0xea   :  { %151 = vadd.xlane.f32.xlu1 %v150_v22 }
 0x16f   :  { %v149_v23 = vpop.xlane.xlu1 %148 }
 0x170   :  { %v154_v24 = vmul.f32 0.03125, %v149_v23 }
 0x172   :  { %v156_v25 = vsub.f32 %v140_v15, %v154_v24 }
 0x173   :  { %v152_v26 = vpop.xlane.xlu1 %151 }
 0x174   :  { %v155_v27 = vmul.f32 0.03125, %v152_v26  ;;  %v158_v28 = vmul.f32 %v156_v25, %v156_v25 }
 0x176   :  { %v157_v29 = vsub.f32 %v143_v20, %v155_v27  ;;  %v160_v30 = vsel %vm146_vm1, %v158_v28, 0.0 }
 0x177   :  { %161 = vadd.xlane.f32.xlu0 %v160_v30 }
 0x178   :  { %v159_v31 = vmul.f32 %v157_v29, %v157_v29 }
 0x17a   :  { %v163_v32 = vsel %vm146_vm1, %v159_v31, 0.0 }
 0x17b   :  { %164 = vadd.xlane.f32.xlu1 %v163_v32 }
 0x18c   :  { %192 = vperm.xlu1 %252, %v188_v33  }
 0x200   :  { %v162_v34 = vpop.xlane.xlu0 %161 }
 0x201   :  { %v166_v35 = vmul.f32 0.03125, %v162_v34 }
 0x203   :  { %v170_v36 = vadd.f32 1e-05, %v166_v35 }
 0x204   :  { %v165_v37 = vpop.xlane.xlu1 %164 }
 0x205   :  { %262 = vrsqrt.f32 %v170_v36  ;;  %v167_v38 = vmul.f32 0.03125, %v165_v37 }
 0x207   :  { %v171_v39 = vadd.f32 1e-05, %v167_v38 }
 0x208   :  { %v193_v47 = vpop.permute.xlu1 %192 }
 0x209   :  { %264 = vrsqrt.f32 %v171_v39 }
 0x212   :  { %v263_v41 = vpop.eup %262 }
 0x213   :  { %v174_v42 = vmul.f32 %v263_v41, %v168_v40 }
 0x215   :  { %178 = vperm.xlu1 %252, %v174_v42  }
 0x216   :  { %v265_v44 = vpop.eup %264 }
 0x217   :  { %v175_v45 = vmul.f32 %v265_v44, %v169_v43 }
 0x219   :  { %183 = vperm.xlu1 %252, %v175_v45  }
 0x21d   :  { %197 = vperm.xlu1 %252, %v189_v46  }
 0x290   :  { %v179_v48 = vpop.permute.xlu1 %178 }
 0x291   :  { %v186_v49 = vmul.f32 %v179_v48, %v156_v25 }
 0x293   :  { %v200_v50 = vadd.f32 %v193_v47, %v186_v49 }
 0x294   :  { %v184_v51 = vpop.permute.xlu1 %183 }
 0x295   :  { %v202_v52 = vmax.f32 %v200_v50, 0.0  ;;  %v187_v53 = vmul.f32 %v184_v51, %v157_v29 }
 0x297   :  { %204 = vst.msk [vmem:[%s361_s5] sm:$0xff] %vm146_vm1, %v202_v52 }
 0x298   :  { %v198_v54 = vpop.permute.xlu1 %197 }
 0x299   :  { %v201_v55 = vadd.f32 %v198_v54, %v187_v53 }
 0x29b   :  { %v203_v56 = vmax.f32 %v201_v55, 0.0 }
 0x29d   :  { %205 = vst.msk [vmem:[%s361_s5 + $0x8] sm:$0xff] %vm146_vm1, %v203_v56 }

// kernel: autoencoder_forward.10
= control target key start
LH: loop header
LB: loop body
LE: loop exit
PB: predicated region body
PF: predicated region fallthrough
CT: control target
= control target key end

     0   :  { %v465_v1 = vmov 0   ;;  %vm246_vm0 = vcmask 64512   ;;  %s636_s1 = inlined_call_operand.vmem [shape: bf16[256,8], index: 1, kind: input, shape index: {}]   ;;  %s637_s0 = inlined_call_operand.vmem [shape: bf16[32,256], index: 0, kind: input, shape index: {}]   ;;  %s638_s2 = inlined_call_operand.vmem [shape: f32[32,1], index: 2, kind: input, shape index: {}]   ;;  %s639_s4 = inlined_call_operand.vmem [shape: f32[32,1], index: 4, kind: input, shape index: {}]   ;;  %s640_s3 = inlined_call_operand.vmem [shape: f32[32,1], index: 3, kind: input, shape index: {}]   ;;  %s641_s5 = inlined_call_operand.vmem [shape: f32[32,8], index: 5, kind: output, shape index: {}]  }
   0x1   :  { %v435_v0 = vld [vmem:[%s636_s1 + $0x78] sm:$0xff]   ;;  %433 = vset.pattern.permute.xlu0 %v465_v1  ;;  %434 = vset.pattern.permute.xlu1 %v465_v1  ;;  %v437_v3 = vld [vmem:[%s636_s1 + $0x70] sm:$0xff]   ;;  %v439_v5 = vld [vmem:[%s636_s1 + $0x68] sm:$0xff]  }
   0x2   :  { %v436_v2 = vld [vmem:[%s636_s1 + $0x38] sm:$0xff]   ;;  %388 = vmatprep.subr.bf16.mxu0 %v435_v0  ;;  %416 = vmatprep.subr.bf16.mxu1 %v435_v0  ;;  %v438_v4 = vld [vmem:[%s636_s1 + $0x30] sm:$0xff]   ;;  %v440_v6 = vld [vmem:[%s636_s1 + $0x28] sm:$0xff]  }
   0x3   :  { %389 = vmatpush3.bf16.msra.mxu0 %v436_v2  ;;  %424 = vmatpush3.bf16.msra.mxu1 %v436_v2  ;;  %v441_v7 = vld [vmem:[%s636_s1 + $0x60] sm:$0xff]   ;;  %v443_v9 = vld [vmem:[%s636_s1 + $0x58] sm:$0xff]   ;;  %v445_v11 = vld [vmem:[%s636_s1 + $0x50] sm:$0xff]  }
   0x4   :  { %390 = vmatprep.subr.bf16.mxu0 %v437_v3  ;;  %417 = vmatprep.subr.bf16.mxu1 %v437_v3  ;;  %v442_v8 = vld [vmem:[%s636_s1 + $0x20] sm:$0xff]   ;;  %v444_v10 = vld [vmem:[%s636_s1 + $0x18] sm:$0xff]   ;;  %v446_v14 = vld [vmem:[%s636_s1 + $0x10] sm:$0xff]  }
   0x5   :  { %v453_v12 = vld [vmem:[%s637_s0 + $0x4] ss:$8 sps:$4 sm:$0xff]   ;;  %v456_v13 = vld [vmem:[%s637_s0 + $0x14] ss:$8 sps:$4 sm:$0xff]   ;;  %v451_v23 = vld [vmem:[%s637_s0] ss:$8 sps:$4 sm:$0xff]  }
   0x6   :  { %v57_v15 = vld [vmem:[%s638_s2] sm:$0xff]  ;;  %v59_v16 = vld [vmem:[%s638_s2 + $0x10] sm:$0xff]  ;;  %v447_v17 = vld [vmem:[%s636_s1 + $0x48] sm:$0xff]   ;;  %229 = vmatprep.mubr.bf16.mxu0 %v453_v12  ;;  %237 = vmatprep.mubr.bf16.mxu1 %v456_v13 }
   0x7   :  { %391 = vmatpush3.bf16.msra.mxu0 %v438_v4  ;;  %425 = vmatpush3.bf16.msra.mxu1 %v438_v4  ;;  %v448_v18 = vld [vmem:[%s636_s1 + $0x8] sm:$0xff]   ;;  %v60_v20 = vld [vmem:[%s638_s2 + $0x18] sm:$0xff]  ;;  %v449_v21 = vld [vmem:[%s636_s1 + $0x40] sm:$0xff]  }
   0x8   :  { %392 = vmatprep.subr.bf16.mxu0 %v439_v5  ;;  %418 = vmatprep.subr.bf16.mxu1 %v439_v5  ;;  %v58_v19 = vld [vmem:[%s638_s2 + $0x8] sm:$0xff]  ;;  %v450_v22 = vld [vmem:[%s636_s1] sm:$0xff]   ;;  %v454_v24 = vld [vmem:[%s637_s0 + $0x10] ss:$8 sps:$4 sm:$0xff]  }
   0x9   :  { %63 = vperm.xlu0 %433, %v57_v15   ;;  %73 = vperm.xlu1 %434, %v59_v16   ;;  %v329_v5 = vld [vmem:[%s639_s4 + $0x8] sm:$0xff] }
   0xb   :  { %393 = vmatpush3.bf16.msra.mxu0 %v440_v6  ;;  %426 = vmatpush3.bf16.msra.mxu1 %v440_v6  ;;  %v328_v6 = vld [vmem:[%s639_s4] sm:$0xff] }
   0xc   :  { %394 = vmatprep.subr.bf16.mxu0 %v441_v7  ;;  %419 = vmatprep.subr.bf16.mxu1 %v441_v7 }
   0xd   :  { %68 = vperm.xlu0 %433, %v58_v19   ;;  %78 = vperm.xlu1 %434, %v60_v20   ;;  %v288_v19 = vld [vmem:[%s640_s3] sm:$0xff] }
   0xf   :  { %395 = vmatpush3.bf16.msra.mxu0 %v442_v8  ;;  %427 = vmatpush3.bf16.msra.mxu1 %v442_v8 }
  0x10   :  { %396 = vmatprep.subr.bf16.mxu0 %v443_v9  ;;  %420 = vmatprep.subr.bf16.mxu1 %v443_v9 }
  0x13   :  { %397 = vmatpush3.bf16.msra.mxu0 %v444_v10  ;;  %428 = vmatpush3.bf16.msra.mxu1 %v444_v10 }
  0x14   :  { %398 = vmatprep.subr.bf16.mxu0 %v445_v11  ;;  %421 = vmatprep.subr.bf16.mxu1 %v445_v11 }
  0x17   :  { %399 = vmatpush3.bf16.msra.mxu0 %v446_v14  ;;  %429 = vmatpush3.bf16.msra.mxu1 %v446_v14 }
  0x18   :  { %400 = vmatprep.subr.bf16.mxu0 %v447_v17  ;;  %422 = vmatprep.subr.bf16.mxu1 %v447_v17 }
  0x1b   :  { %401 = vmatpush3.bf16.msra.mxu0 %v448_v18  ;;  %430 = vmatpush3.bf16.msra.mxu1 %v448_v18 }
  0x1c   :  { %402 = vmatprep.subr.bf16.mxu0 %v449_v21  ;;  %423 = vmatprep.subr.bf16.mxu1 %v449_v21 }
  0x1f   :  { %403 = vmatpush3.bf16.msra.mxu0 %v450_v22  ;;  %431 = vmatpush3.bf16.msra.mxu1 %v450_v22  ;;  %v290_v22 = vld [vmem:[%s640_s3 + $0x10] sm:$0xff] }
  0x22   :  { %230 = vmatmul.mubr.bf16.vlgmr.msra.gmra.mxu0 %v451_v23  ;;  %238 = vmatmul.mubr.bf16.vlgmr.msra.gmra.mxu1 %v454_v24  ;;  %v289_v23 = vld [vmem:[%s640_s3 + $0x8] sm:$0xff] }
  0x84   :  { %v64_v27 = vpop.permute.xlu0 %63  ;;  %v74_v28 = vpop.permute.xlu1 %73 }
  0x88   :  { %v69_v42 = vpop.permute.xlu0 %68  ;;  %v79_v43 = vpop.permute.xlu1 %78 }
  0xe2   :  { %v404_v25 = vpop.f32.mrf.mxu0  ;;  %v410_v26 = vpop.f32.mrf.mxu1 }
  0xe4   :  { %v405_v29 = vpop.f32.mrf.mxu0  ;;  %v411_v30 = vpop.f32.mrf.mxu1 }
  0xe5   :  { %v406_v31 = vadd.f32 %v405_v29, %v404_v25  ;;  %v412_v32 = vadd.f32 %v411_v30, %v410_v26  ;;  %v330_v30 = vld [vmem:[%s639_s4 + $0x10] sm:$0xff] }
  0xe6   :  { %v407_v33 = vpop.f32.mrf.mxu0  ;;  %v413_v34 = vpop.f32.mrf.mxu1 }
  0xe7   :  { %v232_v35 = vadd.f32 %v406_v31, %v64_v27  ;;  %v240_v38 = vadd.f32 %v412_v32, %v74_v28  ;;  %v291_v28 = vld [vmem:[%s640_s3 + $0x18] sm:$0xff] }
  0xe8   :  { %v408_v36 = vpop.f32.mrf.mxu0  ;;  %v414_v37 = vpop.f32.mrf.mxu1  ;;  %v331_v32 = vld [vmem:[%s639_s4 + $0x18] sm:$0xff] }
  0xe9   :  { %v409_v39 = vadd.f32 %v408_v36, %v407_v33  ;;  %v415_v40 = vadd.f32 %v414_v37, %v413_v34  ;;  %v247_v41 = vsel %vm246_vm0, %v232_v35, 0.0  ;;  %v253_v47 = vsel %vm246_vm0, %v240_v38, 0.0 }
  0xea   :  { %248 = vadd.xlane.f32.xlu0 %v247_v41 }
  0xeb   :  { %v235_v44 = vadd.f32 %v409_v39, %v69_v42  ;;  %v243_v45 = vadd.f32 %v415_v40, %v79_v43 }
  0xed   :  { %v250_v46 = vsel %vm246_vm0, %v235_v44, 0.0  ;;  %v256_v48 = vsel %vm246_vm0, %v243_v45, 0.0 }
  0xee   :  { %251 = vadd.xlane.f32.xlu1 %v250_v46  ;;  %254 = vadd.xlane.f32.xlu0 %v253_v47 }
  0xf2   :  { %257 = vadd.xlane.f32.xlu0 %v256_v48 }
 0x173   :  { %v249_v49 = vpop.xlane.xlu0 %248 }
 0x174   :  { %v260_v50 = vmul.f32 0.125, %v249_v49 }
 0x176   :  { %v572_v51 = vsub.f32 %v232_v35, %v260_v50 }
 0x177   :  { %v252_v52 = vpop.xlane.xlu1 %251  ;;  %v255_v53 = vpop.xlane.xlu0 %254 }
 0x178   :  { %v261_v54 = vmul.f32 0.125, %v252_v52  ;;  %v262_v55 = vmul.f32 0.125, %v255_v53  ;;  %v268_v56 = vmul.f32 %v572_v51, %v572_v51 }
 0x17a   :  { %v576_v57 = vsub.f32 %v235_v44, %v261_v54  ;;  %v578_v58 = vsub.f32 %v240_v38, %v262_v55  ;;  %v272_v59 = vsel %vm246_vm0, %v268_v56, 0.0 }
 0x17b   :  { %273 = vadd.xlane.f32.xlu1 %v272_v59  ;;  %v258_v60 = vpop.xlane.xlu0 %257 }
 0x17c   :  { %v263_v61 = vmul.f32 0.125, %v258_v60  ;;  %v269_v62 = vmul.f32 %v576_v57, %v576_v57  ;;  %v270_v63 = vmul.f32 %v578_v58, %v578_v58 }
 0x17e   :  { %v585_v0 = vsub.f32 %v243_v45, %v263_v61  ;;  %v275_v1 = vsel %vm246_vm0, %v269_v62, 0.0  ;;  %v278_v2 = vsel %vm246_vm0, %v270_v63, 0.0 }
 0x17f   :  { %276 = vadd.xlane.f32.xlu0 %v275_v1  ;;  %279 = vadd.xlane.f32.xlu1 %v278_v2 }
 0x180   :  { %v271_v3 = vmul.f32 %v585_v0, %v585_v0 }
 0x182   :  { %v281_v4 = vsel %vm246_vm0, %v271_v3, 0.0 }
 0x183   :  { %282 = vadd.xlane.f32.xlu0 %v281_v4 }
 0x190   :  { %339 = vperm.xlu1 %434, %v329_v5  }
 0x199   :  { %334 = vperm.xlu0 %433, %v328_v6  }
 0x204   :  { %v274_v7 = vpop.xlane.xlu1 %273 }
 0x205   :  { %v284_v8 = vmul.f32 0.125, %v274_v7 }
 0x207   :  { %v292_v9 = vadd.f32 1e-05, %v284_v8 }
 0x208   :  { %v280_v10 = vpop.xlane.xlu1 %279  ;;  %v277_v11 = vpop.xlane.xlu0 %276 }
 0x209   :  { %457 = vrsqrt.f32 %v292_v9  ;;  %v286_v12 = vmul.f32 0.125, %v280_v10  ;;  %v285_v13 = vmul.f32 0.125, %v277_v11 }
 0x20b   :  { %v294_v14 = vadd.f32 1e-05, %v286_v12  ;;  %v293_v15 = vadd.f32 1e-05, %v285_v13 }
 0x20c   :  { %v283_v16 = vpop.xlane.xlu0 %282  ;;  %v340_v33 = vpop.permute.xlu1 %339 }
 0x20d   :  { %459 = vrsqrt.f32 %v294_v14  ;;  %v287_v17 = vmul.f32 0.125, %v283_v16 }
 0x20e   :  { %461 = vrsqrt.f32 %v293_v15 }
 0x20f   :  { %v295_v18 = vadd.f32 1e-05, %v287_v17 }
 0x211   :  { %463 = vrsqrt.f32 %v295_v18 }
 0x214   :  { %v335_v35 = vpop.permute.xlu0 %334 }
 0x216   :  { %v458_v20 = vpop.eup %457 }
 0x217   :  { %v300_v21 = vmul.f32 %v458_v20, %v288_v19 }
 0x219   :  { %306 = vperm.xlu1 %434, %v300_v21  }
 0x21a   :  { %v460_v24 = vpop.eup %459 }
 0x21b   :  { %v462_v25 = vpop.eup %461  ;;  %v302_v26 = vmul.f32 %v460_v24, %v290_v22 }
 0x21c   :  { %v301_v27 = vmul.f32 %v462_v25, %v289_v23 }
 0x21d   :  { %316 = vperm.xlu1 %434, %v302_v26  }
 0x21e   :  { %v464_v29 = vpop.eup %463  ;;  %311 = vperm.xlu0 %433, %v301_v27  }
 0x21f   :  { %v303_v31 = vmul.f32 %v464_v29, %v291_v28 }
 0x221   :  { %321 = vperm.xlu1 %434, %v303_v31  }
 0x222   :  { %344 = vperm.xlu0 %433, %v330_v30  }
 0x225   :  { %349 = vperm.xlu1 %434, %v331_v32  }
 0x294   :  { %v307_v34 = vpop.permute.xlu1 %306 }
 0x295   :  { %v324_v36 = vmul.f32 %v307_v34, %v572_v51 }
 0x297   :  { %v352_v37 = vadd.f32 %v335_v35, %v324_v36 }
 0x298   :  { %v317_v38 = vpop.permute.xlu1 %316 }
 0x299   :  { %v356_v39 = vmax.f32 %v352_v37, 0.0  ;;  %v312_v40 = vpop.permute.xlu0 %311  ;;  %v326_v42 = vmul.f32 %v317_v38, %v578_v58 }
 0x29a   :  { %v325_v41 = vmul.f32 %v312_v40, %v576_v57 }
 0x29b   :  { %360 = vst.msk [vmem:[%s641_s5] sm:$0xff] %vm246_vm0, %v356_v39 }
 0x29c   :  { %v353_v43 = vadd.f32 %v340_v33, %v325_v41  ;;  %v322_v44 = vpop.permute.xlu1 %321 }
 0x29d   :  { %v345_v45 = vpop.permute.xlu0 %344  ;;  %v327_v48 = vmul.f32 %v322_v44, %v585_v0 }
 0x29e   :  { %v357_v46 = vmax.f32 %v353_v43, 0.0  ;;  %v354_v47 = vadd.f32 %v345_v45, %v326_v42 }
 0x2a0   :  { %361 = vst.msk [vmem:[%s641_s5 + $0x8] sm:$0xff] %vm246_vm0, %v357_v46  ;;  %v358_v49 = vmax.f32 %v354_v47, 0.0  ;;  %v350_v50 = vpop.permute.xlu1 %349 }
 0x2a1   :  { %v355_v51 = vadd.f32 %v350_v50, %v327_v48 }
 0x2a2   :  { %362 = vst.msk [vmem:[%s641_s5 + $0x10] sm:$0xff] %vm246_vm0, %v358_v49 }
 0x2a3   :  { %v359_v52 = vmax.f32 %v355_v51, 0.0 }
 0x2a5   :  { %363 = vst.msk [vmem:[%s641_s5 + $0x18] sm:$0xff] %vm246_vm0, %v359_v52 }

// kernel: autoencoder_forward.11
= control target key start
LH: loop header
LB: loop body
LE: loop exit
PB: predicated region body
PF: predicated region fallthrough
CT: control target
= control target key end

     0   :  { %v992_v1 = vmov 0   ;;  %vm551_vm0 = vcmask 15360   ;;  %s1339_s1 = inlined_call_operand.vmem [shape: bf16[512,2], index: 1, kind: input, shape index: {}]   ;;  %s1340_s0 = inlined_call_operand.vmem [shape: bf16[64,512], index: 0, kind: input, shape index: {}]   ;;  %s1341_s2 = inlined_call_operand.vmem [shape: f32[64,1], index: 2, kind: input, shape index: {}]   ;;  %s1342_s4 = inlined_call_operand.vmem [shape: f32[64,1], index: 4, kind: input, shape index: {}]   ;;  %s1343_s3 = inlined_call_operand.vmem [shape: f32[64,1], index: 3, kind: input, shape index: {}]   ;;  %s1344_s5 = inlined_call_operand.vmem [shape: f32[64,2], index: 5, kind: output, shape index: {}]  }
   0x1   :  { %v920_v0 = vld [vmem:[%s1339_s1 + $0x78] sm:$0xff]   ;;  %918 = vset.pattern.permute.xlu0 %v992_v1  ;;  %919 = vset.pattern.permute.xlu1 %v992_v1  ;;  %v924_v5 = vld [vmem:[%s1339_s1 + $0x70] sm:$0xff]   ;;  %v928_v9 = vld [vmem:[%s1339_s1 + $0x68] sm:$0xff]  }
   0x2   :  { %v921_v2 = vld [vmem:[%s1339_s1 + $0xf8] sm:$0xff]   ;;  %837 = vmatprep.subr.bf16.mxu0 %v920_v0  ;;  %v925_v6 = vld [vmem:[%s1339_s1 + $0xf0] sm:$0xff]   ;;  %v929_v10 = vld [vmem:[%s1339_s1 + $0xe8] sm:$0xff]  }
   0x3   :  { %v922_v3 = vld [vmem:[%s1339_s1 + $0x38] sm:$0xff]   ;;  %877 = vmatprep.subr.bf16.mxu1 %v921_v2  ;;  %v926_v7 = vld [vmem:[%s1339_s1 + $0x30] sm:$0xff]   ;;  %v930_v11 = vld [vmem:[%s1339_s1 + $0x28] sm:$0xff]  }
   0x4   :  { %v923_v4 = vld [vmem:[%s1339_s1 + $0xb8] sm:$0xff]   ;;  %838 = vmatpush3.bf16.msra.mxu0 %v922_v3  ;;  %v927_v8 = vld [vmem:[%s1339_s1 + $0xb0] sm:$0xff]   ;;  %v931_v12 = vld [vmem:[%s1339_s1 + $0xa8] sm:$0xff]  }
   0x5   :  { %878 = vmatpush3.bf16.msra.mxu1 %v923_v4  ;;  %839 = vmatprep.subr.bf16.mxu0 %v924_v5  ;;  %v932_v13 = vld [vmem:[%s1339_s1 + $0x60] sm:$0xff]   ;;  %v936_v17 = vld [vmem:[%s1339_s1 + $0x58] sm:$0xff]   ;;  %v940_v21 = vld [vmem:[%s1339_s1 + $0x50] sm:$0xff]  }
   0x6   :  { %879 = vmatprep.subr.bf16.mxu1 %v925_v6  ;;  %v933_v14 = vld [vmem:[%s1339_s1 + $0xe0] sm:$0xff]   ;;  %v937_v18 = vld [vmem:[%s1339_s1 + $0xd8] sm:$0xff]   ;;  %v941_v22 = vld [vmem:[%s1339_s1 + $0xd0] sm:$0xff]  }
   0x7   :  { %v934_v15 = vld [vmem:[%s1339_s1 + $0x20] sm:$0xff]   ;;  %v938_v19 = vld [vmem:[%s1339_s1 + $0x18] sm:$0xff]   ;;  %v942_v23 = vld [vmem:[%s1339_s1 + $0x10] sm:$0xff]  }
   0x8   :  { %840 = vmatpush3.bf16.msra.mxu0 %v926_v7  ;;  %v935_v16 = vld [vmem:[%s1339_s1 + $0xa0] sm:$0xff]   ;;  %v939_v20 = vld [vmem:[%s1339_s1 + $0x98] sm:$0xff]   ;;  %v943_v24 = vld [vmem:[%s1339_s1 + $0x90] sm:$0xff]  }
   0x9   :  { %880 = vmatpush3.bf16.msra.mxu1 %v927_v8  ;;  %841 = vmatprep.subr.bf16.mxu0 %v928_v9  ;;  %v944_v25 = vld [vmem:[%s1339_s1 + $0x48] sm:$0xff]   ;;  %v948_v29 = vld [vmem:[%s1339_s1 + $0x40] sm:$0xff]   ;;  %v103_v44 = vld [vmem:[%s1341_s2 + $0x10] sm:$0xff] }
   0xa   :  { %881 = vmatprep.subr.bf16.mxu1 %v929_v10  ;;  %v945_v26 = vld [vmem:[%s1339_s1 + $0xc8] sm:$0xff]   ;;  %v949_v30 = vld [vmem:[%s1339_s1 + $0xc0] sm:$0xff]   ;;  %121 = vperm.xlu1 %919, %v103_v44   ;;  %v104_v46 = vld [vmem:[%s1341_s2 + $0x18] sm:$0xff] }
   0xb   :  { %v946_v27 = vld [vmem:[%s1339_s1 + $0x8] sm:$0xff]   ;;  %v950_v31 = vld [vmem:[%s1339_s1] sm:$0xff]   ;;  %v107_v53 = vld [vmem:[%s1341_s2 + $0x30] sm:$0xff] }
   0xc   :  { %842 = vmatpush3.bf16.msra.mxu0 %v930_v11  ;;  %v947_v28 = vld [vmem:[%s1339_s1 + $0x88] sm:$0xff]   ;;  %v951_v32 = vld [vmem:[%s1339_s1 + $0x80] sm:$0xff]   ;;  %v108_v54 = vld [vmem:[%s1341_s2 + $0x38] sm:$0xff] }
   0xd   :  { %882 = vmatpush3.bf16.msra.mxu1 %v931_v12  ;;  %843 = vmatprep.subr.bf16.mxu0 %v932_v13  ;;  %v952_v33 = vld [vmem:[%s1340_s0] ss:$16 sps:$4 sm:$0xff]   ;;  %v954_v34 = vld [vmem:[%s1340_s0 + $0x4] ss:$16 sps:$4 sm:$0xff]   ;;  %v955_v35 = vld [vmem:[%s1340_s0 + $0x8] ss:$16 sps:$4 sm:$0xff]  }
   0xe   :  { %883 = vmatprep.subr.bf16.mxu1 %v933_v14  ;;  %v957_v36 = vld [vmem:[%s1340_s0 + $0xc] ss:$16 sps:$4 sm:$0xff]   ;;  %453 = vmatprep.mubr.bf16.mxu0 %v954_v34  ;;  %v958_v37 = vld [vmem:[%s1340_s0 + $0x24] ss:$16 sps:$4 sm:$0xff]   ;;  %v962_v39 = vld [vmem:[%s1340_s0 + $0x20] ss:$16 sps:$4 sm:$0xff]  }
   0xf   :  { %518 = vmatprep.mubr.bf16.mxu1 %v957_v36  ;;  %v960_v38 = vld [vmem:[%s1340_s0 + $0x2c] ss:$16 sps:$4 sm:$0xff]   ;;  %v963_v40 = vld [vmem:[%s1340_s0 + $0x28] ss:$16 sps:$4 sm:$0xff]   ;;  %v964_v41 = vld [vmem:[%s1340_s0 + $0x44] ss:$16 sps:$4 sm:$0xff]   ;;  %126 = vperm.xlu1 %919, %v104_v46  }
  0x10   :  { %844 = vmatpush3.bf16.msra.mxu0 %v934_v15  ;;  %v966_v42 = vld [vmem:[%s1340_s0 + $0x4c] ss:$16 sps:$4 sm:$0xff]   ;;  %v101_v43 = vld [vmem:[%s1341_s2] sm:$0xff]  ;;  %v969_v49 = vld [vmem:[%s1340_s0 + $0x48] ss:$16 sps:$4 sm:$0xff]  }
  0x11   :  { %884 = vmatpush3.bf16.msra.mxu1 %v935_v16  ;;  %845 = vmatprep.subr.bf16.mxu0 %v936_v17  ;;  %v102_v45 = vld [vmem:[%s1341_s2 + $0x8] sm:$0xff]  ;;  %v968_v47 = vld [vmem:[%s1340_s0 + $0x40] ss:$16 sps:$4 sm:$0xff]   ;;  %v970_v50 = vld [vmem:[%s1340_s0 + $0x64] ss:$16 sps:$4 sm:$0xff]  }
  0x12   :  { %885 = vmatprep.subr.bf16.mxu1 %v937_v18  ;;  %111 = vperm.xlu0 %918, %v101_v43   ;;  %v105_v48 = vld [vmem:[%s1341_s2 + $0x20] sm:$0xff]  ;;  %v106_v51 = vld [vmem:[%s1341_s2 + $0x28] sm:$0xff] }
  0x13   :  { %v972_v52 = vld [vmem:[%s1340_s0 + $0x6c] ss:$16 sps:$4 sm:$0xff]   ;;  %136 = vperm.xlu1 %919, %v106_v51   ;;  %v974_v55 = vld [vmem:[%s1340_s0 + $0x60] ss:$16 sps:$4 sm:$0xff]   ;;  %v975_v56 = vld [vmem:[%s1340_s0 + $0x68] ss:$16 sps:$4 sm:$0xff]  }
  0x14   :  { %846 = vmatpush3.bf16.msra.mxu0 %v938_v19 }
  0x15   :  { %886 = vmatpush3.bf16.msra.mxu1 %v939_v20  ;;  %847 = vmatprep.subr.bf16.mxu0 %v940_v21 }
  0x16   :  { %887 = vmatprep.subr.bf16.mxu1 %v941_v22  ;;  %116 = vperm.xlu0 %918, %v102_v45  }
  0x17   :  { %146 = vperm.xlu1 %919, %v108_v54  }
  0x18   :  { %848 = vmatpush3.bf16.msra.mxu0 %v942_v23 }
  0x19   :  { %888 = vmatpush3.bf16.msra.mxu1 %v943_v24  ;;  %849 = vmatprep.subr.bf16.mxu0 %v944_v25 }
  0x1a   :  { %889 = vmatprep.subr.bf16.mxu1 %v945_v26  ;;  %131 = vperm.xlu0 %918, %v105_v48  }
  0x1c   :  { %850 = vmatpush3.bf16.msra.mxu0 %v946_v27 }
  0x1d   :  { %890 = vmatpush3.bf16.msra.mxu1 %v947_v28  ;;  %851 = vmatprep.subr.bf16.mxu0 %v948_v29 }
  0x1e   :  { %891 = vmatprep.subr.bf16.mxu1 %v949_v30  ;;  %141 = vperm.xlu0 %918, %v107_v53  }
  0x20   :  { %852 = vmatpush3.bf16.msra.mxu0 %v950_v31 }
  0x21   :  { %892 = vmatpush3.bf16.msra.mxu1 %v951_v32 }
  0x23   :  { %454 = vmatmul.mubr.bf16.vlgmr.msra.gmra.mxu0 %v952_v33 }
  0x24   :  { %519 = vmatmul.mubr.bf16.vlgmr.msra.gmra.mxu1 %v955_v35  ;;  %461 = vmatprep.mubr.bf16.mxu0 %v958_v37 }
  0x25   :  { %526 = vmatprep.mubr.bf16.mxu1 %v960_v38 }
  0x2b   :  { %462 = vmatmul.mubr.bf16.gmra.mxu0 %v962_v39 }
  0x2c   :  { %527 = vmatmul.mubr.bf16.gmra.mxu1 %v963_v40  ;;  %469 = vmatprep.mubr.bf16.mxu0 %v964_v41 }
  0x2d   :  { %534 = vmatprep.mubr.bf16.mxu1 %v966_v42 }
  0x33   :  { %470 = vmatmul.mubr.bf16.gmra.mxu0 %v968_v47 }
  0x34   :  { %535 = vmatmul.mubr.bf16.gmra.mxu1 %v969_v49  ;;  %477 = vmatprep.mubr.bf16.mxu0 %v970_v50 }
  0x35   :  { %542 = vmatprep.mubr.bf16.mxu1 %v972_v52 }
  0x3b   :  { %478 = vmatmul.mubr.bf16.gmra.mxu0 %v974_v55 }
  0x3c   :  { %543 = vmatmul.mubr.bf16.gmra.mxu1 %v975_v56 }
  0x85   :  { %v122_v13 = vpop.permute.xlu1 %121 }
  0x8a   :  { %v127_v27 = vpop.permute.xlu1 %126 }
  0x8d   :  { %v112_v58 = vpop.permute.xlu0 %111 }
  0x8e   :  { %v137_v47 = vpop.permute.xlu1 %136 }
  0x91   :  { %v117_v4 = vpop.permute.xlu0 %116 }
  0x95   :  { %v132_v37 = vpop.permute.xlu0 %131 }
  0xe3   :  { %v853_v57 = vpop.f32.mrf.mxu0 }
  0xe4   :  { %v893_v59 = vpop.f32.mrf.mxu1 }
  0xe5   :  { %v854_v60 = vpop.f32.mrf.mxu0 }
  0xe6   :  { %v855_v61 = vadd.f32 %v854_v60, %v853_v57  ;;  %v894_v62 = vpop.f32.mrf.mxu1  ;;  %v142_v57 = vpop.permute.xlu0 %141 }
  0xe7   :  { %v856_v63 = vpop.f32.mrf.mxu0  ;;  %v895_v0 = vadd.f32 %v894_v62, %v893_v59 }
  0xe8   :  { %v456_v1 = vadd.f32 %v855_v61, %v112_v58  ;;  %v896_v2 = vpop.f32.mrf.mxu1 }
  0xe9   :  { %v857_v3 = vpop.f32.mrf.mxu0 }
  0xea   :  { %v858_v5 = vadd.f32 %v857_v3, %v856_v63  ;;  %v897_v6 = vpop.f32.mrf.mxu1  ;;  %v1191_v7 = vadd.f32 %v895_v0, %v456_v1  ;;  %v147_v3 = vpop.permute.xlu1 %146 }
  0xeb   :  { %v859_v8 = vpop.f32.mrf.mxu0  ;;  %v898_v9 = vadd.f32 %v897_v6, %v896_v2 }
  0xec   :  { %v459_v10 = vadd.f32 %v858_v5, %v117_v4  ;;  %v899_v11 = vpop.f32.mrf.mxu1  ;;  %v552_v12 = vsel %vm551_vm0, %v1191_v7, 0.0 }
  0xed   :  { %v860_v14 = vpop.f32.mrf.mxu0  ;;  %553 = vadd.xlane.f32.xlu0 %v552_v12 }
  0xee   :  { %v861_v15 = vadd.f32 %v860_v14, %v859_v8  ;;  %v900_v16 = vpop.f32.mrf.mxu1  ;;  %v1195_v17 = vadd.f32 %v898_v9, %v459_v10 }
  0xef   :  { %v862_v18 = vpop.f32.mrf.mxu0  ;;  %v901_v20 = vadd.f32 %v900_v16, %v899_v11 }
  0xf0   :  { %v464_v19 = vadd.f32 %v861_v15, %v122_v13  ;;  %v902_v21 = vpop.f32.mrf.mxu1  ;;  %v555_v22 = vsel %vm551_vm0, %v1195_v17, 0.0 }
  0xf1   :  { %v863_v23 = vpop.f32.mrf.mxu0  ;;  %556 = vadd.xlane.f32.xlu1 %v555_v22 }
  0xf2   :  { %v864_v24 = vadd.f32 %v863_v23, %v862_v18  ;;  %v903_v25 = vpop.f32.mrf.mxu1  ;;  %v1199_v26 = vadd.f32 %v901_v20, %v464_v19 }
  0xf3   :  { %v865_v28 = vpop.f32.mrf.mxu0  ;;  %v904_v30 = vadd.f32 %v903_v25, %v902_v21 }
  0xf4   :  { %v467_v29 = vadd.f32 %v864_v24, %v127_v27  ;;  %v905_v31 = vpop.f32.mrf.mxu1  ;;  %v558_v32 = vsel %vm551_vm0, %v1199_v26, 0.0 }
  0xf5   :  { %v866_v33 = vpop.f32.mrf.mxu0  ;;  %559 = vadd.xlane.f32.xlu0 %v558_v32 }
  0xf6   :  { %v867_v34 = vadd.f32 %v866_v33, %v865_v28  ;;  %v906_v35 = vpop.f32.mrf.mxu1  ;;  %v532_v36 = vadd.f32 %v904_v30, %v467_v29 }
  0xf7   :  { %v868_v38 = vpop.f32.mrf.mxu0  ;;  %v907_v40 = vadd.f32 %v906_v35, %v905_v31 }
  0xf8   :  { %v472_v39 = vadd.f32 %v867_v34, %v132_v37  ;;  %v908_v41 = vpop.f32.mrf.mxu1  ;;  %v561_v42 = vsel %vm551_vm0, %v532_v36, 0.0 }
  0xf9   :  { %v869_v43 = vpop.f32.mrf.mxu0  ;;  %562 = vadd.xlane.f32.xlu0 %v561_v42 }
  0xfa   :  { %v870_v44 = vadd.f32 %v869_v43, %v868_v38  ;;  %v909_v45 = vpop.f32.mrf.mxu1  ;;  %v537_v46 = vadd.f32 %v907_v40, %v472_v39 }
  0xfb   :  { %v871_v48 = vpop.f32.mrf.mxu0  ;;  %v910_v50 = vadd.f32 %v909_v45, %v908_v41 }
  0xfc   :  { %v475_v49 = vadd.f32 %v870_v44, %v137_v47  ;;  %v911_v51 = vpop.f32.mrf.mxu1  ;;  %v564_v52 = vsel %vm551_vm0, %v537_v46, 0.0 }
  0xfd   :  { %v872_v53 = vpop.f32.mrf.mxu0  ;;  %565 = vadd.xlane.f32.xlu1 %v564_v52  ;;  %v713_v52 = vld [vmem:[%s1342_s4] sm:$0xff] }
  0xfe   :  { %v873_v54 = vadd.f32 %v872_v53, %v871_v48  ;;  %v912_v55 = vpop.f32.mrf.mxu1  ;;  %v540_v56 = vadd.f32 %v910_v50, %v475_v49  ;;  %v714_v49 = vld [vmem:[%s1342_s4 + $0x8] sm:$0xff]  ;;  %v716_v50 = vld [vmem:[%s1342_s4 + $0x18] sm:$0xff]  ;;  %v715_v53 = vld [vmem:[%s1342_s4 + $0x10] sm:$0xff] }
  0xff   :  { %v874_v58 = vpop.f32.mrf.mxu0  ;;  %v913_v60 = vadd.f32 %v912_v55, %v911_v51  ;;  %v718_v51 = vld [vmem:[%s1342_s4 + $0x28] sm:$0xff] }
 0x100   :  { %v480_v59 = vadd.f32 %v873_v54, %v142_v57  ;;  %v914_v61 = vpop.f32.mrf.mxu1  ;;  %v567_v62 = vsel %vm551_vm0, %v540_v56, 0.0  ;;  %v717_v54 = vld [vmem:[%s1342_s4 + $0x20] sm:$0xff] }
 0x101   :  { %v875_v63 = vpop.f32.mrf.mxu0  ;;  %568 = vadd.xlane.f32.xlu0 %v567_v62 }
 0x102   :  { %v876_v0 = vadd.f32 %v875_v63, %v874_v58  ;;  %v915_v1 = vpop.f32.mrf.mxu1  ;;  %v545_v2 = vadd.f32 %v913_v60, %v480_v59 }
 0x103   :  { %v916_v5 = vadd.f32 %v915_v1, %v914_v61 }
 0x104   :  { %v483_v4 = vadd.f32 %v876_v0, %v147_v3  ;;  %v570_v6 = vsel %vm551_vm0, %v545_v2, 0.0 }
 0x105   :  { %571 = vadd.xlane.f32.xlu1 %v570_v6 }
 0x106   :  { %v548_v8 = vadd.f32 %v916_v5, %v483_v4  ;;  %v633_v4 = vld [vmem:[%s1343_s3] sm:$0xff] }
 0x108   :  { %v573_v9 = vsel %vm551_vm0, %v548_v8, 0.0 }
 0x109   :  { %574 = vadd.xlane.f32.xlu0 %v573_v9 }
 0x176   :  { %v554_v10 = vpop.xlane.xlu0 %553 }
 0x177   :  { %v577_v11 = vmul.f32 0.5, %v554_v10 }
 0x179   :  { %v1209_v12 = vsub.f32 %v1191_v7, %v577_v11  ;;  %v634_v11 = vld [vmem:[%s1343_s3 + $0x8] sm:$0xff] }
 0x17a   :  { %v557_v13 = vpop.xlane.xlu1 %556 }
 0x17b   :  { %v578_v14 = vmul.f32 0.5, %v557_v13  ;;  %v593_v15 = vmul.f32 %v1209_v12, %v1209_v12 }
 0x17d   :  { %v1214_v16 = vsub.f32 %v1195_v17, %v578_v14  ;;  %v601_v18 = vsel %vm551_vm0, %v593_v15, 0.0 }
 0x17e   :  { %602 = vadd.xlane.f32.xlu1 %v601_v18  ;;  %v560_v19 = vpop.xlane.xlu0 %559 }
 0x17f   :  { %v579_v20 = vmul.f32 0.5, %v560_v19  ;;  %v594_v21 = vmul.f32 %v1214_v16, %v1214_v16 }
 0x181   :  { %v1220_v22 = vsub.f32 %v1199_v26, %v579_v20  ;;  %v604_v7 = vsel %vm551_vm0, %v594_v21, 0.0  ;;  %v635_v20 = vld [vmem:[%s1343_s3 + $0x10] sm:$0xff] }
 0x182   :  { %605 = vadd.xlane.f32.xlu0 %v604_v7  ;;  %v563_v23 = vpop.xlane.xlu0 %562 }
 0x183   :  { %v580_v24 = vmul.f32 0.5, %v563_v23  ;;  %v595_v17 = vmul.f32 %v1220_v22, %v1220_v22 }
 0x185   :  { %v1225_v25 = vsub.f32 %v532_v36, %v580_v24  ;;  %v607_v27 = vsel %vm551_vm0, %v595_v17, 0.0 }
 0x186   :  { %v566_v28 = vpop.xlane.xlu1 %565  ;;  %608 = vadd.xlane.f32.xlu1 %v607_v27  ;;  %v636_v27 = vld [vmem:[%s1343_s3 + $0x18] sm:$0xff] }
 0x187   :  { %v581_v29 = vmul.f32 0.5, %v566_v28  ;;  %v596_v30 = vmul.f32 %v1225_v25, %v1225_v25 }
 0x189   :  { %v1230_v26 = vsub.f32 %v537_v46, %v581_v29  ;;  %v610_v31 = vsel %vm551_vm0, %v596_v30, 0.0 }
 0x18a   :  { %611 = vadd.xlane.f32.xlu0 %v610_v31  ;;  %v569_v32 = vpop.xlane.xlu0 %568 }
 0x18b   :  { %v582_v33 = vmul.f32 0.5, %v569_v32  ;;  %v597_v34 = vmul.f32 %v1230_v26, %v1230_v26  ;;  %v637_v32 = vld [vmem:[%s1343_s3 + $0x20] sm:$0xff] }
 0x18d   :  { %v1235_v35 = vsub.f32 %v540_v56, %v582_v33  ;;  %v613_v36 = vsel %vm551_vm0, %v597_v34, 0.0 }
 0x18e   :  { %v572_v37 = vpop.xlane.xlu1 %571  ;;  %614 = vadd.xlane.f32.xlu1 %v613_v36  ;;  %v638_v36 = vld [vmem:[%s1343_s3 + $0x28] sm:$0xff] }
 0x18f   :  { %v583_v38 = vmul.f32 0.5, %v572_v37  ;;  %v598_v39 = vmul.f32 %v1235_v35, %v1235_v35 }
 0x191   :  { %v1240_v40 = vsub.f32 %v545_v2, %v583_v38  ;;  %v616_v41 = vsel %vm551_vm0, %v598_v39, 0.0  ;;  %v639_v39 = vld [vmem:[%s1343_s3 + $0x30] sm:$0xff] }
 0x192   :  { %617 = vadd.xlane.f32.xlu0 %v616_v41  ;;  %v575_v42 = vpop.xlane.xlu0 %574 }
 0x193   :  { %v584_v43 = vmul.f32 0.5, %v575_v42  ;;  %v599_v44 = vmul.f32 %v1240_v40, %v1240_v40 }
 0x195   :  { %v1245_v45 = vsub.f32 %v548_v8, %v584_v43  ;;  %v619_v46 = vsel %vm551_vm0, %v599_v44, 0.0  ;;  %v640_v43 = vld [vmem:[%s1343_s3 + $0x38] sm:$0xff] }
 0x196   :  { %620 = vadd.xlane.f32.xlu1 %v619_v46  ;;  %v719_v46 = vld [vmem:[%s1342_s4 + $0x30] sm:$0xff] }
 0x197   :  { %v600_v47 = vmul.f32 %v1245_v45, %v1245_v45 }
 0x199   :  { %v622_v48 = vsel %vm551_vm0, %v600_v47, 0.0 }
 0x19a   :  { %623 = vadd.xlane.f32.xlu0 %v622_v48  ;;  %v720_v48 = vld [vmem:[%s1342_s4 + $0x38] sm:$0xff] }
 0x1a7   :  { %728 = vperm.xlu1 %919, %v714_v49  }
 0x1ab   :  { %738 = vperm.xlu1 %919, %v716_v50  }
 0x1af   :  { %748 = vperm.xlu1 %919, %v718_v51  }
 0x1b0   :  { %723 = vperm.xlu0 %918, %v713_v52  }
 0x1b4   :  { %733 = vperm.xlu0 %918, %v715_v53  }
 0x1b8   :  { %743 = vperm.xlu0 %918, %v717_v54  }
 0x207   :  { %v603_v55 = vpop.xlane.xlu1 %602 }
 0x208   :  { %v625_v56 = vmul.f32 0.5, %v603_v55 }
 0x20a   :  { %v641_v57 = vadd.f32 1e-05, %v625_v56 }
 0x20b   :  { %v606_v58 = vpop.xlane.xlu0 %605 }
 0x20c   :  { %976 = vrsqrt.f32 %v641_v57  ;;  %v626_v59 = vmul.f32 0.5, %v606_v58 }
 0x20e   :  { %v642_v60 = vadd.f32 1e-05, %v626_v59 }
 0x20f   :  { %v609_v61 = vpop.xlane.xlu1 %608 }
 0x210   :  { %978 = vrsqrt.f32 %v642_v60  ;;  %v627_v62 = vmul.f32 0.5, %v609_v61 }
 0x212   :  { %v643_v63 = vadd.f32 1e-05, %v627_v62 }
 0x213   :  { %v612_v0 = vpop.xlane.xlu0 %611 }
 0x214   :  { %980 = vrsqrt.f32 %v643_v63  ;;  %v628_v1 = vmul.f32 0.5, %v612_v0 }
 0x216   :  { %v644_v2 = vadd.f32 1e-05, %v628_v1 }
 0x217   :  { %v615_v3 = vpop.xlane.xlu1 %614 }
 0x218   :  { %982 = vrsqrt.f32 %v644_v2  ;;  %v629_v5 = vmul.f32 0.5, %v615_v3 }
 0x219   :  { %v977_v6 = vpop.eup %976 }
 0x21a   :  { %v645_v8 = vadd.f32 1e-05, %v629_v5  ;;  %v657_v9 = vmul.f32 %v977_v6, %v633_v4 }
 0x21b   :  { %v618_v10 = vpop.xlane.xlu0 %617 }
 0x21c   :  { %984 = vrsqrt.f32 %v645_v8  ;;  %v630_v13 = vmul.f32 0.5, %v618_v10  ;;  %667 = vperm.xlu1 %919, %v657_v9  }
 0x21d   :  { %v979_v14 = vpop.eup %978 }
 0x21e   :  { %v646_v15 = vadd.f32 1e-05, %v630_v13  ;;  %v658_v18 = vmul.f32 %v979_v14, %v634_v11 }
 0x21f   :  { %v621_v19 = vpop.xlane.xlu1 %620 }
 0x220   :  { %986 = vrsqrt.f32 %v646_v15  ;;  %v631_v21 = vmul.f32 0.5, %v621_v19  ;;  %672 = vperm.xlu0 %918, %v658_v18  }
 0x221   :  { %v981_v7 = vpop.eup %980 }
 0x222   :  { %v647_v23 = vadd.f32 1e-05, %v631_v21  ;;  %v659_v24 = vmul.f32 %v981_v7, %v635_v20 }
 0x223   :  { %v624_v17 = vpop.xlane.xlu0 %623  ;;  %v729_v49 = vpop.permute.xlu1 %728 }
 0x224   :  { %988 = vrsqrt.f32 %v647_v23  ;;  %v632_v28 = vmul.f32 0.5, %v624_v17  ;;  %677 = vperm.xlu1 %919, %v659_v24  }
 0x225   :  { %v983_v29 = vpop.eup %982 }
 0x226   :  { %v648_v30 = vadd.f32 1e-05, %v632_v28  ;;  %v660_v31 = vmul.f32 %v983_v29, %v636_v27 }
 0x227   :  { %v739_v51 = vpop.permute.xlu1 %738 }
 0x228   :  { %990 = vrsqrt.f32 %v648_v30  ;;  %682 = vperm.xlu1 %919, %v660_v31  }
 0x229   :  { %v985_v33 = vpop.eup %984 }
 0x22a   :  { %v661_v34 = vmul.f32 %v985_v33, %v637_v32 }
 0x22b   :  { %v724_v50 = vpop.permute.xlu0 %723  ;;  %v749_v53 = vpop.permute.xlu1 %748 }
 0x22c   :  { %687 = vperm.xlu0 %918, %v661_v34  }
 0x22d   :  { %v987_v37 = vpop.eup %986 }
 0x22e   :  { %v662_v38 = vmul.f32 %v987_v37, %v638_v36 }
 0x22f   :  { %v734_v52 = vpop.permute.xlu0 %733 }
 0x230   :  { %692 = vperm.xlu1 %919, %v662_v38  }
 0x231   :  { %v989_v41 = vpop.eup %988 }
 0x232   :  { %v663_v42 = vmul.f32 %v989_v41, %v639_v39 }
 0x233   :  { %v744_v54 = vpop.permute.xlu0 %743 }
 0x234   :  { %697 = vperm.xlu0 %918, %v663_v42  }
 0x235   :  { %v991_v44 = vpop.eup %990 }
 0x236   :  { %v664_v47 = vmul.f32 %v991_v44, %v640_v43 }
 0x238   :  { %753 = vperm.xlu0 %918, %v719_v46   ;;  %702 = vperm.xlu1 %919, %v664_v47  }
 0x23c   :  { %758 = vperm.xlu1 %919, %v720_v48  }
 0x297   :  { %v668_v55 = vpop.permute.xlu1 %667 }
 0x298   :  { %v705_v56 = vmul.f32 %v668_v55, %v1209_v12 }
 0x29a   :  { %v761_v57 = vadd.f32 %v724_v50, %v705_v56 }
 0x29b   :  { %v673_v58 = vpop.permute.xlu0 %672 }
 0x29c   :  { %v769_v59 = vmax.f32 %v761_v57, 0.0  ;;  %v706_v60 = vmul.f32 %v673_v58, %v1214_v16 }
 0x29e   :  { %777 = vst.msk [vmem:[%s1344_s5] sm:$0xff] %vm551_vm0, %v769_v59  ;;  %v762_v61 = vadd.f32 %v729_v49, %v706_v60 }
 0x29f   :  { %v678_v62 = vpop.permute.xlu1 %677 }
 0x2a0   :  { %v770_v63 = vmax.f32 %v762_v61, 0.0  ;;  %v707_v0 = vmul.f32 %v678_v62, %v1220_v22 }
 0x2a2   :  { %778 = vst.msk [vmem:[%s1344_s5 + $0x8] sm:$0xff] %vm551_vm0, %v770_v63  ;;  %v763_v12 = vadd.f32 %v734_v52, %v707_v0 }
 0x2a3   :  { %v683_v1 = vpop.permute.xlu1 %682 }
 0x2a4   :  { %v771_v2 = vmax.f32 %v763_v12, 0.0  ;;  %v708_v16 = vmul.f32 %v683_v1, %v1225_v25 }
 0x2a6   :  { %779 = vst.msk [vmem:[%s1344_s5 + $0x10] sm:$0xff] %vm551_vm0, %v771_v2  ;;  %v764_v3 = vadd.f32 %v739_v51, %v708_v16 }
 0x2a7   :  { %v688_v4 = vpop.permute.xlu0 %687 }
 0x2a8   :  { %v772_v5 = vmax.f32 %v764_v3, 0.0  ;;  %v709_v22 = vmul.f32 %v688_v4, %v1230_v26 }
 0x2aa   :  { %780 = vst.msk [vmem:[%s1344_s5 + $0x18] sm:$0xff] %vm551_vm0, %v772_v5  ;;  %v765_v6 = vadd.f32 %v744_v54, %v709_v22 }
 0x2ab   :  { %v693_v8 = vpop.permute.xlu1 %692 }
 0x2ac   :  { %v773_v9 = vmax.f32 %v765_v6, 0.0  ;;  %v710_v25 = vmul.f32 %v693_v8, %v1235_v35 }
 0x2ae   :  { %781 = vst.msk [vmem:[%s1344_s5 + $0x20] sm:$0xff] %vm551_vm0, %v773_v9  ;;  %v766_v10 = vadd.f32 %v749_v53, %v710_v25 }
 0x2af   :  { %v698_v11 = vpop.permute.xlu0 %697 }
 0x2b0   :  { %v774_v13 = vmax.f32 %v766_v10, 0.0  ;;  %v711_v26 = vmul.f32 %v698_v11, %v1240_v40 }
 0x2b2   :  { %782 = vst.msk [vmem:[%s1344_s5 + $0x28] sm:$0xff] %vm551_vm0, %v774_v13 }
 0x2b3   :  { %v703_v14 = vpop.permute.xlu1 %702  ;;  %v754_v15 = vpop.permute.xlu0 %753 }
 0x2b4   :  { %v767_v18 = vadd.f32 %v754_v15, %v711_v26  ;;  %v712_v35 = vmul.f32 %v703_v14, %v1245_v45 }
 0x2b6   :  { %v775_v19 = vmax.f32 %v767_v18, 0.0 }
 0x2b7   :  { %v759_v20 = vpop.permute.xlu1 %758 }
 0x2b8   :  { %783 = vst.msk [vmem:[%s1344_s5 + $0x30] sm:$0xff] %vm551_vm0, %v775_v19  ;;  %v768_v21 = vadd.f32 %v759_v20, %v712_v35 }
 0x2ba   :  { %v776_v7 = vmax.f32 %v768_v21, 0.0 }
 0x2bc   :  { %784 = vst.msk [vmem:[%s1344_s5 + $0x38] sm:$0xff] %vm551_vm0, %v776_v7 }

// kernel: autoencoder_forward.12
= control target key start
LH: loop header
LB: loop body
LE: loop exit
PB: predicated region body
PF: predicated region fallthrough
CT: control target
= control target key end

     0   :  { %v1567_v1 = vmov 0   ;;  %vm855_vm0 = vcmask 15360   ;;  %s2078_s1 = inlined_call_operand.vmem [shape: bf16[4,256,2], index: 1, kind: input, shape index: {}]   ;;  %s2079_s0 = inlined_call_operand.vmem [shape: bf16[4,32,256], index: 0, kind: input, shape index: {}]   ;;  %s2080_s2 = inlined_call_operand.vmem [shape: f32[32,1], index: 2, kind: input, shape index: {}]   ;;  %s2081_s3 = inlined_call_operand.vmem [shape: f32[32,1], index: 3, kind: input, shape index: {}]   ;;  %s2082_s4 = inlined_call_operand.vmem [shape: f32[32,1], index: 4, kind: input, shape index: {}]   ;;  %s2083_s5 = inlined_call_operand.vmem [shape: f32[4,32,2], index: 5, kind: output, shape index: {}]  }
   0x1   :  { %v1471_v0 = vld [vmem:[%s2078_s1 + $0x78] sm:$0xff]   ;;  %1469 = vset.pattern.permute.xlu0 %v1567_v1  ;;  %1470 = vset.pattern.permute.xlu1 %v1567_v1  ;;  %v1475_v5 = vld [vmem:[%s2078_s1 + $0x70] sm:$0xff]   ;;  %v1479_v9 = vld [vmem:[%s2078_s1 + $0x68] sm:$0xff]  }
   0x2   :  { %v1472_v2 = vld [vmem:[%s2078_s1 + $0xf8] sm:$0xff]   ;;  %1356 = vmatprep.subr.bf16.mxu0 %v1471_v0  ;;  %v1476_v6 = vld [vmem:[%s2078_s1 + $0xf0] sm:$0xff]   ;;  %v1480_v10 = vld [vmem:[%s2078_s1 + $0xe8] sm:$0xff]  }
   0x3   :  { %v1473_v3 = vld [vmem:[%s2078_s1 + $0x38] sm:$0xff]   ;;  %1384 = vmatprep.subr.bf16.mxu1 %v1472_v2  ;;  %v1477_v7 = vld [vmem:[%s2078_s1 + $0x30] sm:$0xff]   ;;  %v1481_v11 = vld [vmem:[%s2078_s1 + $0x28] sm:$0xff]  }
   0x4   :  { %v1474_v4 = vld [vmem:[%s2078_s1 + $0xb8] sm:$0xff]   ;;  %1357 = vmatpush3.bf16.msra.mxu0 %v1473_v3  ;;  %v1478_v8 = vld [vmem:[%s2078_s1 + $0xb0] sm:$0xff]   ;;  %v1482_v12 = vld [vmem:[%s2078_s1 + $0xa8] sm:$0xff]  }
   0x5   :  { %1385 = vmatpush3.bf16.msra.mxu1 %v1474_v4  ;;  %1358 = vmatprep.subr.bf16.mxu0 %v1475_v5  ;;  %v1483_v13 = vld [vmem:[%s2078_s1 + $0x60] sm:$0xff]   ;;  %v1487_v17 = vld [vmem:[%s2078_s1 + $0x58] sm:$0xff]   ;;  %v1491_v21 = vld [vmem:[%s2078_s1 + $0x50] sm:$0xff]  }
   0x6   :  { %1386 = vmatprep.subr.bf16.mxu1 %v1476_v6  ;;  %v1484_v14 = vld [vmem:[%s2078_s1 + $0xe0] sm:$0xff]   ;;  %v1488_v18 = vld [vmem:[%s2078_s1 + $0xd8] sm:$0xff]   ;;  %v1492_v22 = vld [vmem:[%s2078_s1 + $0xd0] sm:$0xff]  }
   0x7   :  { %v1485_v15 = vld [vmem:[%s2078_s1 + $0x20] sm:$0xff]   ;;  %v1489_v19 = vld [vmem:[%s2078_s1 + $0x18] sm:$0xff]   ;;  %v1493_v23 = vld [vmem:[%s2078_s1 + $0x10] sm:$0xff]  }
   0x8   :  { %1359 = vmatpush3.bf16.msra.mxu0 %v1477_v7  ;;  %v1486_v16 = vld [vmem:[%s2078_s1 + $0xa0] sm:$0xff]   ;;  %v1490_v20 = vld [vmem:[%s2078_s1 + $0x98] sm:$0xff]   ;;  %v1494_v24 = vld [vmem:[%s2078_s1 + $0x90] sm:$0xff]  }
   0x9   :  { %1387 = vmatpush3.bf16.msra.mxu1 %v1478_v8  ;;  %1360 = vmatprep.subr.bf16.mxu0 %v1479_v9  ;;  %v1495_v25 = vld [vmem:[%s2078_s1 + $0x48] sm:$0xff]   ;;  %v1499_v29 = vld [vmem:[%s2078_s1 + $0x40] sm:$0xff]   ;;  %v1509_v37 = vld [vmem:[%s2078_s1 + $0x178] sm:$0xff]  }
   0xa   :  { %1388 = vmatprep.subr.bf16.mxu1 %v1480_v10  ;;  %v1496_v26 = vld [vmem:[%s2078_s1 + $0xc8] sm:$0xff]   ;;  %v1500_v30 = vld [vmem:[%s2078_s1 + $0xc0] sm:$0xff]   ;;  %v1510_v38 = vld [vmem:[%s2078_s1 + $0x1f8] sm:$0xff]  }
   0xb   :  { %v1497_v27 = vld [vmem:[%s2078_s1 + $0x8] sm:$0xff]   ;;  %v1501_v31 = vld [vmem:[%s2078_s1] sm:$0xff]   ;;  %v1511_v39 = vld [vmem:[%s2078_s1 + $0x138] sm:$0xff]  }
   0xc   :  { %1361 = vmatpush3.bf16.msra.mxu0 %v1481_v11  ;;  %v1498_v28 = vld [vmem:[%s2078_s1 + $0x88] sm:$0xff]   ;;  %v1502_v32 = vld [vmem:[%s2078_s1 + $0x80] sm:$0xff]   ;;  %v1512_v40 = vld [vmem:[%s2078_s1 + $0x1b8] sm:$0xff]  }
   0xd   :  { %1389 = vmatpush3.bf16.msra.mxu1 %v1482_v12  ;;  %1362 = vmatprep.subr.bf16.mxu0 %v1483_v13  ;;  %v1503_v33 = vld [vmem:[%s2079_s0] ss:$8 sps:$4 sm:$0xff]   ;;  %v1505_v34 = vld [vmem:[%s2079_s0 + $0x4] ss:$8 sps:$4 sm:$0xff]   ;;  %v1513_v41 = vld [vmem:[%s2078_s1 + $0x170] sm:$0xff]  }
   0xe   :  { %1390 = vmatprep.subr.bf16.mxu1 %v1484_v14  ;;  %v1506_v35 = vld [vmem:[%s2079_s0 + $0x20] ss:$8 sps:$4 sm:$0xff]   ;;  %v1508_v36 = vld [vmem:[%s2079_s0 + $0x24] ss:$8 sps:$4 sm:$0xff]   ;;  %229 = vmatprep.mubr.bf16.mxu0 %v1505_v34  ;;  %v1514_v42 = vld [vmem:[%s2078_s1 + $0x1f0] sm:$0xff]  }
   0xf   :  { %432 = vmatprep.mubr.bf16.mxu1 %v1508_v36  ;;  %v1515_v43 = vld [vmem:[%s2078_s1 + $0x130] sm:$0xff]   ;;  %v1517_v45 = vld [vmem:[%s2078_s1 + $0x168] sm:$0xff]   ;;  %v1521_v49 = vld [vmem:[%s2078_s1 + $0x160] sm:$0xff]  }
  0x10   :  { %1363 = vmatpush3.bf16.msra.mxu0 %v1485_v15  ;;  %v1516_v44 = vld [vmem:[%s2078_s1 + $0x1b0] sm:$0xff]   ;;  %v1518_v46 = vld [vmem:[%s2078_s1 + $0x1e8] sm:$0xff]   ;;  %v1522_v50 = vld [vmem:[%s2078_s1 + $0x1e0] sm:$0xff]  }
  0x11   :  { %1391 = vmatpush3.bf16.msra.mxu1 %v1486_v16  ;;  %1364 = vmatprep.subr.bf16.mxu0 %v1487_v17  ;;  %v1519_v47 = vld [vmem:[%s2078_s1 + $0x128] sm:$0xff]   ;;  %v1523_v51 = vld [vmem:[%s2079_s0 + $0x14] ss:$8 sps:$4 sm:$0xff]   ;;  %v1525_v52 = vld [vmem:[%s2078_s1 + $0x120] sm:$0xff]  }
  0x12   :  { %1392 = vmatprep.subr.bf16.mxu1 %v1488_v18  ;;  %v1520_v48 = vld [vmem:[%s2078_s1 + $0x1a8] sm:$0xff]   ;;  %v1526_v53 = vld [vmem:[%s2078_s1 + $0x1a0] sm:$0xff]   ;;  %v1527_v54 = vld [vmem:[%s2079_s0 + $0x10] ss:$8 sps:$4 sm:$0xff]  }
  0x13   :  { %v1528_v55 = vld [vmem:[%s2078_s1 + $0x158] sm:$0xff]   ;;  %v1535_v61 = vld [vmem:[%s2078_s1 + $0x150] sm:$0xff]   ;;  %v1539_v1 = vld [vmem:[%s2078_s1 + $0x148] sm:$0xff]  }
  0x14   :  { %1365 = vmatpush3.bf16.msra.mxu0 %v1489_v19  ;;  %v1529_v56 = vld [vmem:[%s2078_s1 + $0x1d8] sm:$0xff]   ;;  %v1536_v62 = vld [vmem:[%s2078_s1 + $0x1d0] sm:$0xff]   ;;  %v1540_v2 = vld [vmem:[%s2078_s1 + $0x1c8] sm:$0xff]  }
  0x15   :  { %1393 = vmatpush3.bf16.msra.mxu1 %v1490_v20  ;;  %1366 = vmatprep.subr.bf16.mxu0 %v1491_v21  ;;  %v1530_v57 = vld [vmem:[%s2079_s0 + $0x34] ss:$8 sps:$4 sm:$0xff]   ;;  %v1534_v60 = vld [vmem:[%s2079_s0 + $0x30] ss:$8 sps:$4 sm:$0xff]   ;;  %v1541_v3 = vld [vmem:[%s2078_s1 + $0x108] sm:$0xff]  }
  0x16   :  { %1394 = vmatprep.subr.bf16.mxu1 %v1492_v22  ;;  %v1532_v58 = vld [vmem:[%s2078_s1 + $0x118] sm:$0xff]   ;;  %v1537_v63 = vld [vmem:[%s2078_s1 + $0x110] sm:$0xff]   ;;  %v1542_v4 = vld [vmem:[%s2078_s1 + $0x188] sm:$0xff]  }
  0x17   :  { %v1533_v59 = vld [vmem:[%s2078_s1 + $0x198] sm:$0xff]   ;;  %v1538_v0 = vld [vmem:[%s2078_s1 + $0x190] sm:$0xff]   ;;  %v1543_v5 = vld [vmem:[%s2078_s1 + $0x140] sm:$0xff]  }
  0x18   :  { %1367 = vmatpush3.bf16.msra.mxu0 %v1493_v23  ;;  %v1544_v6 = vld [vmem:[%s2078_s1 + $0x1c0] sm:$0xff]   ;;  %v1553_v13 = vld [vmem:[%s2079_s0 + $0x54] ss:$8 sps:$4 sm:$0xff]   ;;  %v58_v17 = vld [vmem:[%s2080_s2 + $0x8] sm:$0xff] }
  0x19   :  { %1395 = vmatpush3.bf16.msra.mxu1 %v1494_v24  ;;  %1368 = vmatprep.subr.bf16.mxu0 %v1495_v25  ;;  %v1545_v7 = vld [vmem:[%s2078_s1 + $0x100] sm:$0xff]   ;;  %v1555_v14 = vld [vmem:[%s2079_s0 + $0x74] ss:$8 sps:$4 sm:$0xff]   ;;  %v1557_v18 = vld [vmem:[%s2079_s0 + $0x50] ss:$8 sps:$4 sm:$0xff]  }
  0x1a   :  { %1396 = vmatprep.subr.bf16.mxu1 %v1496_v26  ;;  %v1546_v8 = vld [vmem:[%s2078_s1 + $0x180] sm:$0xff]   ;;  %v59_v16 = vld [vmem:[%s2080_s2 + $0x10] sm:$0xff]  ;;  %v60_v19 = vld [vmem:[%s2080_s2 + $0x18] sm:$0xff] }
  0x1b   :  { %v1547_v9 = vld [vmem:[%s2079_s0 + $0x40] ss:$8 sps:$4 sm:$0xff]   ;;  %v1549_v10 = vld [vmem:[%s2079_s0 + $0x44] ss:$8 sps:$4 sm:$0xff]   ;;  %73 = vperm.xlu1 %1470, %v59_v16   ;;  %v1558_v20 = vld [vmem:[%s2079_s0 + $0x70] ss:$8 sps:$4 sm:$0xff]  }
  0x1c   :  { %1369 = vmatpush3.bf16.msra.mxu0 %v1497_v27  ;;  %v1550_v11 = vld [vmem:[%s2079_s0 + $0x60] ss:$8 sps:$4 sm:$0xff]   ;;  %v1552_v12 = vld [vmem:[%s2079_s0 + $0x64] ss:$8 sps:$4 sm:$0xff]  }
  0x1d   :  { %1397 = vmatpush3.bf16.msra.mxu1 %v1498_v28  ;;  %1370 = vmatprep.subr.bf16.mxu0 %v1499_v29  ;;  %v57_v15 = vld [vmem:[%s2080_s2] sm:$0xff] }
  0x1e   :  { %1398 = vmatprep.subr.bf16.mxu1 %v1500_v30  ;;  %63 = vperm.xlu0 %1469, %v57_v15  }
  0x1f   :  { %78 = vperm.xlu1 %1470, %v60_v19  }
  0x20   :  { %1371 = vmatpush3.bf16.msra.mxu0 %v1501_v31 }
  0x21   :  { %1399 = vmatpush3.bf16.msra.mxu1 %v1502_v32  ;;  %1412 = vmatprep.subr.bf16.mxu0 %v1509_v37 }
  0x22   :  { %1440 = vmatprep.subr.bf16.mxu1 %v1510_v38  ;;  %68 = vperm.xlu0 %1469, %v58_v17  }
  0x23   :  { %230 = vmatmul.mubr.bf16.vlgmr.msra.gmra.mxu0 %v1503_v33 }
  0x24   :  { %433 = vmatmul.mubr.bf16.vlgmr.msra.gmra.mxu1 %v1506_v35  ;;  %1413 = vmatpush3.bf16.msra.mxu0 %v1511_v39 }
  0x25   :  { %1441 = vmatpush3.bf16.msra.mxu1 %v1512_v40  ;;  %1414 = vmatprep.subr.bf16.mxu0 %v1513_v41 }
  0x26   :  { %1442 = vmatprep.subr.bf16.mxu1 %v1514_v42  ;;  %237 = vmatprep.mubr.bf16.mxu0 %v1523_v51 }
  0x27   :  { %440 = vmatprep.mubr.bf16.mxu1 %v1530_v57 }
  0x28   :  { %1415 = vmatpush3.bf16.msra.mxu0 %v1515_v43 }
  0x29   :  { %1443 = vmatpush3.bf16.msra.mxu1 %v1516_v44  ;;  %1416 = vmatprep.subr.bf16.mxu0 %v1517_v45 }
  0x2a   :  { %1444 = vmatprep.subr.bf16.mxu1 %v1518_v46 }
  0x2b   :  { %238 = vmatmul.mubr.bf16.gmra.mxu0 %v1527_v54 }
  0x2c   :  { %1417 = vmatpush3.bf16.msra.mxu0 %v1519_v47  ;;  %441 = vmatmul.mubr.bf16.gmra.mxu1 %v1534_v60 }
  0x2d   :  { %1445 = vmatpush3.bf16.msra.mxu1 %v1520_v48  ;;  %1418 = vmatprep.subr.bf16.mxu0 %v1521_v49 }
  0x2e   :  { %1446 = vmatprep.subr.bf16.mxu1 %v1522_v50  ;;  %635 = vmatprep.mubr.bf16.mxu0 %v1549_v10 }
  0x2f   :  { %838 = vmatprep.mubr.bf16.mxu1 %v1552_v12 }
  0x30   :  { %1419 = vmatpush3.bf16.msra.mxu0 %v1525_v52 }
  0x31   :  { %1447 = vmatpush3.bf16.msra.mxu1 %v1526_v53  ;;  %1420 = vmatprep.subr.bf16.mxu0 %v1528_v55 }
  0x32   :  { %1448 = vmatprep.subr.bf16.mxu1 %v1529_v56 }
  0x34   :  { %1421 = vmatpush3.bf16.msra.mxu0 %v1532_v58 }
  0x35   :  { %1449 = vmatpush3.bf16.msra.mxu1 %v1533_v59  ;;  %1422 = vmatprep.subr.bf16.mxu0 %v1535_v61 }
  0x36   :  { %1450 = vmatprep.subr.bf16.mxu1 %v1536_v62 }
  0x38   :  { %1423 = vmatpush3.bf16.msra.mxu0 %v1537_v63 }
  0x39   :  { %1451 = vmatpush3.bf16.msra.mxu1 %v1538_v0  ;;  %1424 = vmatprep.subr.bf16.mxu0 %v1539_v1 }
  0x3a   :  { %1452 = vmatprep.subr.bf16.mxu1 %v1540_v2 }
  0x3c   :  { %1425 = vmatpush3.bf16.msra.mxu0 %v1541_v3 }
  0x3d   :  { %1453 = vmatpush3.bf16.msra.mxu1 %v1542_v4  ;;  %1426 = vmatprep.subr.bf16.mxu0 %v1543_v5 }
  0x3e   :  { %1454 = vmatprep.subr.bf16.mxu1 %v1544_v6 }
  0x40   :  { %1427 = vmatpush3.bf16.msra.mxu0 %v1545_v7 }
  0x41   :  { %1455 = vmatpush3.bf16.msra.mxu1 %v1546_v8 }
  0x43   :  { %636 = vmatmul.mubr.bf16.vlgmr.msra.gmra.mxu0 %v1547_v9 }
  0x44   :  { %839 = vmatmul.mubr.bf16.vlgmr.msra.gmra.mxu1 %v1550_v11  ;;  %643 = vmatprep.mubr.bf16.mxu0 %v1553_v13 }
  0x45   :  { %846 = vmatprep.mubr.bf16.mxu1 %v1555_v14 }
  0x4b   :  { %644 = vmatmul.mubr.bf16.gmra.mxu0 %v1557_v18 }
  0x4c   :  { %847 = vmatmul.mubr.bf16.gmra.mxu1 %v1558_v20 }
  0x96   :  { %v74_v43 = vpop.permute.xlu1 %73 }
  0x99   :  { %v64_v22 = vpop.permute.xlu0 %63 }
  0x9a   :  { %v79_v48 = vpop.permute.xlu1 %78 }
  0x9d   :  { %v69_v32 = vpop.permute.xlu0 %68 }
  0xe3   :  { %v1372_v21 = vpop.f32.mrf.mxu0 }
  0xe4   :  { %v1400_v23 = vpop.f32.mrf.mxu1 }
  0xe5   :  { %v1373_v24 = vpop.f32.mrf.mxu0 }
  0xe6   :  { %v1374_v25 = vadd.f32 %v1373_v24, %v1372_v21  ;;  %v1401_v26 = vpop.f32.mrf.mxu1 }
  0xe7   :  { %v1402_v27 = vadd.f32 %v1401_v26, %v1400_v23  ;;  %v1375_v28 = vpop.f32.mrf.mxu0 }
  0xe8   :  { %v1403_v29 = vpop.f32.mrf.mxu1  ;;  %v1850_v30 = vadd.f32 %v1374_v25, %v64_v22 }
  0xe9   :  { %v1376_v31 = vpop.f32.mrf.mxu0  ;;  %v1852_v33 = vadd.f32 %v1402_v27, %v64_v22 }
  0xea   :  { %v1377_v34 = vadd.f32 %v1376_v31, %v1375_v28  ;;  %v1404_v35 = vpop.f32.mrf.mxu1  ;;  %v856_v36 = vsel %vm855_vm0, %v1850_v30, 0.0 }
  0xeb   :  { %v1405_v37 = vadd.f32 %v1404_v35, %v1403_v29  ;;  %v868_v38 = vsel %vm855_vm0, %v1852_v33, 0.0  ;;  %857 = vadd.xlane.f32.xlu0 %v856_v36  ;;  %v1378_v44 = vpop.f32.mrf.mxu0 }
  0xec   :  { %869 = vadd.xlane.f32.xlu1 %v868_v38  ;;  %v1858_v39 = vadd.f32 %v1377_v34, %v69_v32  ;;  %v1406_v50 = vpop.f32.mrf.mxu1 }
  0xed   :  { %v1860_v40 = vadd.f32 %v1405_v37, %v69_v32  ;;  %v1379_v45 = vpop.f32.mrf.mxu0 }
  0xee   :  { %v859_v41 = vsel %vm855_vm0, %v1858_v39, 0.0  ;;  %v1380_v46 = vadd.f32 %v1379_v45, %v1378_v44  ;;  %v1407_v54 = vpop.f32.mrf.mxu1 }
  0xef   :  { %v871_v42 = vsel %vm855_vm0, %v1860_v40, 0.0  ;;  %v1381_v47 = vpop.f32.mrf.mxu0  ;;  %v1408_v55 = vadd.f32 %v1407_v54, %v1406_v50 }
  0xf0   :  { %860 = vadd.xlane.f32.xlu1 %v859_v41  ;;  %872 = vadd.xlane.f32.xlu0 %v871_v42  ;;  %v1866_v49 = vadd.f32 %v1380_v46, %v74_v43  ;;  %v1409_v57 = vpop.f32.mrf.mxu1 }
  0xf1   :  { %v1382_v51 = vpop.f32.mrf.mxu0  ;;  %v1872_v58 = vadd.f32 %v1408_v55, %v74_v43 }
  0xf2   :  { %v1383_v52 = vadd.f32 %v1382_v51, %v1381_v47  ;;  %v862_v53 = vsel %vm855_vm0, %v1866_v49, 0.0  ;;  %v1410_v60 = vpop.f32.mrf.mxu1 }
  0xf3   :  { %v1411_v61 = vadd.f32 %v1410_v60, %v1409_v57  ;;  %v874_v62 = vsel %vm855_vm0, %v1872_v58, 0.0 }
  0xf4   :  { %863 = vadd.xlane.f32.xlu0 %v862_v53  ;;  %v1870_v56 = vadd.f32 %v1383_v52, %v79_v48  ;;  %875 = vadd.xlane.f32.xlu1 %v874_v62 }
  0xf5   :  { %v1878_v63 = vadd.f32 %v1411_v61, %v79_v48 }
  0xf6   :  { %v865_v59 = vsel %vm855_vm0, %v1870_v56, 0.0 }
  0xf7   :  { %v877_v0 = vsel %vm855_vm0, %v1878_v63, 0.0 }
  0xf8   :  { %866 = vadd.xlane.f32.xlu0 %v865_v59 }
  0xfc   :  { %878 = vadd.xlane.f32.xlu0 %v877_v0 }
 0x103   :  { %v1428_v1 = vpop.f32.mrf.mxu0 }
 0x104   :  { %v1456_v2 = vpop.f32.mrf.mxu1 }
 0x105   :  { %v1429_v3 = vpop.f32.mrf.mxu0 }
 0x106   :  { %v1430_v4 = vadd.f32 %v1429_v3, %v1428_v1  ;;  %v1457_v5 = vpop.f32.mrf.mxu1 }
 0x107   :  { %v1458_v6 = vadd.f32 %v1457_v5, %v1456_v2  ;;  %v1431_v7 = vpop.f32.mrf.mxu0 }
 0x108   :  { %v1882_v8 = vadd.f32 %v1430_v4, %v64_v22  ;;  %v1459_v9 = vpop.f32.mrf.mxu1 }
 0x109   :  { %v1432_v10 = vpop.f32.mrf.mxu0  ;;  %v1884_v11 = vadd.f32 %v1458_v6, %v64_v22 }
 0x10a   :  { %v1433_v12 = vadd.f32 %v1432_v10, %v1431_v7  ;;  %v1460_v13 = vpop.f32.mrf.mxu1  ;;  %v884_v14 = vsel %vm855_vm0, %v1882_v8, 0.0 }
 0x10b   :  { %v1461_v15 = vadd.f32 %v1460_v13, %v1459_v9  ;;  %v1434_v16 = vpop.f32.mrf.mxu0  ;;  %885 = vadd.xlane.f32.xlu1 %v884_v14  ;;  %v900_v22 = vsel %vm855_vm0, %v1884_v11, 0.0 }
 0x10c   :  { %v1888_v17 = vadd.f32 %v1433_v12, %v69_v32  ;;  %v1462_v18 = vpop.f32.mrf.mxu1 }
 0x10d   :  { %v1435_v19 = vpop.f32.mrf.mxu0  ;;  %v1890_v20 = vadd.f32 %v1461_v15, %v69_v32 }
 0x10e   :  { %v1436_v21 = vadd.f32 %v1435_v19, %v1434_v16  ;;  %v1463_v23 = vpop.f32.mrf.mxu1  ;;  %v887_v24 = vsel %vm855_vm0, %v1888_v17, 0.0 }
 0x10f   :  { %v1464_v25 = vadd.f32 %v1463_v23, %v1462_v18  ;;  %v1437_v26 = vpop.f32.mrf.mxu0  ;;  %901 = vadd.xlane.f32.xlu1 %v900_v22  ;;  %888 = vadd.xlane.f32.xlu0 %v887_v24  ;;  %v903_v36 = vsel %vm855_vm0, %v1890_v20, 0.0 }
 0x110   :  { %v1896_v27 = vadd.f32 %v1436_v21, %v74_v43  ;;  %v1465_v28 = vpop.f32.mrf.mxu1 }
 0x111   :  { %v1438_v29 = vpop.f32.mrf.mxu0  ;;  %v1898_v31 = vadd.f32 %v1464_v25, %v74_v43 }
 0x112   :  { %v1439_v32 = vadd.f32 %v1438_v29, %v1437_v26  ;;  %v1466_v34 = vpop.f32.mrf.mxu1  ;;  %v890_v35 = vsel %vm855_vm0, %v1896_v27, 0.0 }
 0x113   :  { %v1467_v37 = vadd.f32 %v1466_v34, %v1465_v28  ;;  %891 = vadd.xlane.f32.xlu1 %v890_v35  ;;  %904 = vadd.xlane.f32.xlu0 %v903_v36  ;;  %v906_v42 = vsel %vm855_vm0, %v1898_v31, 0.0 }
 0x114   :  { %v1904_v38 = vadd.f32 %v1439_v32, %v79_v48 }
 0x115   :  { %v1906_v41 = vadd.f32 %v1467_v37, %v79_v48 }
 0x116   :  { %v893_v43 = vsel %vm855_vm0, %v1904_v38, 0.0 }
 0x117   :  { %907 = vadd.xlane.f32.xlu1 %v906_v42  ;;  %894 = vadd.xlane.f32.xlu0 %v893_v43  ;;  %v909_v44 = vsel %vm855_vm0, %v1906_v41, 0.0 }
 0x11b   :  { %910 = vadd.xlane.f32.xlu0 %v909_v44 }
 0x174   :  { %v858_v45 = vpop.xlane.xlu0 %857 }
 0x175   :  { %v870_v47 = vpop.xlane.xlu1 %869 }
 0x176   :  { %v880_v55 = vadd.f32 %v870_v47, %v858_v45 }
 0x179   :  { %v873_v46 = vpop.xlane.xlu0 %872  ;;  %v861_v51 = vpop.xlane.xlu1 %860 }
 0x17a   :  { %v881_v61 = vadd.f32 %v873_v46, %v861_v51 }
 0x17d   :  { %v864_v50 = vpop.xlane.xlu0 %863  ;;  %v876_v48 = vpop.xlane.xlu1 %875 }
 0x17e   :  { %v882_v4 = vadd.f32 %v876_v48, %v864_v50 }
 0x181   :  { %v867_v52 = vpop.xlane.xlu0 %866 }
 0x185   :  { %v879_v53 = vpop.xlane.xlu0 %878 }
 0x186   :  { %v883_v21 = vadd.f32 %v879_v53, %v867_v52 }
 0x194   :  { %v886_v54 = vpop.xlane.xlu1 %885 }
 0x195   :  { %v896_v57 = vadd.f32 %v886_v54, %v880_v55 }
 0x198   :  { %v902_v59 = vpop.xlane.xlu1 %901  ;;  %v889_v60 = vpop.xlane.xlu0 %888 }
 0x199   :  { %v912_v62 = vadd.f32 %v902_v59, %v896_v57  ;;  %v897_v1 = vadd.f32 %v889_v60, %v881_v61 }
 0x19b   :  { %v1914_v0 = vmul.f32 0.125, %v912_v62 }
 0x19c   :  { %v892_v2 = vpop.xlane.xlu1 %891  ;;  %v905_v3 = vpop.xlane.xlu0 %904 }
 0x19d   :  { %v913_v5 = vadd.f32 %v905_v3, %v897_v1  ;;  %v921_v6 = vsub.f32 %v1850_v30, %v1914_v0  ;;  %v941_v7 = vsub.f32 %v1852_v33, %v1914_v0  ;;  %v898_v9 = vadd.f32 %v892_v2, %v882_v4 }
 0x19e   :  { %v965_v19 = vsub.f32 %v1882_v8, %v1914_v0  ;;  %v989_v34 = vsub.f32 %v1884_v11, %v1914_v0 }
 0x19f   :  { %v1920_v10 = vmul.f32 0.125, %v913_v5  ;;  %v925_v12 = vmul.f32 %v921_v6, %v921_v6  ;;  %v945_v18 = vmul.f32 %v941_v7, %v941_v7 }
 0x1a0   :  { %v908_v13 = vpop.xlane.xlu1 %907  ;;  %v895_v14 = vpop.xlane.xlu0 %894  ;;  %v969_v32 = vmul.f32 %v965_v19, %v965_v19  ;;  %v993_v44 = vmul.f32 %v989_v34, %v989_v34 }
 0x1a1   :  { %v914_v15 = vadd.f32 %v908_v13, %v898_v9  ;;  %v929_v16 = vsel %vm855_vm0, %v925_v12, 0.0  ;;  %v922_v23 = vsub.f32 %v1858_v39, %v1920_v10  ;;  %v942_v22 = vsub.f32 %v1860_v40, %v1920_v10 }
 0x1a2   :  { %930 = vadd.xlane.f32.xlu1 %v929_v16  ;;  %v899_v24 = vadd.f32 %v895_v14, %v883_v21  ;;  %v949_v29 = vsel %vm855_vm0, %v945_v18, 0.0  ;;  %v966_v42 = vsub.f32 %v1888_v17, %v1920_v10  ;;  %v973_v43 = vsel %vm855_vm0, %v969_v32, 0.0 }
 0x1a3   :  { %v926_v26 = vmul.f32 %v922_v23, %v922_v23  ;;  %v1929_v28 = vmul.f32 0.125, %v914_v15  ;;  %v946_v37 = vmul.f32 %v942_v22, %v942_v22  ;;  %v990_v51 = vsub.f32 %v1890_v20, %v1920_v10 }
 0x1a4   :  { %v911_v25 = vpop.xlane.xlu0 %910  ;;  %v970_v50 = vmul.f32 %v966_v42, %v966_v42  ;;  %v997_v52 = vsel %vm855_vm0, %v993_v44, 0.0 }
 0x1a5   :  { %v915_v35 = vadd.f32 %v911_v25, %v899_v24  ;;  %v932_v36 = vsel %vm855_vm0, %v926_v26, 0.0  ;;  %v923_v45 = vsub.f32 %v1866_v49, %v1929_v28  ;;  %v952_v47 = vsel %vm855_vm0, %v946_v37, 0.0 }
 0x1a6   :  { %950 = vadd.xlane.f32.xlu1 %v949_v29  ;;  %933 = vadd.xlane.f32.xlu0 %v932_v36  ;;  %v943_v53 = vsub.f32 %v1872_v58, %v1929_v28  ;;  %v976_v54 = vsel %vm855_vm0, %v970_v50, 0.0  ;;  %v994_v55 = vmul.f32 %v990_v51, %v990_v51  ;;  %v967_v61 = vsub.f32 %v1896_v27, %v1929_v28 }
 0x1a7   :  { %v1940_v46 = vmul.f32 0.125, %v915_v35  ;;  %v927_v48 = vmul.f32 %v923_v45, %v923_v45  ;;  %v991_v5 = vsub.f32 %v1898_v31, %v1929_v28 }
 0x1a8   :  { %v947_v60 = vmul.f32 %v943_v53, %v943_v53  ;;  %v1000_v62 = vsel %vm855_vm0, %v994_v55, 0.0  ;;  %v971_v4 = vmul.f32 %v967_v61, %v967_v61 }
 0x1a9   :  { %v924_v57 = vsub.f32 %v1870_v56, %v1940_v46  ;;  %v935_v59 = vsel %vm855_vm0, %v927_v48, 0.0  ;;  %v944_v2 = vsub.f32 %v1878_v63, %v1940_v46  ;;  %v968_v9 = vsub.f32 %v1904_v38, %v1940_v46 }
 0x1aa   :  { %974 = vadd.xlane.f32.xlu1 %v973_v43  ;;  %953 = vadd.xlane.f32.xlu0 %v952_v47  ;;  %v955_v3 = vsel %vm855_vm0, %v947_v60, 0.0  ;;  %v979_v12 = vsel %vm855_vm0, %v971_v4, 0.0  ;;  %v995_v13 = vmul.f32 %v991_v5, %v991_v5  ;;  %v992_v16 = vsub.f32 %v1906_v41, %v1940_v46 }
 0x1ab   :  { %v928_v1 = vmul.f32 %v924_v57, %v924_v57  ;;  %v948_v7 = vmul.f32 %v944_v2, %v944_v2  ;;  %v972_v15 = vmul.f32 %v968_v9, %v968_v9 }
 0x1ac   :  { %v1003_v18 = vsel %vm855_vm0, %v995_v13, 0.0  ;;  %v996_v21 = vmul.f32 %v992_v16, %v992_v16 }
 0x1ad   :  { %v938_v6 = vsel %vm855_vm0, %v928_v1, 0.0  ;;  %v958_v14 = vsel %vm855_vm0, %v948_v7, 0.0  ;;  %v982_v19 = vsel %vm855_vm0, %v972_v15, 0.0 }
 0x1ae   :  { %998 = vadd.xlane.f32.xlu1 %v997_v52  ;;  %977 = vadd.xlane.f32.xlu0 %v976_v54  ;;  %v1006_v23 = vsel %vm855_vm0, %v996_v21, 0.0 }
 0x1b2   :  { %936 = vadd.xlane.f32.xlu1 %v935_v59  ;;  %1001 = vadd.xlane.f32.xlu0 %v1000_v62 }
 0x1b6   :  { %956 = vadd.xlane.f32.xlu1 %v955_v3  ;;  %939 = vadd.xlane.f32.xlu0 %v938_v6  ;;  %v1017_v3 = vld [vmem:[%s2081_s3] sm:$0xff] }
 0x1ba   :  { %980 = vadd.xlane.f32.xlu1 %v979_v12  ;;  %959 = vadd.xlane.f32.xlu0 %v958_v14  ;;  %v1018_v14 = vld [vmem:[%s2081_s3 + $0x8] sm:$0xff] }
 0x1be   :  { %1004 = vadd.xlane.f32.xlu1 %v1003_v18  ;;  %983 = vadd.xlane.f32.xlu0 %v982_v19 }
 0x1c2   :  { %1007 = vadd.xlane.f32.xlu0 %v1006_v23  ;;  %v1033_v23 = vld [vmem:[%s2082_s4] sm:$0xff] }
 0x22b   :  { %v931_v22 = vpop.xlane.xlu1 %930 }
 0x22f   :  { %v951_v24 = vpop.xlane.xlu1 %950  ;;  %v934_v25 = vpop.xlane.xlu0 %933 }
 0x230   :  { %v961_v29 = vadd.f32 %v951_v24, %v931_v22  ;;  %v1019_v24 = vld [vmem:[%s2081_s3 + $0x10] sm:$0xff] }
 0x233   :  { %v975_v26 = vpop.xlane.xlu1 %974  ;;  %v954_v32 = vpop.xlane.xlu0 %953 }
 0x234   :  { %v985_v34 = vadd.f32 %v975_v26, %v961_v29  ;;  %v962_v42 = vadd.f32 %v954_v32, %v934_v25  ;;  %v1034_v32 = vld [vmem:[%s2082_s4 + $0x8] sm:$0xff] }
 0x237   :  { %v999_v35 = vpop.xlane.xlu1 %998  ;;  %v978_v37 = vpop.xlane.xlu0 %977 }
 0x238   :  { %v1009_v36 = vadd.f32 %v999_v35, %v985_v34  ;;  %v986_v44 = vadd.f32 %v978_v37, %v962_v42  ;;  %v1020_v35 = vld [vmem:[%s2081_s3 + $0x18] sm:$0xff] }
 0x23a   :  { %v1013_v43 = vmul.f32 0.125, %v1009_v36 }
 0x23b   :  { %v937_v45 = vpop.xlane.xlu1 %936  ;;  %v1002_v50 = vpop.xlane.xlu0 %1001 }
 0x23c   :  { %v1021_v47 = vadd.f32 1e-05, %v1013_v43  ;;  %v1010_v51 = vadd.f32 %v1002_v50, %v986_v44  ;;  %v1036_v44 = vld [vmem:[%s2082_s4 + $0x18] sm:$0xff] }
 0x23e   :  { %1559 = vrsqrt.f32 %v1021_v47  ;;  %v1014_v52 = vmul.f32 0.125, %v1010_v51 }
 0x23f   :  { %v957_v48 = vpop.xlane.xlu1 %956  ;;  %v940_v53 = vpop.xlane.xlu0 %939 }
 0x240   :  { %v1022_v54 = vadd.f32 1e-05, %v1014_v52  ;;  %v963_v57 = vadd.f32 %v957_v48, %v937_v45 }
 0x242   :  { %1561 = vrsqrt.f32 %v1022_v54 }
 0x243   :  { %v981_v55 = vpop.xlane.xlu1 %980  ;;  %v960_v59 = vpop.xlane.xlu0 %959 }
 0x244   :  { %v987_v60 = vadd.f32 %v981_v55, %v963_v57  ;;  %v964_v2 = vadd.f32 %v960_v59, %v940_v53 }
 0x247   :  { %v1005_v61 = vpop.xlane.xlu1 %1004  ;;  %v984_v1 = vpop.xlane.xlu0 %983 }
 0x248   :  { %v1011_v62 = vadd.f32 %v1005_v61, %v987_v60  ;;  %v988_v6 = vadd.f32 %v984_v1, %v964_v2 }
 0x24a   :  { %v1015_v4 = vmul.f32 0.125, %v1011_v62 }
 0x24b   :  { %v1560_v5 = vpop.eup %1559  ;;  %v1008_v9 = vpop.xlane.xlu0 %1007 }
 0x24c   :  { %v1023_v7 = vadd.f32 1e-05, %v1015_v4  ;;  %v1029_v12 = vmul.f32 %v1560_v5, %v1017_v3  ;;  %v1012_v13 = vadd.f32 %v1008_v9, %v988_v6 }
 0x24e   :  { %1563 = vrsqrt.f32 %v1023_v7  ;;  %1047 = vperm.xlu1 %1470, %v1029_v12   ;;  %v1016_v15 = vmul.f32 0.125, %v1012_v13  ;;  %v1037_v21 = vmul.f32 %v1029_v12, %v1914_v0  ;;  %v1035_v0 = vld [vmem:[%s2082_s4 + $0x10] sm:$0xff] }
 0x24f   :  { %v1562_v16 = vpop.eup %1561 }
 0x250   :  { %v1024_v18 = vadd.f32 1e-05, %v1016_v15  ;;  %v1030_v19 = vmul.f32 %v1562_v16, %v1018_v14  ;;  %v1041_v22 = vsub.f32 %v1033_v23, %v1037_v21 }
 0x252   :  { %1565 = vrsqrt.f32 %v1024_v18  ;;  %1052 = vperm.xlu0 %1469, %v1030_v19   ;;  %v1038_v29 = vmul.f32 %v1030_v19, %v1920_v10 }
 0x254   :  { %v1042_v42 = vsub.f32 %v1034_v32, %v1038_v29 }
 0x256   :  { %1071 = vperm.xlu0 %1469, %v1041_v22  }
 0x25b   :  { %v1564_v25 = vpop.eup %1563 }
 0x25c   :  { %v1031_v26 = vmul.f32 %v1564_v25, %v1019_v24 }
 0x25e   :  { %1057 = vperm.xlu1 %1470, %v1031_v26   ;;  %v1039_v34 = vmul.f32 %v1031_v26, %v1929_v28 }
 0x25f   :  { %v1566_v36 = vpop.eup %1565 }
 0x260   :  { %v1043_v37 = vsub.f32 %v1035_v0, %v1039_v34  ;;  %v1032_v43 = vmul.f32 %v1566_v36, %v1020_v35 }
 0x262   :  { %1081 = vperm.xlu0 %1469, %v1043_v37   ;;  %1076 = vperm.xlu1 %1470, %v1042_v42   ;;  %v1040_v10 = vmul.f32 %v1032_v43, %v1940_v46 }
 0x264   :  { %v1044_v45 = vsub.f32 %v1036_v44, %v1040_v10 }
 0x266   :  { %1062 = vperm.xlu1 %1470, %v1032_v43  }
 0x26a   :  { %1086 = vperm.xlu1 %1470, %v1044_v45  }
 0x2c9   :  { %v1048_v28 = vpop.permute.xlu1 %1047 }
 0x2ca   :  { %v1065_v50 = vmul.f32 %v1048_v28, %v1850_v30  ;;  %v1093_v51 = vmul.f32 %v1048_v28, %v1852_v33  ;;  %v1101_v52 = vmul.f32 %v1048_v28, %v1882_v8  ;;  %v1109_v48 = vmul.f32 %v1048_v28, %v1884_v11 }
 0x2cd   :  { %v1053_v47 = vpop.permute.xlu0 %1052 }
 0x2ce   :  { %v1066_v33 = vmul.f32 %v1053_v47, %v1858_v39  ;;  %v1094_v8 = vmul.f32 %v1053_v47, %v1860_v40  ;;  %v1102_v11 = vmul.f32 %v1053_v47, %v1888_v17  ;;  %v1110_v1 = vmul.f32 %v1053_v47, %v1890_v20 }
 0x2d1   :  { %v1072_v53 = vpop.permute.xlu0 %1071 }
 0x2d2   :  { %v1089_v54 = vadd.f32 %v1072_v53, %v1065_v50  ;;  %v1097_v46 = vadd.f32 %v1093_v51, %v1072_v53  ;;  %v1105_v55 = vadd.f32 %v1101_v52, %v1072_v53  ;;  %v1113_v57 = vadd.f32 %v1109_v48, %v1072_v53 }
 0x2d4   :  { %v1117_v59 = vmax.f32 %v1089_v54, 0.0  ;;  %v1125_v60 = vmax.f32 %v1097_v46, 0.0  ;;  %v1134_v61 = vmax.f32 %v1105_v55, 0.0  ;;  %v1143_v62 = vmax.f32 %v1113_v57, 0.0 }
 0x2d6   :  { %1121 = vst.msk [vmem:[%s2083_s5] sm:$0xff] %vm855_vm0, %v1117_v59  ;;  %1344 = vst.msk [vmem:[%s2083_s5 + $0x20] sm:$0xff] %vm855_vm0, %v1125_v60 }
 0x2d7   :  { %1348 = vst.msk [vmem:[%s2083_s5 + $0x40] sm:$0xff] %vm855_vm0, %v1134_v61  ;;  %1352 = vst.msk [vmem:[%s2083_s5 + $0x60] sm:$0xff] %vm855_vm0, %v1143_v62 }
 0x2d9   :  { %v1058_v30 = vpop.permute.xlu1 %1057 }
 0x2da   :  { %v1067_v3 = vmul.f32 %v1058_v30, %v1866_v49  ;;  %v1095_v4 = vmul.f32 %v1058_v30, %v1872_v58  ;;  %v1103_v5 = vmul.f32 %v1058_v30, %v1896_v27  ;;  %v1111_v6 = vmul.f32 %v1058_v30, %v1898_v31 }
 0x2dd   :  { %v1077_v2 = vpop.permute.xlu1 %1076  ;;  %v1082_v7 = vpop.permute.xlu0 %1081 }
 0x2de   :  { %v1090_v9 = vadd.f32 %v1077_v2, %v1066_v33  ;;  %v1098_v12 = vadd.f32 %v1094_v8, %v1077_v2  ;;  %v1106_v13 = vadd.f32 %v1102_v11, %v1077_v2  ;;  %v1114_v39 = vadd.f32 %v1110_v1, %v1077_v2 }
 0x2df   :  { %v1091_v14 = vadd.f32 %v1082_v7, %v1067_v3  ;;  %v1099_v40 = vadd.f32 %v1095_v4, %v1082_v7  ;;  %v1107_v15 = vadd.f32 %v1103_v5, %v1082_v7  ;;  %v1115_v17 = vadd.f32 %v1111_v6, %v1082_v7 }
 0x2e0   :  { %v1118_v16 = vmax.f32 %v1090_v9, 0.0  ;;  %v1126_v20 = vmax.f32 %v1098_v12, 0.0  ;;  %v1135_v18 = vmax.f32 %v1106_v13, 0.0  ;;  %v1144_v19 = vmax.f32 %v1114_v39, 0.0 }
 0x2e1   :  { %v1119_v49 = vmax.f32 %v1091_v14, 0.0  ;;  %v1127_v21 = vmax.f32 %v1099_v40, 0.0  ;;  %v1136_v58 = vmax.f32 %v1107_v15, 0.0  ;;  %v1145_v23 = vmax.f32 %v1115_v17, 0.0  ;;  %v1063_v27 = vpop.permute.xlu1 %1062 }
 0x2e2   :  { %1122 = vst.msk [vmem:[%s2083_s5 + $0x8] sm:$0xff] %vm855_vm0, %v1118_v16  ;;  %1345 = vst.msk [vmem:[%s2083_s5 + $0x28] sm:$0xff] %vm855_vm0, %v1126_v20  ;;  %v1068_v31 = vmul.f32 %v1063_v27, %v1870_v56  ;;  %v1096_v22 = vmul.f32 %v1063_v27, %v1878_v63  ;;  %v1104_v24 = vmul.f32 %v1063_v27, %v1904_v38 }
 0x2e3   :  { %1349 = vst.msk [vmem:[%s2083_s5 + $0x48] sm:$0xff] %vm855_vm0, %v1135_v18  ;;  %1353 = vst.msk [vmem:[%s2083_s5 + $0x68] sm:$0xff] %vm855_vm0, %v1144_v19  ;;  %v1112_v25 = vmul.f32 %v1063_v27, %v1906_v41 }
 0x2e4   :  { %1123 = vst.msk [vmem:[%s2083_s5 + $0x10] sm:$0xff] %vm855_vm0, %v1119_v49  ;;  %1346 = vst.msk [vmem:[%s2083_s5 + $0x30] sm:$0xff] %vm855_vm0, %v1127_v21 }
 0x2e5   :  { %1350 = vst.msk [vmem:[%s2083_s5 + $0x50] sm:$0xff] %vm855_vm0, %v1136_v58  ;;  %1354 = vst.msk [vmem:[%s2083_s5 + $0x70] sm:$0xff] %vm855_vm0, %v1145_v23  ;;  %v1087_v26 = vpop.permute.xlu1 %1086 }
 0x2e6   :  { %v1092_v29 = vadd.f32 %v1087_v26, %v1068_v31  ;;  %v1100_v0 = vadd.f32 %v1096_v22, %v1087_v26  ;;  %v1108_v32 = vadd.f32 %v1104_v24, %v1087_v26  ;;  %v1116_v34 = vadd.f32 %v1112_v25, %v1087_v26 }
 0x2e8   :  { %v1120_v35 = vmax.f32 %v1092_v29, 0.0  ;;  %v1128_v36 = vmax.f32 %v1100_v0, 0.0  ;;  %v1137_v37 = vmax.f32 %v1108_v32, 0.0  ;;  %v1146_v42 = vmax.f32 %v1116_v34, 0.0 }
 0x2ea   :  { %1124 = vst.msk [vmem:[%s2083_s5 + $0x18] sm:$0xff] %vm855_vm0, %v1120_v35  ;;  %1347 = vst.msk [vmem:[%s2083_s5 + $0x38] sm:$0xff] %vm855_vm0, %v1128_v36 }
 0x2eb   :  { %1351 = vst.msk [vmem:[%s2083_s5 + $0x58] sm:$0xff] %vm855_vm0, %v1137_v37  ;;  %1355 = vst.msk [vmem:[%s2083_s5 + $0x78] sm:$0xff] %vm855_vm0, %v1146_v42 }

// kernel: autoencoder_forward.13
= control target key start
LH: loop header
LB: loop body
LE: loop exit
PB: predicated region body
PF: predicated region fallthrough
CT: control target
= control target key end

     0   :  { %v903_v0 = vmov 0.0   ;;  %vm904_vm0 = vmmov 0   ;;  %v905_v4 = vmov 0   ;;  %vm491_vm1 = vcmask 64512   ;;  %s1197_s1 = inlined_call_operand.vmem [shape: bf16[4,128,8], index: 1, kind: input, shape index: {}]   ;;  %s1198_s0 = inlined_call_operand.vmem [shape: bf16[4,16,128], index: 0, kind: input, shape index: {}]   ;;  %s1199_s2 = inlined_call_operand.vmem [shape: f32[16,1], index: 2, kind: input, shape index: {}]   ;;  %s1200_s3 = inlined_call_operand.vmem [shape: f32[16,1], index: 3, kind: input, shape index: {}]   ;;  %s1201_s4 = inlined_call_operand.vmem [shape: f32[16,1], index: 4, kind: input, shape index: {}]   ;;  %s1202_s5 = inlined_call_operand.vmem [shape: f32[4,16,8], index: 5, kind: output, shape index: {}]  }
   0x1   :  { %778 = vmatprep.subr.bf16.mxu0 %v903_v0  ;;  %798 = vmatprep.subr.bf16.mxu1 %v903_v0  ;;  %v863_v1 = vld [vmem:[%s1197_s1 + $0x38] sm:$0xff]   ;;  %v865_v3 = vld [vmem:[%s1197_s1 + $0x30] sm:$0xff]   ;;  %v867_v6 = vld [vmem:[%s1197_s1 + $0x28] sm:$0xff]  }
   0x2   :  { %v864_v2 = vld [vmem:[%s1197_s1 + $0x78] sm:$0xff]   ;;  %794 = vmatprep.mubr.msk.bf16.mxu0 %vm904_vm0, %v903_v0  ;;  %814 = vmatprep.mubr.msk.bf16.mxu1 %vm904_vm0, %v903_v0  ;;  %v866_v5 = vld [vmem:[%s1197_s1 + $0x70] sm:$0xff]   ;;  %v868_v7 = vld [vmem:[%s1197_s1 + $0x68] sm:$0xff]  }
   0x3   :  { %779 = vmatpush3.bf16.msra.mxu0 %v863_v1  ;;  %861 = vset.pattern.permute.xlu0 %v905_v4  ;;  %v869_v8 = vld [vmem:[%s1197_s1 + $0x20] sm:$0xff]   ;;  %v871_v10 = vld [vmem:[%s1197_s1 + $0x18] sm:$0xff]   ;;  %v873_v12 = vld [vmem:[%s1197_s1 + $0x10] sm:$0xff]  }
   0x4   :  { %799 = vmatpush3.bf16.msra.mxu1 %v864_v2  ;;  %780 = vmatprep.subr.bf16.mxu0 %v903_v0  ;;  %v870_v9 = vld [vmem:[%s1197_s1 + $0x60] sm:$0xff]   ;;  %v872_v11 = vld [vmem:[%s1197_s1 + $0x58] sm:$0xff]   ;;  %v874_v13 = vld [vmem:[%s1197_s1 + $0x50] sm:$0xff]  }
   0x5   :  { %800 = vmatprep.subr.bf16.mxu1 %v903_v0  ;;  %862 = vset.pattern.permute.xlu1 %v905_v4  ;;  %v875_v14 = vld [vmem:[%s1197_s1 + $0x8] sm:$0xff]   ;;  %v877_v16 = vld [vmem:[%s1197_s1] sm:$0xff]   ;;  %v881_v20 = vld [vmem:[%s1197_s1 + $0xb8] sm:$0xff]  }
   0x6   :  { %v876_v15 = vld [vmem:[%s1197_s1 + $0x48] sm:$0xff]   ;;  %v878_v17 = vld [vmem:[%s1197_s1 + $0x40] sm:$0xff]   ;;  %v882_v21 = vld [vmem:[%s1197_s1 + $0xf8] sm:$0xff]  }
   0x7   :  { %781 = vmatpush3.bf16.msra.mxu0 %v865_v3  ;;  %v879_v18 = vld [vmem:[%s1198_s0] sm:$0xff]   ;;  %v880_v19 = vld [vmem:[%s1198_s0 + $0x8] sm:$0xff]   ;;  %v883_v22 = vld [vmem:[%s1197_s1 + $0xb0] sm:$0xff]  }
   0x8   :  { %801 = vmatpush3.bf16.msra.mxu1 %v866_v5  ;;  %782 = vmatprep.subr.bf16.mxu0 %v903_v0  ;;  %v884_v23 = vld [vmem:[%s1197_s1 + $0xf0] sm:$0xff]   ;;  %v39_v24 = vld [vmem:[%s1199_s2] sm:$0xff]  ;;  %v885_v25 = vld [vmem:[%s1197_s1 + $0xa8] sm:$0xff]  }
   0x9   :  { %802 = vmatprep.subr.bf16.mxu1 %v903_v0  ;;  %43 = vperm.xlu0 %861, %v39_v24   ;;  %v40_v26 = vld [vmem:[%s1199_s2 + $0x8] sm:$0xff]  ;;  %v887_v28 = vld [vmem:[%s1197_s1 + $0xa0] sm:$0xff]   ;;  %v889_v30 = vld [vmem:[%s1197_s1 + $0x98] sm:$0xff]  }
   0xa   :  { %v886_v27 = vld [vmem:[%s1197_s1 + $0xe8] sm:$0xff]   ;;  %v888_v29 = vld [vmem:[%s1197_s1 + $0xe0] sm:$0xff]   ;;  %v890_v31 = vld [vmem:[%s1197_s1 + $0xd8] sm:$0xff]  }
   0xb   :  { %783 = vmatpush3.bf16.msra.mxu0 %v867_v6  ;;  %v891_v32 = vld [vmem:[%s1197_s1 + $0x90] sm:$0xff]   ;;  %v893_v34 = vld [vmem:[%s1197_s1 + $0x88] sm:$0xff]   ;;  %v895_v36 = vld [vmem:[%s1197_s1 + $0x80] sm:$0xff]  }
   0xc   :  { %803 = vmatpush3.bf16.msra.mxu1 %v868_v7  ;;  %784 = vmatprep.subr.bf16.mxu0 %v903_v0  ;;  %v892_v33 = vld [vmem:[%s1197_s1 + $0xd0] sm:$0xff]   ;;  %v894_v35 = vld [vmem:[%s1197_s1 + $0xc8] sm:$0xff]   ;;  %v896_v37 = vld [vmem:[%s1197_s1 + $0xc0] sm:$0xff]  }
   0xd   :  { %804 = vmatprep.subr.bf16.mxu1 %v903_v0  ;;  %48 = vperm.xlu0 %861, %v40_v26   ;;  %v897_v38 = vld [vmem:[%s1198_s0 + $0x10] sm:$0xff]   ;;  %v898_v39 = vld [vmem:[%s1198_s0 + $0x18] sm:$0xff]  }
   0xf   :  { %785 = vmatpush3.bf16.msra.mxu0 %v869_v8 }
  0x10   :  { %805 = vmatpush3.bf16.msra.mxu1 %v870_v9  ;;  %786 = vmatprep.subr.bf16.mxu0 %v903_v0 }
  0x11   :  { %806 = vmatprep.subr.bf16.mxu1 %v903_v0 }
  0x13   :  { %787 = vmatpush3.bf16.msra.mxu0 %v871_v10 }
  0x14   :  { %807 = vmatpush3.bf16.msra.mxu1 %v872_v11  ;;  %788 = vmatprep.subr.bf16.mxu0 %v903_v0 }
  0x15   :  { %808 = vmatprep.subr.bf16.mxu1 %v903_v0 }
  0x17   :  { %789 = vmatpush3.bf16.msra.mxu0 %v873_v12 }
  0x18   :  { %809 = vmatpush3.bf16.msra.mxu1 %v874_v13  ;;  %790 = vmatprep.subr.bf16.mxu0 %v903_v0 }
  0x19   :  { %810 = vmatprep.subr.bf16.mxu1 %v903_v0 }
  0x1b   :  { %791 = vmatpush3.bf16.msra.mxu0 %v875_v14 }
  0x1c   :  { %811 = vmatpush3.bf16.msra.mxu1 %v876_v15  ;;  %792 = vmatprep.subr.bf16.mxu0 %v903_v0 }
  0x1d   :  { %812 = vmatprep.subr.bf16.mxu1 %v903_v0 }
  0x1f   :  { %793 = vmatpush3.bf16.msra.mxu0 %v877_v16 }
  0x20   :  { %813 = vmatpush3.bf16.msra.mxu1 %v878_v17  ;;  %818 = vmatprep.subr.bf16.mxu0 %v903_v0 }
  0x21   :  { %838 = vmatprep.subr.bf16.mxu1 %v903_v0 }
  0x22   :  { %795 = vmatmul.mubr.bf16.vlgmr.msra.gmra.mxu0 %v879_v18 }
  0x23   :  { %815 = vmatmul.mubr.bf16.vlgmr.msra.gmra.mxu1 %v880_v19  ;;  %819 = vmatpush3.bf16.msra.mxu0 %v881_v20 }
  0x24   :  { %839 = vmatpush3.bf16.msra.mxu1 %v882_v21  ;;  %820 = vmatprep.subr.bf16.mxu0 %v903_v0 }
  0x25   :  { %840 = vmatprep.subr.bf16.mxu1 %v903_v0  ;;  %834 = vmatprep.mubr.msk.bf16.mxu0 %vm904_vm0, %v903_v0 }
  0x26   :  { %854 = vmatprep.mubr.msk.bf16.mxu1 %vm904_vm0, %v903_v0 }
  0x27   :  { %821 = vmatpush3.bf16.msra.mxu0 %v883_v22 }
  0x28   :  { %841 = vmatpush3.bf16.msra.mxu1 %v884_v23  ;;  %822 = vmatprep.subr.bf16.mxu0 %v903_v0 }
  0x29   :  { %842 = vmatprep.subr.bf16.mxu1 %v903_v0 }
  0x2b   :  { %823 = vmatpush3.bf16.msra.mxu0 %v885_v25 }
  0x2c   :  { %843 = vmatpush3.bf16.msra.mxu1 %v886_v27  ;;  %824 = vmatprep.subr.bf16.mxu0 %v903_v0 }
  0x2d   :  { %844 = vmatprep.subr.bf16.mxu1 %v903_v0 }
  0x2f   :  { %825 = vmatpush3.bf16.msra.mxu0 %v887_v28 }
  0x30   :  { %845 = vmatpush3.bf16.msra.mxu1 %v888_v29  ;;  %826 = vmatprep.subr.bf16.mxu0 %v903_v0 }
  0x31   :  { %846 = vmatprep.subr.bf16.mxu1 %v903_v0 }
  0x33   :  { %827 = vmatpush3.bf16.msra.mxu0 %v889_v30 }
  0x34   :  { %847 = vmatpush3.bf16.msra.mxu1 %v890_v31  ;;  %828 = vmatprep.subr.bf16.mxu0 %v903_v0 }
  0x35   :  { %848 = vmatprep.subr.bf16.mxu1 %v903_v0 }
  0x37   :  { %829 = vmatpush3.bf16.msra.mxu0 %v891_v32 }
  0x38   :  { %849 = vmatpush3.bf16.msra.mxu1 %v892_v33  ;;  %830 = vmatprep.subr.bf16.mxu0 %v903_v0 }
  0x39   :  { %850 = vmatprep.subr.bf16.mxu1 %v903_v0 }
  0x3b   :  { %831 = vmatpush3.bf16.msra.mxu0 %v893_v34 }
  0x3c   :  { %851 = vmatpush3.bf16.msra.mxu1 %v894_v35  ;;  %832 = vmatprep.subr.bf16.mxu0 %v903_v0 }
  0x3d   :  { %852 = vmatprep.subr.bf16.mxu1 %v903_v0 }
  0x3f   :  { %833 = vmatpush3.bf16.msra.mxu0 %v895_v36 }
  0x40   :  { %853 = vmatpush3.bf16.msra.mxu1 %v896_v37 }
  0x42   :  { %835 = vmatmul.mubr.bf16.vlgmr.msra.gmra.mxu0 %v897_v38 }
  0x43   :  { %855 = vmatmul.mubr.bf16.vlgmr.msra.gmra.mxu1 %v898_v39 }
  0x84   :  { %v44_v40 = vpop.permute.xlu0 %43 }
  0x88   :  { %v49_v46 = vpop.permute.xlu0 %48 }
  0xe2   :  { %v139_v41 = vpop.f32.mrf.mxu0 }
  0xe3   :  { %v1090_v42 = vadd.f32 %v139_v41, %v44_v40  ;;  %v254_v43 = vpop.f32.mrf.mxu1 }
  0xe4   :  { %v1092_v44 = vadd.f32 %v254_v43, %v44_v40  ;;  %v796_v45 = vpop.f32.mrf.mxu0 }
  0xe5   :  { %v816_v47 = vpop.f32.mrf.mxu1  ;;  %v492_v48 = vsel %vm491_vm1, %v1090_v42, 0.0 }
  0xe6   :  { %493 = vadd.xlane.f32.xlu1 %v492_v48  ;;  %v142_v49 = vpop.f32.mrf.mxu0  ;;  %v498_v50 = vsel %vm491_vm1, %v1092_v44, 0.0 }
  0xe7   :  { %v257_v51 = vpop.f32.mrf.mxu1  ;;  %v1098_v52 = vadd.f32 %v142_v49, %v49_v46  ;;  %499 = vadd.xlane.f32.xlu0 %v498_v50 }
  0xe8   :  { %v797_v53 = vpop.f32.mrf.mxu0  ;;  %v1100_v54 = vadd.f32 %v257_v51, %v49_v46 }
  0xe9   :  { %v817_v55 = vpop.f32.mrf.mxu1  ;;  %v495_v56 = vsel %vm491_vm1, %v1098_v52, 0.0 }
  0xea   :  { %496 = vadd.xlane.f32.xlu1 %v495_v56  ;;  %v501_v57 = vsel %vm491_vm1, %v1100_v54, 0.0 }
  0xee   :  { %502 = vadd.xlane.f32.xlu1 %v501_v57 }
 0x102   :  { %v369_v58 = vpop.f32.mrf.mxu0 }
 0x103   :  { %v1106_v59 = vadd.f32 %v369_v58, %v44_v40  ;;  %v484_v60 = vpop.f32.mrf.mxu1 }
 0x104   :  { %v836_v61 = vpop.f32.mrf.mxu0  ;;  %v1108_v62 = vadd.f32 %v484_v60, %v44_v40 }
 0x105   :  { %v856_v63 = vpop.f32.mrf.mxu1  ;;  %v506_v0 = vsel %vm491_vm1, %v1106_v59, 0.0 }
 0x106   :  { %507 = vadd.xlane.f32.xlu1 %v506_v0  ;;  %v372_v1 = vpop.f32.mrf.mxu0  ;;  %v514_v6 = vsel %vm491_vm1, %v1108_v62, 0.0 }
 0x107   :  { %v487_v2 = vpop.f32.mrf.mxu1  ;;  %v1112_v4 = vadd.f32 %v372_v1, %v49_v46 }
 0x108   :  { %v837_v3 = vpop.f32.mrf.mxu0  ;;  %v1116_v7 = vadd.f32 %v487_v2, %v49_v46 }
 0x109   :  { %v857_v5 = vpop.f32.mrf.mxu1  ;;  %v509_v8 = vsel %vm491_vm1, %v1112_v4, 0.0 }
 0x10a   :  { %515 = vadd.xlane.f32.xlu1 %v514_v6  ;;  %v517_v9 = vsel %vm491_vm1, %v1116_v7, 0.0 }
 0x10e   :  { %510 = vadd.xlane.f32.xlu1 %v509_v8 }
 0x112   :  { %518 = vadd.xlane.f32.xlu1 %v517_v9 }
 0x16f   :  { %v494_v10 = vpop.xlane.xlu1 %493 }
 0x170   :  { %v500_v13 = vpop.xlane.xlu0 %499 }
 0x171   :  { %v504_v15 = vadd.f32 %v500_v13, %v494_v10  ;;  %v573_v13 = vld [vmem:[%s1200_s3] sm:$0xff] }
 0x173   :  { %v497_v11 = vpop.xlane.xlu1 %496 }
 0x177   :  { %v503_v12 = vpop.xlane.xlu1 %502 }
 0x178   :  { %v505_v21 = vadd.f32 %v503_v12, %v497_v11  ;;  %v574_v12 = vld [vmem:[%s1200_s3 + $0x8] sm:$0xff] }
 0x18f   :  { %v508_v14 = vpop.xlane.xlu1 %507 }
 0x190   :  { %v512_v16 = vadd.f32 %v508_v14, %v504_v15 }
 0x193   :  { %v516_v17 = vpop.xlane.xlu1 %515 }
 0x194   :  { %v520_v18 = vadd.f32 %v516_v17, %v512_v16 }
 0x196   :  { %v1122_v19 = vmul.f32 0.03125, %v520_v18  ;;  %v581_v18 = vld [vmem:[%s1201_s4] sm:$0xff] }
 0x197   :  { %v511_v20 = vpop.xlane.xlu1 %510 }
 0x198   :  { %v525_v22 = vsub.f32 %v1090_v42, %v1122_v19  ;;  %v535_v23 = vsub.f32 %v1092_v44, %v1122_v19  ;;  %v513_v24 = vadd.f32 %v511_v20, %v505_v21  ;;  %v547_v27 = vsub.f32 %v1106_v59, %v1122_v19 }
 0x199   :  { %v559_v39 = vsub.f32 %v1108_v62, %v1122_v19 }
 0x19a   :  { %v527_v25 = vmul.f32 %v525_v22, %v525_v22  ;;  %v537_v30 = vmul.f32 %v535_v23, %v535_v23  ;;  %v549_v32 = vmul.f32 %v547_v27, %v547_v27  ;;  %v582_v23 = vld [vmem:[%s1201_s4 + $0x8] sm:$0xff] }
 0x19b   :  { %v519_v26 = vpop.xlane.xlu1 %518  ;;  %v561_v49 = vmul.f32 %v559_v39, %v559_v39 }
 0x19c   :  { %v521_v28 = vadd.f32 %v519_v26, %v513_v24  ;;  %v529_v29 = vsel %vm491_vm1, %v527_v25, 0.0  ;;  %v539_v33 = vsel %vm491_vm1, %v537_v30, 0.0  ;;  %v551_v38 = vsel %vm491_vm1, %v549_v32, 0.0 }
 0x19d   :  { %530 = vadd.xlane.f32.xlu1 %v529_v29  ;;  %v563_v51 = vsel %vm491_vm1, %v561_v49, 0.0 }
 0x19e   :  { %v524_v31 = vmul.f32 0.03125, %v521_v28 }
 0x1a0   :  { %v536_v34 = vsub.f32 %v1100_v54, %v524_v31  ;;  %v548_v35 = vsub.f32 %v1112_v4, %v524_v31  ;;  %v526_v36 = vsub.f32 %v1098_v52, %v524_v31  ;;  %v560_v45 = vsub.f32 %v1116_v7, %v524_v31 }
 0x1a1   :  { %540 = vadd.xlane.f32.xlu1 %v539_v33 }
 0x1a2   :  { %v538_v37 = vmul.f32 %v536_v34, %v536_v34  ;;  %v550_v41 = vmul.f32 %v548_v35, %v548_v35  ;;  %v528_v43 = vmul.f32 %v526_v36, %v526_v36  ;;  %v562_v48 = vmul.f32 %v560_v45, %v560_v45 }
 0x1a4   :  { %v542_v40 = vsel %vm491_vm1, %v538_v37, 0.0  ;;  %v554_v46 = vsel %vm491_vm1, %v550_v41, 0.0  ;;  %v532_v47 = vsel %vm491_vm1, %v528_v43, 0.0  ;;  %v566_v50 = vsel %vm491_vm1, %v562_v48, 0.0 }
 0x1a5   :  { %552 = vadd.xlane.f32.xlu1 %v551_v38  ;;  %543 = vadd.xlane.f32.xlu0 %v542_v40 }
 0x1a9   :  { %555 = vadd.xlane.f32.xlu0 %v554_v46  ;;  %533 = vadd.xlane.f32.xlu1 %v532_v47 }
 0x1ad   :  { %567 = vadd.xlane.f32.xlu0 %v566_v50  ;;  %564 = vadd.xlane.f32.xlu1 %v563_v51 }
 0x226   :  { %v531_v53 = vpop.xlane.xlu1 %530 }
 0x22a   :  { %v541_v55 = vpop.xlane.xlu1 %540 }
 0x22b   :  { %v545_v61 = vadd.f32 %v541_v55, %v531_v53 }
 0x22e   :  { %v544_v56 = vpop.xlane.xlu0 %543  ;;  %v553_v57 = vpop.xlane.xlu1 %552 }
 0x22f   :  { %v557_v0 = vadd.f32 %v553_v57, %v545_v61 }
 0x232   :  { %v556_v58 = vpop.xlane.xlu0 %555  ;;  %v534_v60 = vpop.xlane.xlu1 %533 }
 0x233   :  { %v546_v63 = vadd.f32 %v544_v56, %v534_v60 }
 0x235   :  { %v558_v1 = vadd.f32 %v556_v58, %v546_v63 }
 0x236   :  { %v568_v2 = vpop.xlane.xlu0 %567  ;;  %v565_v3 = vpop.xlane.xlu1 %564 }
 0x237   :  { %v570_v5 = vadd.f32 %v568_v2, %v558_v1  ;;  %v569_v6 = vadd.f32 %v565_v3, %v557_v0 }
 0x239   :  { %v572_v8 = vmul.f32 0.03125, %v570_v5  ;;  %v571_v9 = vmul.f32 0.03125, %v569_v6 }
 0x23b   :  { %v576_v10 = vadd.f32 1e-05, %v572_v8  ;;  %v575_v11 = vadd.f32 1e-05, %v571_v9 }
 0x23d   :  { %899 = vrsqrt.f32 %v576_v10 }
 0x23e   :  { %901 = vrsqrt.f32 %v575_v11 }
 0x24a   :  { %v900_v14 = vpop.eup %899 }
 0x24b   :  { %v902_v15 = vpop.eup %901  ;;  %v580_v16 = vmul.f32 %v900_v14, %v574_v12 }
 0x24c   :  { %v579_v17 = vmul.f32 %v902_v15, %v573_v13 }
 0x24d   :  { %594 = vperm.xlu0 %861, %v580_v16   ;;  %v584_v22 = vmul.f32 %v580_v16, %v524_v31 }
 0x24e   :  { %589 = vperm.xlu1 %862, %v579_v17   ;;  %v583_v20 = vmul.f32 %v579_v17, %v1122_v19 }
 0x24f   :  { %v586_v24 = vsub.f32 %v582_v23, %v584_v22 }
 0x250   :  { %v585_v21 = vsub.f32 %v581_v18, %v583_v20 }
 0x252   :  { %601 = vperm.xlu1 %862, %v585_v21  }
 0x256   :  { %606 = vperm.xlu1 %862, %v586_v24  }
 0x2c8   :  { %v595_v26 = vpop.permute.xlu0 %594 }
 0x2c9   :  { %v590_v25 = vpop.permute.xlu1 %589  ;;  %v598_v35 = vmul.f32 %v595_v26, %v1098_v52  ;;  %v612_v36 = vmul.f32 %v595_v26, %v1100_v54  ;;  %v616_v37 = vmul.f32 %v595_v26, %v1112_v4  ;;  %v620_v38 = vmul.f32 %v595_v26, %v1116_v7 }
 0x2ca   :  { %v597_v27 = vmul.f32 %v590_v25, %v1090_v42  ;;  %v611_v28 = vmul.f32 %v590_v25, %v1092_v44  ;;  %v615_v29 = vmul.f32 %v590_v25, %v1106_v59  ;;  %v619_v30 = vmul.f32 %v590_v25, %v1108_v62 }
 0x2cd   :  { %v602_v19 = vpop.permute.xlu1 %601 }
 0x2ce   :  { %v609_v32 = vadd.f32 %v602_v19, %v597_v27  ;;  %v613_v31 = vadd.f32 %v611_v28, %v602_v19  ;;  %v617_v33 = vadd.f32 %v615_v29, %v602_v19  ;;  %v621_v34 = vadd.f32 %v619_v30, %v602_v19 }
 0x2d0   :  { %v623_v42 = vmax.f32 %v609_v32, 0.0  ;;  %v627_v39 = vmax.f32 %v613_v31, 0.0  ;;  %v632_v44 = vmax.f32 %v617_v33, 0.0  ;;  %v637_v40 = vmax.f32 %v621_v34, 0.0 }
 0x2d1   :  { %v607_v59 = vpop.permute.xlu1 %606 }
 0x2d2   :  { %625 = vst.msk [vmem:[%s1202_s5] sm:$0xff] %vm491_vm1, %v623_v42  ;;  %736 = vst.msk [vmem:[%s1202_s5 + $0x10] sm:$0xff] %vm491_vm1, %v627_v39  ;;  %v610_v52 = vadd.f32 %v607_v59, %v598_v35  ;;  %v614_v54 = vadd.f32 %v612_v36, %v607_v59  ;;  %v618_v62 = vadd.f32 %v616_v37, %v607_v59 }
 0x2d3   :  { %738 = vst.msk [vmem:[%s1202_s5 + $0x20] sm:$0xff] %vm491_vm1, %v632_v44  ;;  %740 = vst.msk [vmem:[%s1202_s5 + $0x30] sm:$0xff] %vm491_vm1, %v637_v40  ;;  %v622_v4 = vadd.f32 %v620_v38, %v607_v59 }
 0x2d4   :  { %v624_v7 = vmax.f32 %v610_v52, 0.0  ;;  %v628_v41 = vmax.f32 %v614_v54, 0.0  ;;  %v633_v43 = vmax.f32 %v618_v62, 0.0 }
 0x2d5   :  { %v638_v45 = vmax.f32 %v622_v4, 0.0 }
 0x2d6   :  { %626 = vst.msk [vmem:[%s1202_s5 + $0x8] sm:$0xff] %vm491_vm1, %v624_v7  ;;  %737 = vst.msk [vmem:[%s1202_s5 + $0x18] sm:$0xff] %vm491_vm1, %v628_v41 }
 0x2d7   :  { %739 = vst.msk [vmem:[%s1202_s5 + $0x28] sm:$0xff] %vm491_vm1, %v633_v43  ;;  %741 = vst.msk [vmem:[%s1202_s5 + $0x38] sm:$0xff] %vm491_vm1, %v638_v45 }

// kernel: autoencoder_forward.14
= control target key start
LH: loop header
LB: loop body
LE: loop exit
PB: predicated region body
PF: predicated region fallthrough
CT: control target
= control target key end

     0   :  { %v561_v0 = vmov 0.0   ;;  %vm562_vm0 = vmmov 0   ;;  %v563_v4 = vmov 0   ;;  %vm60_vm1 = vcmask 523264   ;;  %s705_s1 = inlined_call_operand.vmem [shape: bf16[4,64,32], index: 1, kind: input, shape index: {}]   ;;  %s706_s0 = inlined_call_operand.vmem [shape: bf16[4,8,64], index: 0, kind: input, shape index: {}]   ;;  %s707_s2 = inlined_call_operand.vmem [shape: f32[8,1], index: 2, kind: input, shape index: {}]   ;;  %s708_s3 = inlined_call_operand.vmem [shape: f32[8,1], index: 3, kind: input, shape index: {}]   ;;  %s709_s4 = inlined_call_operand.vmem [shape: f32[8,1], index: 4, kind: input, shape index: {}]   ;;  %s710_s5 = inlined_call_operand.vmem [shape: f32[4,8,32], index: 5, kind: output, shape index: {}]  }
   0x1   :  { %490 = vmatprep.subr.bf16.mxu0 %v561_v0  ;;  %502 = vmatprep.subr.bf16.mxu1 %v561_v0  ;;  %v543_v1 = vld [vmem:[%s705_s1 + $0x18] sm:$0xff]   ;;  %v545_v3 = vld [vmem:[%s705_s1 + $0x10] sm:$0xff]   ;;  %v547_v6 = vld [vmem:[%s705_s1 + $0x8] sm:$0xff]   ;;  %vm338_vm2 = vcmask 261120  }
   0x2   :  { %v544_v2 = vld [vmem:[%s705_s1 + $0x38] sm:$0xff]   ;;  %498 = vmatprep.mubr.msk.bf16.mxu0 %vm562_vm0, %v561_v0  ;;  %510 = vmatprep.mubr.msk.bf16.mxu1 %vm562_vm0, %v561_v0  ;;  %v546_v5 = vld [vmem:[%s705_s1 + $0x30] sm:$0xff]   ;;  %v548_v7 = vld [vmem:[%s705_s1 + $0x28] sm:$0xff]  }
   0x3   :  { %491 = vmatpush3.bf16.msra.mxu0 %v543_v1  ;;  %541 = vset.pattern.permute.xlu0 %v563_v4  ;;  %v549_v8 = vld [vmem:[%s705_s1] sm:$0xff]   ;;  %v551_v12 = vld [vmem:[%s705_s1 + $0x58] sm:$0xff]   ;;  %v553_v14 = vld [vmem:[%s705_s1 + $0x50] sm:$0xff]  }
   0x4   :  { %503 = vmatpush3.bf16.msra.mxu1 %v544_v2  ;;  %492 = vmatprep.subr.bf16.mxu0 %v561_v0  ;;  %v550_v9 = vld [vmem:[%s705_s1 + $0x20] sm:$0xff]   ;;  %v552_v13 = vld [vmem:[%s705_s1 + $0x78] sm:$0xff]   ;;  %v554_v16 = vld [vmem:[%s705_s1 + $0x70] sm:$0xff]  }
   0x5   :  { %504 = vmatprep.subr.bf16.mxu1 %v561_v0  ;;  %542 = vset.pattern.permute.xlu1 %v563_v4  ;;  %v21_v10 = vld [vmem:[%s706_s0] sm:$0xf]  ;;  %v425_v11 = vld [vmem:[%s706_s0 + $0x4] sm:$0xf]  ;;  %v555_v17 = vld [vmem:[%s705_s1 + $0x48] sm:$0xff]  }
   0x6   :  { %v30_v15 = vld [vmem:[%s707_s2] sm:$0xff]  ;;  %v556_v18 = vld [vmem:[%s705_s1 + $0x68] sm:$0xff]  }
   0x7   :  { %493 = vmatpush3.bf16.msra.mxu0 %v545_v3  ;;  %33 = vperm.xlu0 %541, %v30_v15   ;;  %v557_v19 = vld [vmem:[%s705_s1 + $0x40] sm:$0xff]   ;;  %v439_v21 = vld [vmem:[%s706_s0 + $0x8] sm:$0xf]  ;;  %v453_v22 = vld [vmem:[%s706_s0 + $0xc] sm:$0xf] }
   0x8   :  { %505 = vmatpush3.bf16.msra.mxu1 %v546_v5  ;;  %494 = vmatprep.subr.bf16.mxu0 %v561_v0  ;;  %v558_v20 = vld [vmem:[%s705_s1 + $0x60] sm:$0xff]  }
   0x9   :  { %506 = vmatprep.subr.bf16.mxu1 %v561_v0 }
   0xb   :  { %495 = vmatpush3.bf16.msra.mxu0 %v547_v6 }
   0xc   :  { %507 = vmatpush3.bf16.msra.mxu1 %v548_v7  ;;  %496 = vmatprep.subr.bf16.mxu0 %v561_v0 }
   0xd   :  { %508 = vmatprep.subr.bf16.mxu1 %v561_v0 }
   0xf   :  { %497 = vmatpush3.bf16.msra.mxu0 %v549_v8 }
  0x10   :  { %509 = vmatpush3.bf16.msra.mxu1 %v550_v9  ;;  %514 = vmatprep.subr.bf16.mxu0 %v561_v0 }
  0x11   :  { %526 = vmatprep.subr.bf16.mxu1 %v561_v0 }
  0x12   :  { %499 = vmatmul.mubr.msk.bf16.vlgmr.msra.gmra.mxu0 %vm60_vm1, %v21_v10 }
  0x13   :  { %511 = vmatmul.mubr.msk.bf16.vlgmr.msra.gmra.mxu1 %vm60_vm1, %v425_v11  ;;  %515 = vmatpush3.bf16.msra.mxu0 %v551_v12 }
  0x14   :  { %527 = vmatpush3.bf16.msra.mxu1 %v552_v13  ;;  %516 = vmatprep.subr.bf16.mxu0 %v561_v0  ;;  %v380_v13 = vld [vmem:[%s708_s3] sm:$0xff] }
  0x15   :  { %528 = vmatprep.subr.bf16.mxu1 %v561_v0  ;;  %522 = vmatprep.mubr.msk.bf16.mxu0 %vm562_vm0, %v561_v0 }
  0x16   :  { %534 = vmatprep.mubr.msk.bf16.mxu1 %vm562_vm0, %v561_v0 }
  0x17   :  { %517 = vmatpush3.bf16.msra.mxu0 %v553_v14 }
  0x18   :  { %529 = vmatpush3.bf16.msra.mxu1 %v554_v16  ;;  %518 = vmatprep.subr.bf16.mxu0 %v561_v0  ;;  %v384_v16 = vld [vmem:[%s709_s4] sm:$0xff] }
  0x19   :  { %530 = vmatprep.subr.bf16.mxu1 %v561_v0 }
  0x1b   :  { %519 = vmatpush3.bf16.msra.mxu0 %v555_v17 }
  0x1c   :  { %531 = vmatpush3.bf16.msra.mxu1 %v556_v18  ;;  %520 = vmatprep.subr.bf16.mxu0 %v561_v0 }
  0x1d   :  { %532 = vmatprep.subr.bf16.mxu1 %v561_v0 }
  0x1f   :  { %521 = vmatpush3.bf16.msra.mxu0 %v557_v19 }
  0x20   :  { %533 = vmatpush3.bf16.msra.mxu1 %v558_v20 }
  0x22   :  { %523 = vmatmul.mubr.msk.bf16.vlgmr.msra.gmra.mxu0 %vm60_vm1, %v439_v21 }
  0x23   :  { %535 = vmatmul.mubr.msk.bf16.vlgmr.msra.gmra.mxu1 %vm60_vm1, %v453_v22 }
  0x82   :  { %v34_v23 = vpop.permute.xlu0 %33 }
  0xd2   :  { %v98_v24 = vpop.f32.mrf.mxu0 }
  0xd3   :  { %v176_v25 = vpop.f32.mrf.mxu1  ;;  %v665_v26 = vadd.f32 %v98_v24, %v34_v23 }
  0xd4   :  { %v500_v27 = vpop.f32.mrf.mxu0  ;;  %v667_v28 = vadd.f32 %v176_v25, %v34_v23 }
  0xd5   :  { %v512_v29 = vpop.f32.mrf.mxu1  ;;  %v339_v30 = vsel %vm338_vm2, %v665_v26, 0.0 }
  0xd6   :  { %v101_v31 = vpop.f32.mrf.mxu0  ;;  %v342_v32 = vsel %vm338_vm2, %v667_v28, 0.0  ;;  %340 = vadd.xlane.f32.xlu0 %v339_v30 }
  0xd7   :  { %v179_v33 = vpop.f32.mrf.mxu1  ;;  %343 = vadd.xlane.f32.xlu1 %v342_v32 }
  0xd8   :  { %v501_v34 = vpop.f32.mrf.mxu0 }
  0xd9   :  { %v513_v35 = vpop.f32.mrf.mxu1 }
  0xe2   :  { %v254_v36 = vpop.f32.mrf.mxu0 }
  0xe3   :  { %v255_v37 = vadd.f32 %v254_v36, %v34_v23  ;;  %v332_v38 = vpop.f32.mrf.mxu1 }
  0xe4   :  { %v524_v39 = vpop.f32.mrf.mxu0  ;;  %v333_v40 = vadd.f32 %v332_v38, %v34_v23 }
  0xe5   :  { %v536_v41 = vpop.f32.mrf.mxu1  ;;  %v346_v42 = vsel %vm338_vm2, %v255_v37, 0.0 }
  0xe6   :  { %347 = vadd.xlane.f32.xlu1 %v346_v42  ;;  %v257_v43 = vpop.f32.mrf.mxu0  ;;  %v350_v47 = vsel %vm338_vm2, %v333_v40, 0.0 }
  0xe7   :  { %v335_v44 = vpop.f32.mrf.mxu1 }
  0xe8   :  { %v525_v45 = vpop.f32.mrf.mxu0 }
  0xe9   :  { %v537_v46 = vpop.f32.mrf.mxu1 }
  0xea   :  { %351 = vadd.xlane.f32.xlu1 %v350_v47 }
 0x15f   :  { %v341_v49 = vpop.xlane.xlu0 %340 }
 0x160   :  { %v344_v48 = vpop.xlane.xlu1 %343 }
 0x161   :  { %v345_v51 = vadd.f32 %v344_v48, %v341_v49 }
 0x16f   :  { %v348_v50 = vpop.xlane.xlu1 %347 }
 0x170   :  { %v349_v52 = vadd.f32 %v348_v50, %v345_v51 }
 0x173   :  { %v352_v53 = vpop.xlane.xlu1 %351 }
 0x174   :  { %v353_v54 = vadd.f32 %v352_v53, %v349_v52 }
 0x176   :  { %v355_v55 = vmul.f32 0.0078125, %v353_v54 }
 0x178   :  { %v356_v56 = vsub.f32 %v665_v26, %v355_v55  ;;  %v361_v57 = vsub.f32 %v667_v28, %v355_v55  ;;  %v367_v61 = vsub.f32 %v255_v37, %v355_v55  ;;  %v373_v0 = vsub.f32 %v333_v40, %v355_v55 }
 0x17a   :  { %v357_v58 = vmul.f32 %v356_v56, %v356_v56  ;;  %v362_v60 = vmul.f32 %v361_v57, %v361_v57  ;;  %v368_v63 = vmul.f32 %v367_v61, %v367_v61  ;;  %v374_v2 = vmul.f32 %v373_v0, %v373_v0 }
 0x17c   :  { %v358_v59 = vsel %vm338_vm2, %v357_v58, 0.0  ;;  %v363_v62 = vsel %vm338_vm2, %v362_v60, 0.0  ;;  %v369_v1 = vsel %vm338_vm2, %v368_v63, 0.0  ;;  %v375_v3 = vsel %vm338_vm2, %v374_v2, 0.0 }
 0x17d   :  { %359 = vadd.xlane.f32.xlu1 %v358_v59 }
 0x181   :  { %364 = vadd.xlane.f32.xlu1 %v363_v62 }
 0x185   :  { %370 = vadd.xlane.f32.xlu1 %v369_v1 }
 0x189   :  { %376 = vadd.xlane.f32.xlu1 %v375_v3 }
 0x206   :  { %v360_v4 = vpop.xlane.xlu1 %359 }
 0x20a   :  { %v365_v5 = vpop.xlane.xlu1 %364 }
 0x20b   :  { %v366_v7 = vadd.f32 %v365_v5, %v360_v4 }
 0x20e   :  { %v371_v6 = vpop.xlane.xlu1 %370 }
 0x20f   :  { %v372_v8 = vadd.f32 %v371_v6, %v366_v7 }
 0x212   :  { %v377_v9 = vpop.xlane.xlu1 %376 }
 0x213   :  { %v378_v10 = vadd.f32 %v377_v9, %v372_v8 }
 0x215   :  { %v379_v11 = vmul.f32 0.0078125, %v378_v10 }
 0x217   :  { %v381_v12 = vadd.f32 1e-05, %v379_v11 }
 0x219   :  { %559 = vrsqrt.f32 %v381_v12 }
 0x226   :  { %v560_v14 = vpop.eup %559 }
 0x227   :  { %v383_v15 = vmul.f32 %v560_v14, %v380_v13 }
 0x229   :  { %389 = vperm.xlu1 %542, %v383_v15   ;;  %v385_v17 = vmul.f32 %v383_v15, %v355_v55 }
 0x22b   :  { %v386_v18 = vsub.f32 %v384_v16, %v385_v17 }
 0x22d   :  { %395 = vperm.xlu0 %541, %v386_v18  }
 0x2a4   :  { %v390_v19 = vpop.permute.xlu1 %389 }
 0x2a5   :  { %v392_v20 = vmul.f32 %v390_v19, %v665_v26  ;;  %v399_v21 = vmul.f32 %v390_v19, %v667_v28  ;;  %v401_v22 = vmul.f32 %v390_v19, %v255_v37  ;;  %v403_v23 = vmul.f32 %v390_v19, %v333_v40 }
 0x2a8   :  { %v396_v24 = vpop.permute.xlu0 %395 }
 0x2a9   :  { %v398_v25 = vadd.f32 %v396_v24, %v392_v20  ;;  %v400_v27 = vadd.f32 %v399_v21, %v396_v24  ;;  %v402_v29 = vadd.f32 %v401_v22, %v396_v24  ;;  %v404_v30 = vadd.f32 %v403_v23, %v396_v24 }
 0x2ab   :  { %v405_v31 = vmax.f32 %v398_v25, 0.0  ;;  %v407_v32 = vmax.f32 %v400_v27, 0.0  ;;  %v410_v33 = vmax.f32 %v402_v29, 0.0  ;;  %v413_v34 = vmax.f32 %v404_v30, 0.0 }
 0x2ad   :  { %406 = vst.msk [vmem:[%s710_s5] sm:$0xff] %vm338_vm2, %v405_v31  ;;  %467 = vst.msk [vmem:[%s710_s5 + $0x8] sm:$0xff] %vm338_vm2, %v407_v32 }
 0x2ae   :  { %468 = vst.msk [vmem:[%s710_s5 + $0x10] sm:$0xff] %vm338_vm2, %v410_v33  ;;  %469 = vst.msk [vmem:[%s710_s5 + $0x18] sm:$0xff] %vm338_vm2, %v413_v34 }

// kernel: autoencoder_forward.15
= control target key start
LH: loop header
LB: loop body
LE: loop exit
PB: predicated region body
PF: predicated region fallthrough
CT: control target
= control target key end

     0   :  { %v536_v0 = vmov 0.0   ;;  %vm537_vm0 = vmmov 0   ;;  %v538_v5 = vmov 0   ;;  %vm46_vm1 = vcmask 261120   ;;  %s634_s1 = inlined_call_operand.vmem [shape: bf16[4,32,128], index: 1, kind: input, shape index: {}]   ;;  %s635_s4 = inlined_call_operand.<no memory space> [shape: f32[1,1], index: 4, kind: input, shape index: {}]   ;;  %s636_s0 = inlined_call_operand.vmem [shape: bf16[4,8,32], index: 0, kind: input, shape index: {}]   ;;  %s637_s2 = inlined_call_operand.vmem [shape: f32[8,1], index: 2, kind: input, shape index: {}]   ;;  %s638_s3 = inlined_call_operand.vmem [shape: f32[8,1], index: 3, kind: input, shape index: {}]   ;;  %s639_s5 = inlined_call_operand.vmem [shape: f32[4,1,128], index: 5, kind: output, shape index: {}]  }
   0x1   :  { %475 = vmatprep.subr.bf16.mxu0 %v536_v0  ;;  %483 = vmatprep.subr.bf16.mxu1 %v536_v0  ;;  %v512_v1 = vld [vmem:[%s634_s1 + $0x8] sm:$0xff]   ;;  %v10_v2 = vstv %s635_s4  ;;  %v513_v3 = vld [vmem:[%s634_s1 + $0x18] sm:$0xff]   ;;  %v514_v4 = vld [vmem:[%s634_s1] sm:$0xff]   ;;  %v110_v36 = vlaneseq }
   0x2   :  { %479 = vmatprep.mubr.msk.bf16.mxu0 %vm537_vm0, %v536_v0  ;;  %487 = vmatprep.mubr.msk.bf16.mxu1 %vm537_vm0, %v536_v0  ;;  %11 = vst [vmem:[#allocation2] sm:$0x1] %v10_v2  ;;  %v515_v6 = vld [vmem:[%s634_s1 + $0x10] sm:$0xff]   ;;  %v23_v7 = vld [vmem:[%s636_s0] sm:$0xf]  ;;  %v516_v9 = vld [vmem:[%s634_s1 + $0x28] sm:$0xff]  }
   0x3   :  { %476 = vmatpush3.bf16.msra.mxu0 %v512_v1  ;;  %511 = vset.pattern.permute.xlu1 %v538_v5  ;;  %v433_v8 = vld [vmem:[%s636_s0 + $0x4] sm:$0xf]  ;;  %v517_v10 = vld [vmem:[%s634_s1 + $0x38] sm:$0xff]   ;;  %v519_v13 = vld [vmem:[%s634_s1 + $0x30] sm:$0xff]   ;;  %v111_v45 = vshrl.u32 %v110_v36, 7 }
   0x4   :  { %484 = vmatpush3.bf16.msra.mxu1 %v513_v3  ;;  %477 = vmatprep.subr.bf16.mxu0 %v536_v0  ;;  %v518_v11 = vld [vmem:[%s634_s1 + $0x20] sm:$0xff]   ;;  %v443_v14 = vld [vmem:[%s636_s0 + $0x8] sm:$0xf]  ;;  %v453_v15 = vld [vmem:[%s636_s0 + $0xc] sm:$0xf] }
   0x5   :  { %485 = vmatprep.subr.bf16.mxu1 %v536_v0  ;;  %510 = vset.pattern.permute.xlu0 %v538_v5  ;;  %v230_v12 = vld [vmem:[%s637_s2] sm:$0xff]  ;;  %v112_v60 = vsub.s32 0, %v111_v45 }
   0x6   :  { %233 = vperm.xlu1 %511, %v230_v12   ;;  %31 = vperm.xlu0 %510, %v230_v12   ;;  %v191_v16 = vld [vmem:[%s638_s3] sm:$0xff] }
   0x7   :  { %478 = vmatpush3.bf16.msra.mxu0 %v514_v4 }
   0x8   :  { %486 = vmatpush3.bf16.msra.mxu1 %v515_v6  ;;  %491 = vmatprep.subr.bf16.mxu0 %v536_v0 }
   0x9   :  { %499 = vmatprep.subr.bf16.mxu1 %v536_v0  ;;  %v204_v17 = vld [vmem:[#allocation2] sm:$0x1] }
   0xa   :  { %480 = vmatmul.mubr.msk.bf16.vlgmr.msra.gmra.mxu0 %vm46_vm1, %v23_v7  ;;  %334 = vperm.xlu1 %511, %v230_v12   ;;  %v104_v18 = vld [vmem:[#allocation2] sm:$0x1] }
   0xb   :  { %488 = vmatmul.mubr.msk.bf16.vlgmr.msra.gmra.mxu1 %vm46_vm1, %v433_v8  ;;  %492 = vmatpush3.bf16.msra.mxu0 %v516_v9  ;;  %v406_v19 = vld [vmem:[#allocation2] sm:$0x1] }
   0xc   :  { %500 = vmatpush3.bf16.msra.mxu1 %v517_v10  ;;  %493 = vmatprep.subr.bf16.mxu0 %v536_v0  ;;  %v305_v20 = vld [vmem:[#allocation2] sm:$0x1] }
   0xd   :  { %501 = vmatprep.subr.bf16.mxu1 %v536_v0  ;;  %495 = vmatprep.mubr.msk.bf16.mxu0 %vm537_vm0, %v536_v0 }
   0xe   :  { %503 = vmatprep.mubr.msk.bf16.mxu1 %vm537_vm0, %v536_v0  ;;  %132 = vperm.xlu0 %510, %v230_v12  }
   0xf   :  { %494 = vmatpush3.bf16.msra.mxu0 %v518_v11  ;;  %194 = vperm.xlu1 %511, %v191_v16  }
  0x10   :  { %502 = vmatpush3.bf16.msra.mxu1 %v519_v13 }
  0x12   :  { %496 = vmatmul.mubr.msk.bf16.vlgmr.msra.gmra.mxu0 %vm46_vm1, %v443_v14  ;;  %94 = vperm.xlu0 %510, %v191_v16  }
  0x13   :  { %504 = vmatmul.mubr.msk.bf16.vlgmr.msra.gmra.mxu1 %vm46_vm1, %v453_v15  ;;  %396 = vperm.xlu1 %511, %v191_v16  }
  0x16   :  { %295 = vperm.xlu0 %510, %v191_v16  }
  0x17   :  { %207 = vperm.xlu1 %511, %v204_v17  }
  0x1a   :  { %107 = vperm.xlu0 %510, %v104_v18  }
  0x1b   :  { %409 = vperm.xlu1 %511, %v406_v19  }
  0x1e   :  { %308 = vperm.xlu0 %510, %v305_v20  }
  0x81   :  { %v32_v21 = vpop.permute.xlu0 %31  ;;  %v234_v22 = vpop.permute.xlu1 %233 }
  0x85   :  { %v335_v24 = vpop.permute.xlu1 %334 }
  0x89   :  { %v133_v23 = vpop.permute.xlu0 %132 }
  0x8a   :  { %v195_v35 = vpop.permute.xlu1 %194 }
  0x8d   :  { %v95_v32 = vpop.permute.xlu0 %94 }
  0x8e   :  { %v397_v53 = vpop.permute.xlu1 %396 }
  0x91   :  { %v296_v49 = vpop.permute.xlu0 %295 }
  0x92   :  { %v208_v9 = vpop.permute.xlu1 %207 }
  0x93   :  { %v213_v13 = vrot.slane %v208_v9, %v112_v60 }
  0x95   :  { %v108_v6 = vpop.permute.xlu0 %107 }
  0x96   :  { %v113_v10 = vrot.slane %v108_v6, %v112_v60 }
  0xca   :  { %v84_v25 = vpop.f32.mrf.mxu0 }
  0xcb   :  { %v85_v26 = vadd.f32 %v84_v25, %v32_v21  ;;  %v184_v27 = vpop.f32.mrf.mxu1  ;;  %v410_v25 = vpop.permute.xlu1 %409 }
  0xcc   :  { %v185_v28 = vadd.f32 %v184_v27, %v133_v23  ;;  %v481_v29 = vpop.f32.mrf.mxu0  ;;  %v309_v23 = vpop.permute.xlu0 %308 }
  0xcd   :  { %v90_v30 = vmax.f32 %v85_v26, 0.0  ;;  %v489_v31 = vpop.f32.mrf.mxu1 }
  0xce   :  { %v190_v33 = vmax.f32 %v185_v28, 0.0  ;;  %v87_v34 = vpop.f32.mrf.mxu0  ;;  %v314_v28 = vrot.slane %v309_v23, %v112_v60 }
  0xcf   :  { %v97_v37 = vmul.f32 %v95_v32, %v90_v30  ;;  %v187_v38 = vpop.f32.mrf.mxu1  ;;  %v415_v30 = vrot.slane %v410_v25, %v112_v60 }
  0xd0   :  { %v197_v39 = vmul.f32 %v195_v35, %v190_v33  ;;  %v482_v40 = vpop.f32.mrf.mxu0 }
  0xd1   :  { %v98_v41 = vrot.slane %v97_v37, 4  ;;  %v490_v42 = vpop.f32.mrf.mxu1 }
  0xd2   :  { %v198_v43 = vrot.slane %v197_v39, 4  ;;  %v285_v44 = vpop.f32.mrf.mxu0 }
  0xd3   :  { %v99_v46 = vadd.f32 %v98_v41, %v97_v37  ;;  %v286_v47 = vadd.f32 %v285_v44, %v234_v22  ;;  %v386_v48 = vpop.f32.mrf.mxu1 }
  0xd4   :  { %v199_v50 = vadd.f32 %v198_v43, %v197_v39  ;;  %v387_v51 = vadd.f32 %v386_v48, %v335_v24  ;;  %v497_v52 = vpop.f32.mrf.mxu0 }
  0xd5   :  { %v100_v54 = vrot.slane %v99_v46, 2  ;;  %v291_v55 = vmax.f32 %v286_v47, 0.0  ;;  %v505_v56 = vpop.f32.mrf.mxu1 }
  0xd6   :  { %v200_v57 = vrot.slane %v199_v50, 2  ;;  %v392_v58 = vmax.f32 %v387_v51, 0.0  ;;  %v288_v59 = vpop.f32.mrf.mxu0 }
  0xd7   :  { %v101_v61 = vadd.f32 %v100_v54, %v99_v46  ;;  %v298_v62 = vmul.f32 %v296_v49, %v291_v55  ;;  %v389_v63 = vpop.f32.mrf.mxu1 }
  0xd8   :  { %v201_v0 = vadd.f32 %v200_v57, %v199_v50  ;;  %v399_v1 = vmul.f32 %v397_v53, %v392_v58  ;;  %v498_v2 = vpop.f32.mrf.mxu0 }
  0xd9   :  { %v102_v3 = vrot.slane %v101_v61, 1  ;;  %v299_v4 = vrot.slane %v298_v62, 4  ;;  %v506_v5 = vpop.f32.mrf.mxu1 }
  0xda   :  { %v202_v7 = vrot.slane %v201_v0, 1  ;;  %v400_v8 = vrot.slane %v399_v1, 4 }
  0xdb   :  { %v103_v11 = vadd.f32 %v102_v3, %v101_v61  ;;  %v300_v12 = vadd.f32 %v299_v4, %v298_v62 }
  0xdc   :  { %v203_v14 = vadd.f32 %v202_v7, %v201_v0  ;;  %v401_v15 = vadd.f32 %v400_v8, %v399_v1 }
  0xdd   :  { %v114_v16 = vadd.f32 %v113_v10, %v103_v11  ;;  %v301_v17 = vrot.slane %v300_v12, 2 }
  0xde   :  { %v214_v18 = vadd.f32 %v213_v13, %v203_v14  ;;  %v402_v19 = vrot.slane %v401_v15, 2 }
  0xdf   :  { %v432_v20 = vmul.f32 -1.442695, %v114_v16  ;;  %v302_v21 = vadd.f32 %v301_v17, %v300_v12 }
  0xe0   :  { %v441_v22 = vmul.f32 -1.442695, %v214_v18  ;;  %v403_v24 = vadd.f32 %v402_v19, %v401_v15 }
  0xe1   :  { %520 = vpow2.f32 %v432_v20  ;;  %v303_v26 = vrot.slane %v302_v21, 1 }
  0xe2   :  { %522 = vpow2.f32 %v441_v22  ;;  %v404_v27 = vrot.slane %v403_v24, 1 }
  0xe3   :  { %v304_v29 = vadd.f32 %v303_v26, %v302_v21 }
  0xe4   :  { %v405_v31 = vadd.f32 %v404_v27, %v403_v24 }
  0xe5   :  { %v315_v32 = vadd.f32 %v314_v28, %v304_v29 }
  0xe6   :  { %v416_v33 = vadd.f32 %v415_v30, %v405_v31 }
  0xe7   :  { %v451_v34 = vmul.f32 -1.442695, %v315_v32 }
  0xe8   :  { %v461_v35 = vmul.f32 -1.442695, %v416_v33 }
  0xe9   :  { %524 = vpow2.f32 %v451_v34 }
  0xea   :  { %526 = vpow2.f32 %v461_v35 }
  0xee   :  { %v521_v36 = vpop.eup %520 }
  0xef   :  { %v523_v37 = vpop.eup %522  ;;  %v118_v38 = vadd.f32 1.0, %v521_v36 }
  0xf0   :  { %v218_v39 = vadd.f32 1.0, %v523_v37 }
  0xf1   :  { %528 = vrcp.f32 %v118_v38 }
  0xf2   :  { %530 = vrcp.f32 %v218_v39 }
  0xf6   :  { %v525_v40 = vpop.eup %524 }
  0xf7   :  { %v527_v41 = vpop.eup %526  ;;  %v319_v42 = vadd.f32 1.0, %v525_v40 }
  0xf8   :  { %v420_v43 = vadd.f32 1.0, %v527_v41 }
  0xf9   :  { %532 = vrcp.f32 %v319_v42 }
  0xfa   :  { %534 = vrcp.f32 %v420_v43 }
  0xfe   :  { %v529_v44 = vpop.eup %528 }
  0xff   :  { %v531_v45 = vpop.eup %530  ;;  %121 = vst [vmem:[%s639_s5] sm:$0x1] %v529_v44 }
 0x100   :  { %442 = vst [vmem:[%s639_s5 + $0x1] sm:$0x1] %v531_v45 }
 0x106   :  { %v533_v46 = vpop.eup %532 }
 0x107   :  { %v535_v47 = vpop.eup %534  ;;  %452 = vst [vmem:[%s639_s5 + $0x2] sm:$0x1] %v533_v46 }
 0x108   :  { %462 = vst [vmem:[%s639_s5 + $0x3] sm:$0x1] %v535_v47 }

</bundles_post_ra>
